<compile_context>
chip_gen: v6e
topology: v6e:2x2x1
jax: 0.10.0
libtpu: 0.0.40
codegen_flags: <defaults>
</compile_context>

<pallas_src>
import functools

import numpy as np

import jax
import jax.numpy as jnp
from jax import lax
from jax.experimental import pallas as pl
from jax.experimental.pallas import tpu as pltpu


_B = 2  # example batch size; mlp1 = 2*2*64 implies 28x28x1 inputs

# Layer geometry (input 28x28x1):
#   conv1: 3x3 s2 p1   1->16   28x28 -> 14x14  (196 positions)
#   conv2: 3x3 s2 p1  16->32   14x14 ->  7x7   ( 49 positions, padded to 56 rows)
#   conv3: 3x3 s2 p1  32->64    7x7  ->  4x4   ( 16 positions)
#   conv4: 2x2 s2 p0  64->64    4x4  ->  2x2   (  4 positions, padded to  8 rows)


# -----------------------------------------------------------------------------
# Single fused Pallas kernel (9 MXU dots for the whole batch)
# -----------------------------------------------------------------------------
def _cnn_fused_kernel(p1_ref, g2_ref, g3_ref, g4_ref,
                      w1_ref, w2_ref, w3_ref, w4_ref, wm1_ref, wm2_ref,
                      b_ref, out_ref, *, batch):
    f32 = jnp.float32

    def bias(row, width):
        return b_ref[row:row + 1, :width]

    def conv(a, g_ref, w_ref, bias_row, kk, ohow_pad, cout):
        # One gather dot covering all kernel offsets and all images, then one
        # deep-contraction weight dot (accumulation stays inside the MXU).
        r = jnp.dot(g_ref[...].astype(f32), a, preferred_element_type=f32)
        # Lane-concat the kk (ohow_pad, B*cin) row blocks -> (ohow_pad, kk*B*cin).
        x = jnp.concatenate(
            [r[t * ohow_pad:(t + 1) * ohow_pad, :] for t in range(kk)], axis=1)
        y = jnp.dot(x, w_ref[...], preferred_element_type=f32)
        return jnp.maximum(y + bias(bias_row, batch * cout), 0.0)

    # conv1: patches are host-built (cin == 1); batch folded into the lane dim.
    a1 = jnp.maximum(
        jnp.dot(p1_ref[...], w1_ref[...], preferred_element_type=f32)
        + bias(0, batch * 16), 0.0)                                 # (196, B*16)
    a2 = conv(a1, g2_ref, w2_ref, 1, kk=9, ohow_pad=56, cout=32)    # ( 56, B*32)
    a3 = conv(a2, g3_ref, w3_ref, 2, kk=9, ohow_pad=16, cout=64)    # ( 16, B*64)
    a4 = conv(a3, g4_ref, w4_ref, 3, kk=4, ohow_pad=8,  cout=64)    # (  8, B*64)

    # mlp1 (no ReLU, matching CNN.forward): lane-concat the 4 valid spatial rows
    # and contract once; the NCHW flatten order lives in wm1's row permutation.
    x5 = jnp.concatenate([a4[p:p + 1, :] for p in range(4)], axis=1)  # (1, 4*B*64)
    h = jnp.dot(x5, wm1_ref[...], preferred_element_type=f32) + bias(4, batch * 100)
    o = jnp.dot(h, wm2_ref[...], preferred_element_type=f32) + bias(5, batch * 10)
    out_ref[...] = o.astype(out_ref.dtype)


def _full_spec(shape):
    # block_shape == full array shape -> single VMEM-resident block per operand.
    return pl.BlockSpec(shape, lambda i: (0,) * len(shape))


def cnn_fused_call(p1, consts):
    g2, g3, g4, w1, w2, w3, w4, wm1, wm2, biases = consts
    batch = p1.shape[1] // 9
    operands = (p1, g2, g3, g4, w1, w2, w3, w4, wm1, wm2, biases)
    dots = [  # (m, k, n) of every MXU contraction, for the cost estimate
        (196, batch * 9, batch * 16),
        (g2.shape[0], 196, batch * 16), (56, 9 * batch * 16, batch * 32),
        (g3.shape[0], 56, batch * 32), (16, 9 * batch * 32, batch * 64),
        (g4.shape[0], 16, batch * 64), (8, 4 * batch * 64, batch * 64),
        (1, 4 * batch * 64, batch * 100), (1, batch * 100, batch * 10),
    ]
    flops = sum(2 * m * k * n for m, k, n in dots)
    bytes_accessed = sum(int(np.prod(a.shape)) * a.dtype.itemsize for a in operands)
    bytes_accessed += batch * 10 * 4
    kern = functools.partial(_cnn_fused_kernel, batch=batch)
    return pl.pallas_call(
        kern,
        out_shape=jax.ShapeDtypeStruct((1, batch * 10), jnp.float32),
        grid=(1,),
        in_specs=[_full_spec(a.shape) for a in operands],
        out_specs=_full_spec((1, batch * 10)),
        compiler_params=pltpu.CompilerParams(dimension_semantics=("arbitrary",)),
        cost_estimate=pl.CostEstimate(flops=flops, transcendentals=0,
                                      bytes_accessed=int(bytes_accessed)),
    )(*operands)


# -----------------------------------------------------------------------------
# Host-side (one-time) parameter preparation
# -----------------------------------------------------------------------------
def _gather_matrix(h_in, w_in, k, stride, pad, n_cols, ohow_pad):
    """(k*k*ohow_pad, n_cols) 0/1 matrix.  Row block t=(i,j) holds, for each output
    position (r, c), a one-hot row selecting input pixel (s*r+i-pad, s*c+j-pad);
    all-zero rows implement both zero padding and the 8-aligned ohow_pad padding."""
    oh = (h_in + 2 * pad - k) // stride + 1
    ow = (w_in + 2 * pad - k) // stride + 1
    g = np.zeros((k * k, ohow_pad, n_cols), np.float32)
    for i in range(k):
        for j in range(k):
            t = i * k + j
            for r in range(oh):
                for c in range(ow):
                    h = stride * r + i - pad
                    w = stride * c + j - pad
                    if 0 <= h < h_in and 0 <= w < w_in:
                        g[t, r * ow + c, h * w_in + w] = 1.0
    # bf16 is exact for 0/1 entries and halves the gather DMA/VMEM footprint.
    return jnp.asarray(g.reshape(k * k * ohow_pad, n_cols), dtype=jnp.bfloat16)


def prepare_params(params, batch):
    """Fold BN (eval mode) into conv weights/bias, build batch-block-diagonal matmul
    weights (batch lives in the lane dim), permute mlp1 rows to the kernel's
    (pos, batch, chan) order, pack all biases into one operand, and build the
    offset-stacked im2col gather matrices."""
    eps = 1e-5
    eye = jnp.eye(batch, dtype=jnp.float32)

    def conv_fold(p):
        w, b, gamma, beta, rmean, rvar = p                  # PyTorch layouts
        cout, cin, kh, kw = w.shape
        scale = gamma / jnp.sqrt(rvar + eps)
        w_mat = (jnp.transpose(w, (2, 3, 1, 0)).reshape(kh * kw * cin, cout)
                 * scale[None, :]).astype(jnp.float32)      # rows ordered (t, cin)
        bias = ((b - rmean) * scale + beta).reshape(1, cout).astype(jnp.float32)
        return w_mat, bias, kh * kw, cin, cout

    def conv_block_diag(w_mat, kk, cin, cout):
        # rows (t, b, cin) -> cols (b, cout); images share the MXU lanes.
        w3 = w_mat.reshape(kk, cin, cout)
        return jnp.einsum("tco,bB->tbcBo", w3, eye).reshape(
            kk * batch * cin, batch * cout).astype(jnp.float32)

    w1m, b1, _, _, _ = conv_fold(params["conv1"])
    w2m, b2, kk2, ci2, co2 = conv_fold(params["conv2"])
    w3m, b3, kk3, ci3, co3 = conv_fold(params["conv3"])
    w4m, b4, kk4, ci4, co4 = conv_fold(params["conv4"])

    # conv1 patches are laid out with lanes (b, t), hence b-major block diagonal.
    w1 = jnp.einsum("ko,bB->bkBo", w1m, eye).reshape(
        batch * 9, batch * 16).astype(jnp.float32)
    w2 = conv_block_diag(w2m, kk2, ci2, co2)
    w3 = conv_block_diag(w3m, kk3, ci3, co3)
    w4 = conv_block_diag(w4m, kk4, ci4, co4)

    # mlp1: torch flatten index (c*4 + p) -> kernel lane order (p, b, c).
    wm, bm1 = params["mlp1"]                                # (100, 256), (100,)
    wpc = jnp.transpose(wm.reshape(100, 64, 4), (2, 1, 0))  # (p, c, o)
    wm1 = jnp.einsum("pco,bB->pbcBo", wpc, eye).reshape(
        4 * batch * 64, batch * 100).astype(jnp.float32)

    wm2_t, bm2 = params["mlp2"]                             # (10, 100), (10,)
    wm2 = jnp.einsum("io,bB->biBo", wm2_t.T, eye).reshape(
        batch * 100, batch * 10).astype(jnp.float32)

    # All 6 biases (lane order (b, chan)) packed into one operand / DMA descriptor.
    bw = batch * 100
    def brow(v):
        v = jnp.tile(v.reshape(1, -1), (1, batch))
        return jnp.pad(v, ((0, 0), (0, bw - v.shape[1])))
    biases = jnp.concatenate(
        [brow(b1), brow(b2), brow(b3), brow(b4), brow(bm1), brow(bm2)],
        axis=0).astype(jnp.float32)                          # (6, B*100)

    g2 = _gather_matrix(14, 14, 3, 2, 1, n_cols=196, ohow_pad=56)  # (504, 196)
    g3 = _gather_matrix(7, 7, 3, 2, 1, n_cols=56, ohow_pad=16)     # (144,  56)
    g4 = _gather_matrix(4, 4, 2, 2, 0, n_cols=16, ohow_pad=8)      # ( 32,  16)

    return (g2, g3, g4, w1, w2, w3, w4, wm1, wm2, biases)


# -----------------------------------------------------------------------------
# Forward pass (only conv1's tiny im2col is XLA glue; the rest is one kernel)
# -----------------------------------------------------------------------------
def _im2col_conv1(x_nchw):
    """conv1 im2col: k=3, s=2, pad=1, cin=1 -> (196, B*9) with lane order (b, t)."""
    b = x_nchw.shape[0]
    x = jnp.transpose(x_nchw, (0, 2, 3, 1)).astype(jnp.float32)   # NHWC
    x = jnp.pad(x, ((0, 0), (1, 1), (1, 1), (0, 0)))              # (B, 30, 30, 1)
    cols = [x[:, i:i + 28:2, j:j + 28:2, 0] for i in range(3) for j in range(3)]
    p = jnp.stack(cols, axis=-1).reshape(b, 196, 9)               # rows (h, w)
    return jnp.transpose(p, (1, 0, 2)).reshape(196, b * 9)


@jax.jit
def cnn_forward(consts, x_nchw):
    batch = x_nchw.shape[0]
    p1 = _im2col_conv1(x_nchw)
    out = cnn_fused_call(p1, consts)
    return out.reshape(batch, 10)


# -----------------------------------------------------------------------------
# Pure-JAX reference (eval-mode BN) for a correctness check
# -----------------------------------------------------------------------------
def reference_forward(params, x):
    eps = 1e-5

    def block(p, x, stride, pad):
        w, b, gamma, beta, rmean, rvar = p
        y = lax.conv_general_dilated(
            x, w, (stride, stride), [(pad, pad), (pad, pad)],
            dimension_numbers=("NCHW", "OIHW", "NCHW"))
        y = y + b[None, :, None, None]
        y = ((y - rmean[None, :, None, None])
             / jnp.sqrt(rvar[None, :, None, None] + eps)
             * gamma[None, :, None, None] + beta[None, :, None, None])
        return jnp.maximum(y, 0.0)

    x = block(params["conv1"], x, 2, 1)
    x = block(params["conv2"], x, 2, 1)
    x = block(params["conv3"], x, 2, 1)
    x = block(params["conv4"], x, 2, 0)
    x = x.reshape(x.shape[0], -1)
    w, b = params["mlp1"]; x = x @ w.T + b
    w, b = params["mlp2"]; x = x @ w.T + b
    return x


# -----------------------------------------------------------------------------
# Deterministic parameter construction (shapes from CNN.__init__)
# -----------------------------------------------------------------------------
def init_params(key):
    def conv_block(key, cin, cout, k):
        ks = jax.random.split(key, 6)
        w = 0.1 * jax.random.normal(ks[0], (cout, cin, k, k), jnp.float32)
        b = 0.05 * jax.random.normal(ks[1], (cout,), jnp.float32)
        gamma = 1.0 + 0.1 * jax.random.normal(ks[2], (cout,), jnp.float32)
        beta = 0.05 * jax.random.normal(ks[3], (cout,), jnp.float32)
        rmean = 0.05 * jax.random.normal(ks[4], (cout,), jnp.float32)
        rvar = 1.0 + 0.1 * jnp.abs(jax.random.normal(ks[5], (cout,), jnp.float32))
        return (w, b, gamma, beta, rmean, rvar)

    def linear_block(key, fin, fout):
        k1, k2 = jax.random.split(key)
        w = 0.05 * jax.random.normal(k1, (fout, fin), jnp.float32)
        b = 0.05 * jax.random.normal(k2, (fout,), jnp.float32)
        return (w, b)

    keys = jax.random.split(key, 6)
    return {
        "conv1": conv_block(keys[0], 1, 16, 3),
        "conv2": conv_block(keys[1], 16, 32, 3),
        "conv3": conv_block(keys[2], 32, 64, 3),
        "conv4": conv_block(keys[3], 64, 64, 2),
        "mlp1": linear_block(keys[4], 2 * 2 * 64, 100),
        "mlp2": linear_block(keys[5], 100, 10),
    }


if __name__ == "__main__":
    key = jax.random.PRNGKey(0)
    k_params, k_input = jax.random.split(key)
    params = init_params(k_params)
    consts = prepare_params(params, _B)
    x = jax.random.normal(k_input, (_B, 1, 28, 28), jnp.float32)

    out = jax.block_until_ready(cnn_forward(consts, x))
    assert out.shape == (_B, 10)

    ref = reference_forward(params, x)
    err = float(jnp.max(jnp.abs(out - ref)))
    assert err < 1e-3, f"max abs error vs reference = {err}"
    print("KERNEL_OK")
</pallas_src>

<mosaic_0001>
module attributes {stable_mosaic.version = 11 : i64} {
  func.func @_cnn_fused_kernel(%arg0: i32, %arg1: memref<196x18xf32, #tpu.memory_space<vmem>>, %arg2: memref<504x196xbf16, #tpu.memory_space<vmem>>, %arg3: memref<144x56xbf16, #tpu.memory_space<vmem>>, %arg4: memref<32x16xbf16, #tpu.memory_space<vmem>>, %arg5: memref<18x32xf32, #tpu.memory_space<vmem>>, %arg6: memref<288x64xf32, #tpu.memory_space<vmem>>, %arg7: memref<576x128xf32, #tpu.memory_space<vmem>>, %arg8: memref<512x128xf32, #tpu.memory_space<vmem>>, %arg9: memref<512x200xf32, #tpu.memory_space<vmem>>, %arg10: memref<200x20xf32, #tpu.memory_space<vmem>>, %arg11: memref<6x200xf32, #tpu.memory_space<vmem>>, %arg12: memref<1x20xf32, #tpu.memory_space<vmem>>) attributes {dimension_semantics = [#tpu.dimension_semantics<arbitrary>], iteration_bounds = array<i64: 1>, scalar_prefetch = 0 : i64, scratch_operands = 0 : i64, tpu.core_type = #tpu.core_type<tc>, window_params = [{pipeline_mode = #tpu.pipeline_mode<synchronous>, transform_indices = @transform_0, window_bounds = array<i64: 196, 18>}, {pipeline_mode = #tpu.pipeline_mode<synchronous>, transform_indices = @transform_1, window_bounds = array<i64: 504, 196>}, {pipeline_mode = #tpu.pipeline_mode<synchronous>, transform_indices = @transform_2, window_bounds = array<i64: 144, 56>}, {pipeline_mode = #tpu.pipeline_mode<synchronous>, transform_indices = @transform_3, window_bounds = array<i64: 32, 16>}, {pipeline_mode = #tpu.pipeline_mode<synchronous>, transform_indices = @transform_4, window_bounds = array<i64: 18, 32>}, {pipeline_mode = #tpu.pipeline_mode<synchronous>, transform_indices = @transform_5, window_bounds = array<i64: 288, 64>}, {pipeline_mode = #tpu.pipeline_mode<synchronous>, transform_indices = @transform_6, window_bounds = array<i64: 576, 128>}, {pipeline_mode = #tpu.pipeline_mode<synchronous>, transform_indices = @transform_7, window_bounds = array<i64: 512, 128>}, {pipeline_mode = #tpu.pipeline_mode<synchronous>, transform_indices = @transform_8, window_bounds = array<i64: 512, 200>}, {pipeline_mode = #tpu.pipeline_mode<synchronous>, transform_indices = @transform_9, window_bounds = array<i64: 200, 20>}, {pipeline_mode = #tpu.pipeline_mode<synchronous>, transform_indices = @transform_10, window_bounds = array<i64: 6, 200>}, {pipeline_mode = #tpu.pipeline_mode<synchronous>, transform_indices = @transform_11, window_bounds = array<i64: 1, 20>}]} {
    %c0 = arith.constant 0 : index
    %c0_0 = arith.constant 0 : index
    %0 = vector.load %arg1[%c0, %c0_0] : memref<196x18xf32, #tpu.memory_space<vmem>>, vector<196x18xf32>
    %c0_1 = arith.constant 0 : index
    %c0_2 = arith.constant 0 : index
    %1 = vector.load %arg5[%c0_1, %c0_2] : memref<18x32xf32, #tpu.memory_space<vmem>>, vector<18x32xf32>
    %cst = arith.constant dense<0.000000e+00> : vector<196x32xf32>
    %2 = tpu.matmul %0, %1, %cst {dimension_numbers = #tpu.dot_dimension_numbers<[1], [0], [0], [1], [0, 0, 1, 1], [], []>} : vector<196x18xf32>, vector<18x32xf32>, vector<196x32xf32> -> vector<196x32xf32>
    %c0_3 = arith.constant 0 : index
    %c0_4 = arith.constant 0 : index
    %3 = vector.load %arg11[%c0_3, %c0_4] : memref<6x200xf32, #tpu.memory_space<vmem>>, vector<1x32xf32>
    %4 = vector.broadcast %3 : vector<1x32xf32> to vector<196x32xf32>
    %5 = arith.addf %2, %4 : vector<196x32xf32>
    %cst_5 = arith.constant 0.000000e+00 : f32
    %6 = vector.broadcast %cst_5 : f32 to vector<196x32xf32>
    %7 = arith.maximumf %5, %6 : vector<196x32xf32>
    %c0_6 = arith.constant 0 : index
    %c0_7 = arith.constant 0 : index
    %8 = vector.load %arg2[%c0_6, %c0_7] : memref<504x196xbf16, #tpu.memory_space<vmem>>, vector<504x196xbf16>
    %9 = arith.extf %8 : vector<504x196xbf16> to vector<504x196xf32>
    %cst_8 = arith.constant dense<0.000000e+00> : vector<504x32xf32>
    %10 = tpu.matmul %9, %7, %cst_8 {dimension_numbers = #tpu.dot_dimension_numbers<[1], [0], [0], [1], [0, 0, 1, 1], [], []>} : vector<504x196xf32>, vector<196x32xf32>, vector<504x32xf32> -> vector<504x32xf32>
    %11 = vector.extract_strided_slice %10 {offsets = [0, 0], sizes = [56, 32], strides = [1, 1]} : vector<504x32xf32> to vector<56x32xf32>
    %12 = vector.extract_strided_slice %10 {offsets = [56, 0], sizes = [56, 32], strides = [1, 1]} : vector<504x32xf32> to vector<56x32xf32>
    %13 = vector.extract_strided_slice %10 {offsets = [112, 0], sizes = [56, 32], strides = [1, 1]} : vector<504x32xf32> to vector<56x32xf32>
    %14 = vector.extract_strided_slice %10 {offsets = [168, 0], sizes = [56, 32], strides = [1, 1]} : vector<504x32xf32> to vector<56x32xf32>
    %15 = vector.extract_strided_slice %10 {offsets = [224, 0], sizes = [56, 32], strides = [1, 1]} : vector<504x32xf32> to vector<56x32xf32>
    %16 = vector.extract_strided_slice %10 {offsets = [280, 0], sizes = [56, 32], strides = [1, 1]} : vector<504x32xf32> to vector<56x32xf32>
    %17 = vector.extract_strided_slice %10 {offsets = [336, 0], sizes = [56, 32], strides = [1, 1]} : vector<504x32xf32> to vector<56x32xf32>
    %18 = vector.extract_strided_slice %10 {offsets = [392, 0], sizes = [56, 32], strides = [1, 1]} : vector<504x32xf32> to vector<56x32xf32>
    %19 = vector.extract_strided_slice %10 {offsets = [448, 0], sizes = [56, 32], strides = [1, 1]} : vector<504x32xf32> to vector<56x32xf32>
    %20 = tpu.concatenate %11, %12, %13, %14, %15, %16, %17, %18, %19 in 1 : vector<56x32xf32>, vector<56x32xf32>, vector<56x32xf32>, vector<56x32xf32>, vector<56x32xf32>, vector<56x32xf32>, vector<56x32xf32>, vector<56x32xf32>, vector<56x32xf32> -> vector<56x288xf32>
    %c0_9 = arith.constant 0 : index
    %c0_10 = arith.constant 0 : index
    %21 = vector.load %arg6[%c0_9, %c0_10] : memref<288x64xf32, #tpu.memory_space<vmem>>, vector<288x64xf32>
    %cst_11 = arith.constant dense<0.000000e+00> : vector<56x64xf32>
    %22 = tpu.matmul %20, %21, %cst_11 {dimension_numbers = #tpu.dot_dimension_numbers<[1], [0], [0], [1], [0, 0, 1, 1], [], []>} : vector<56x288xf32>, vector<288x64xf32>, vector<56x64xf32> -> vector<56x64xf32>
    %c1 = arith.constant 1 : index
    %c0_12 = arith.constant 0 : index
    %23 = vector.load %arg11[%c1, %c0_12] : memref<6x200xf32, #tpu.memory_space<vmem>>, vector<1x64xf32>
    %24 = vector.broadcast %23 : vector<1x64xf32> to vector<56x64xf32>
    %25 = arith.addf %22, %24 : vector<56x64xf32>
    %cst_13 = arith.constant 0.000000e+00 : f32
    %26 = vector.broadcast %cst_13 : f32 to vector<56x64xf32>
    %27 = arith.maximumf %25, %26 : vector<56x64xf32>
    %c0_14 = arith.constant 0 : index
    %c0_15 = arith.constant 0 : index
    %28 = vector.load %arg3[%c0_14, %c0_15] : memref<144x56xbf16, #tpu.memory_space<vmem>>, vector<144x56xbf16>
    %29 = arith.extf %28 : vector<144x56xbf16> to vector<144x56xf32>
    %cst_16 = arith.constant dense<0.000000e+00> : vector<144x64xf32>
    %30 = tpu.matmul %29, %27, %cst_16 {dimension_numbers = #tpu.dot_dimension_numbers<[1], [0], [0], [1], [0, 0, 1, 1], [], []>} : vector<144x56xf32>, vector<56x64xf32>, vector<144x64xf32> -> vector<144x64xf32>
    %31 = vector.extract_strided_slice %30 {offsets = [0, 0], sizes = [16, 64], strides = [1, 1]} : vector<144x64xf32> to vector<16x64xf32>
    %32 = vector.extract_strided_slice %30 {offsets = [16, 0], sizes = [16, 64], strides = [1, 1]} : vector<144x64xf32> to vector<16x64xf32>
    %33 = vector.extract_strided_slice %30 {offsets = [32, 0], sizes = [16, 64], strides = [1, 1]} : vector<144x64xf32> to vector<16x64xf32>
    %34 = vector.extract_strided_slice %30 {offsets = [48, 0], sizes = [16, 64], strides = [1, 1]} : vector<144x64xf32> to vector<16x64xf32>
    %35 = vector.extract_strided_slice %30 {offsets = [64, 0], sizes = [16, 64], strides = [1, 1]} : vector<144x64xf32> to vector<16x64xf32>
    %36 = vector.extract_strided_slice %30 {offsets = [80, 0], sizes = [16, 64], strides = [1, 1]} : vector<144x64xf32> to vector<16x64xf32>
    %37 = vector.extract_strided_slice %30 {offsets = [96, 0], sizes = [16, 64], strides = [1, 1]} : vector<144x64xf32> to vector<16x64xf32>
    %38 = vector.extract_strided_slice %30 {offsets = [112, 0], sizes = [16, 64], strides = [1, 1]} : vector<144x64xf32> to vector<16x64xf32>
    %39 = vector.extract_strided_slice %30 {offsets = [128, 0], sizes = [16, 64], strides = [1, 1]} : vector<144x64xf32> to vector<16x64xf32>
    %40 = tpu.concatenate %31, %32, %33, %34, %35, %36, %37, %38, %39 in 1 : vector<16x64xf32>, vector<16x64xf32>, vector<16x64xf32>, vector<16x64xf32>, vector<16x64xf32>, vector<16x64xf32>, vector<16x64xf32>, vector<16x64xf32>, vector<16x64xf32> -> vector<16x576xf32>
    %c0_17 = arith.constant 0 : index
    %c0_18 = arith.constant 0 : index
    %41 = vector.load %arg7[%c0_17, %c0_18] : memref<576x128xf32, #tpu.memory_space<vmem>>, vector<576x128xf32>
    %cst_19 = arith.constant dense<0.000000e+00> : vector<16x128xf32>
    %42 = tpu.matmul %40, %41, %cst_19 {dimension_numbers = #tpu.dot_dimension_numbers<[1], [0], [0], [1], [0, 0, 1, 1], [], []>} : vector<16x576xf32>, vector<576x128xf32>, vector<16x128xf32> -> vector<16x128xf32>
    %c2 = arith.constant 2 : index
    %c0_20 = arith.constant 0 : index
    %43 = vector.load %arg11[%c2, %c0_20] : memref<6x200xf32, #tpu.memory_space<vmem>>, vector<1x128xf32>
    %44 = vector.broadcast %43 : vector<1x128xf32> to vector<16x128xf32>
    %45 = arith.addf %42, %44 : vector<16x128xf32>
    %cst_21 = arith.constant 0.000000e+00 : f32
    %46 = vector.broadcast %cst_21 : f32 to vector<16x128xf32>
    %47 = arith.maximumf %45, %46 : vector<16x128xf32>
    %c0_22 = arith.constant 0 : index
    %c0_23 = arith.constant 0 : index
    %48 = vector.load %arg4[%c0_22, %c0_23] : memref<32x16xbf16, #tpu.memory_space<vmem>>, vector<32x16xbf16>
    %49 = arith.extf %48 : vector<32x16xbf16> to vector<32x16xf32>
    %cst_24 = arith.constant dense<0.000000e+00> : vector<32x128xf32>
    %50 = tpu.matmul %49, %47, %cst_24 {dimension_numbers = #tpu.dot_dimension_numbers<[1], [0], [0], [1], [0, 0, 1, 1], [], []>} : vector<32x16xf32>, vector<16x128xf32>, vector<32x128xf32> -> vector<32x128xf32>
    %51 = vector.extract_strided_slice %50 {offsets = [0, 0], sizes = [8, 128], strides = [1, 1]} : vector<32x128xf32> to vector<8x128xf32>
    %52 = vector.extract_strided_slice %50 {offsets = [8, 0], sizes = [8, 128], strides = [1, 1]} : vector<32x128xf32> to vector<8x128xf32>
    %53 = vector.extract_strided_slice %50 {offsets = [16, 0], sizes = [8, 128], strides = [1, 1]} : vector<32x128xf32> to vector<8x128xf32>
    %54 = vector.extract_strided_slice %50 {offsets = [24, 0], sizes = [8, 128], strides = [1, 1]} : vector<32x128xf32> to vector<8x128xf32>
    %55 = tpu.concatenate %51, %52, %53, %54 in 1 : vector<8x128xf32>, vector<8x128xf32>, vector<8x128xf32>, vector<8x128xf32> -> vector<8x512xf32>
    %c0_25 = arith.constant 0 : index
    %c0_26 = arith.constant 0 : index
    %56 = vector.load %arg8[%c0_25, %c0_26] : memref<512x128xf32, #tpu.memory_space<vmem>>, vector<512x128xf32>
    %cst_27 = arith.constant dense<0.000000e+00> : vector<8x128xf32>
    %57 = tpu.matmul %55, %56, %cst_27 {dimension_numbers = #tpu.dot_dimension_numbers<[1], [0], [0], [1], [0, 0, 1, 1], [], []>} : vector<8x512xf32>, vector<512x128xf32>, vector<8x128xf32> -> vector<8x128xf32>
    %c3 = arith.constant 3 : index
    %c0_28 = arith.constant 0 : index
    %58 = vector.load %arg11[%c3, %c0_28] : memref<6x200xf32, #tpu.memory_space<vmem>>, vector<1x128xf32>
    %59 = vector.broadcast %58 : vector<1x128xf32> to vector<8x128xf32>
    %60 = arith.addf %57, %59 : vector<8x128xf32>
    %cst_29 = arith.constant 0.000000e+00 : f32
    %61 = vector.broadcast %cst_29 : f32 to vector<8x128xf32>
    %62 = arith.maximumf %60, %61 : vector<8x128xf32>
    %63 = vector.extract_strided_slice %62 {offsets = [0, 0], sizes = [1, 128], strides = [1, 1]} : vector<8x128xf32> to vector<1x128xf32>
    %64 = vector.extract_strided_slice %62 {offsets = [1, 0], sizes = [1, 128], strides = [1, 1]} : vector<8x128xf32> to vector<1x128xf32>
    %65 = vector.extract_strided_slice %62 {offsets = [2, 0], sizes = [1, 128], strides = [1, 1]} : vector<8x128xf32> to vector<1x128xf32>
    %66 = vector.extract_strided_slice %62 {offsets = [3, 0], sizes = [1, 128], strides = [1, 1]} : vector<8x128xf32> to vector<1x128xf32>
    %67 = tpu.concatenate %63, %64, %65, %66 in 1 : vector<1x128xf32>, vector<1x128xf32>, vector<1x128xf32>, vector<1x128xf32> -> vector<1x512xf32>
    %c0_30 = arith.constant 0 : index
    %c0_31 = arith.constant 0 : index
    %68 = vector.load %arg9[%c0_30, %c0_31] : memref<512x200xf32, #tpu.memory_space<vmem>>, vector<512x200xf32>
    %cst_32 = arith.constant dense<0.000000e+00> : vector<1x200xf32>
    %69 = tpu.matmul %67, %68, %cst_32 {dimension_numbers = #tpu.dot_dimension_numbers<[1], [0], [0], [1], [0, 0, 1, 1], [], []>} : vector<1x512xf32>, vector<512x200xf32>, vector<1x200xf32> -> vector<1x200xf32>
    %c4 = arith.constant 4 : index
    %c0_33 = arith.constant 0 : index
    %70 = vector.load %arg11[%c4, %c0_33] : memref<6x200xf32, #tpu.memory_space<vmem>>, vector<1x200xf32>
    %71 = arith.addf %69, %70 : vector<1x200xf32>
    %c0_34 = arith.constant 0 : index
    %c0_35 = arith.constant 0 : index
    %72 = vector.load %arg10[%c0_34, %c0_35] : memref<200x20xf32, #tpu.memory_space<vmem>>, vector<200x20xf32>
    %cst_36 = arith.constant dense<0.000000e+00> : vector<1x20xf32>
    %73 = tpu.matmul %71, %72, %cst_36 {dimension_numbers = #tpu.dot_dimension_numbers<[1], [0], [0], [1], [0, 0, 1, 1], [], []>} : vector<1x200xf32>, vector<200x20xf32>, vector<1x20xf32> -> vector<1x20xf32>
    %c5 = arith.constant 5 : index
    %c0_37 = arith.constant 0 : index
    %74 = vector.load %arg11[%c5, %c0_37] : memref<6x200xf32, #tpu.memory_space<vmem>>, vector<1x20xf32>
    %75 = arith.addf %73, %74 : vector<1x20xf32>
    %c0_38 = arith.constant 0 : index
    %c0_39 = arith.constant 0 : index
    %76 = vector.load %arg12[%c0_38, %c0_39] : memref<1x20xf32, #tpu.memory_space<vmem>>, vector<1x20xf32>
    tpu.vector_store %arg12[%c0_38, %c0_39], %75 {strides = array<i32>} : memref<1x20xf32, #tpu.memory_space<vmem>>, vector<1x20xf32>,
    return
  }
  func.func @transform_0(%arg0: i32) -> (i32, i32) {
    %c0_i32 = arith.constant 0 : i32
    %c0_i32_0 = arith.constant 0 : i32
    %c0_i32_1 = arith.constant 0 : i32
    return %c0_i32, %c0_i32_0 : i32, i32
  }
  func.func @transform_1(%arg0: i32) -> (i32, i32) {
    %c0_i32 = arith.constant 0 : i32
    %c0_i32_0 = arith.constant 0 : i32
    %c0_i32_1 = arith.constant 0 : i32
    return %c0_i32, %c0_i32_0 : i32, i32
  }
  func.func @transform_2(%arg0: i32) -> (i32, i32) {
    %c0_i32 = arith.constant 0 : i32
    %c0_i32_0 = arith.constant 0 : i32
    %c0_i32_1 = arith.constant 0 : i32
    return %c0_i32, %c0_i32_0 : i32, i32
  }
  func.func @transform_3(%arg0: i32) -> (i32, i32) {
    %c0_i32 = arith.constant 0 : i32
    %c0_i32_0 = arith.constant 0 : i32
    %c0_i32_1 = arith.constant 0 : i32
    return %c0_i32, %c0_i32_0 : i32, i32
  }
  func.func @transform_4(%arg0: i32) -> (i32, i32) {
    %c0_i32 = arith.constant 0 : i32
    %c0_i32_0 = arith.constant 0 : i32
    %c0_i32_1 = arith.constant 0 : i32
    return %c0_i32, %c0_i32_0 : i32, i32
  }
  func.func @transform_5(%arg0: i32) -> (i32, i32) {
    %c0_i32 = arith.constant 0 : i32
    %c0_i32_0 = arith.constant 0 : i32
    %c0_i32_1 = arith.constant 0 : i32
    return %c0_i32, %c0_i32_0 : i32, i32
  }
  func.func @transform_6(%arg0: i32) -> (i32, i32) {
    %c0_i32 = arith.constant 0 : i32
    %c0_i32_0 = arith.constant 0 : i32
    %c0_i32_1 = arith.constant 0 : i32
    return %c0_i32, %c0_i32_0 : i32, i32
  }
  func.func @transform_7(%arg0: i32) -> (i32, i32) {
    %c0_i32 = arith.constant 0 : i32
    %c0_i32_0 = arith.constant 0 : i32
    %c0_i32_1 = arith.constant 0 : i32
    return %c0_i32, %c0_i32_0 : i32, i32
  }
  func.func @transform_8(%arg0: i32) -> (i32, i32) {
    %c0_i32 = arith.constant 0 : i32
    %c0_i32_0 = arith.constant 0 : i32
    %c0_i32_1 = arith.constant 0 : i32
    return %c0_i32, %c0_i32_0 : i32, i32
  }
  func.func @transform_9(%arg0: i32) -> (i32, i32) {
    %c0_i32 = arith.constant 0 : i32
    %c0_i32_0 = arith.constant 0 : i32
    %c0_i32_1 = arith.constant 0 : i32
    return %c0_i32, %c0_i32_0 : i32, i32
  }
  func.func @transform_10(%arg0: i32) -> (i32, i32) {
    %c0_i32 = arith.constant 0 : i32
    %c0_i32_0 = arith.constant 0 : i32
    %c0_i32_1 = arith.constant 0 : i32
    return %c0_i32, %c0_i32_0 : i32, i32
  }
  func.func @transform_11(%arg0: i32) -> (i32, i32) {
    %c0_i32 = arith.constant 0 : i32
    %c0_i32_0 = arith.constant 0 : i32
    %c0_i32_1 = arith.constant 0 : i32
    return %c0_i32, %c0_i32_0 : i32, i32
  }
}

</mosaic_0001>

<bundles_post_ra>
// kernel: cnn_forward.1
= control target key start
LH: loop header
LB: loop body
LE: loop exit
PB: predicated region body
PF: predicated region fallthrough
CT: control target
= control target key end

     0   :  { %vm143_vm0 = vcmask 1041408   ;;  %v3674_v0 = vmov 0.0   ;;  %vm3675_vm1 = vmmov 0   ;;  %vm67_vm2 = vcmask 146432   ;;  %s3677_s25 = smov 64   ;;  %s3678_s17 = smov 96   ;;  %s5564_s4 = inlined_call_operand.vmem [shape: f32[18,32], index: 4, kind: input, shape index: {}]   ;;  %s5565_s0 = inlined_call_operand.vmem [shape: f32[196,18], index: 0, kind: input, shape index: {}]   ;;  %s5566_s1 = inlined_call_operand.vmem [shape: bf16[504,196], index: 1, kind: input, shape index: {}]   ;;  %s5567_s10 = inlined_call_operand.vmem [shape: f32[6,200], index: 10, kind: input, shape index: {}]   ;;  %s5568_s5 = inlined_call_operand.vmem [shape: f32[288,64], index: 5, kind: input, shape index: {}]   ;;  %s5569_s2 = inlined_call_operand.vmem [shape: bf16[144,56], index: 2, kind: input, shape index: {}]   ;;  %s5570_s6 = inlined_call_operand.vmem [shape: f32[576,128], index: 6, kind: input, shape index: {}]   ;;  %s5571_s3 = inlined_call_operand.vmem [shape: bf16[32,16], index: 3, kind: input, shape index: {}]   ;;  %s5572_s7 = inlined_call_operand.vmem [shape: f32[512,128], index: 7, kind: input, shape index: {}]   ;;  %s5573_s8 = inlined_call_operand.vmem [shape: f32[512,200], index: 8, kind: input, shape index: {}]   ;;  %s5574_s9 = inlined_call_operand.vmem [shape: f32[200,20], index: 9, kind: input, shape index: {}]   ;;  %s5575_s11 = inlined_call_operand.vmem [shape: f32[1,20], index: 11, kind: output, shape index: {}]  }
   0x1   :  { %3538 = vmatprep.subr.mxu1 %v3674_v0  ;;  %v65_v1 = vld [vmem:[%s5564_s4 + $0x10] sm:$0x3]  ;;  %v64_v2 = vld [vmem:[%s5564_s4 + $0x8] sm:$0xff]  ;;  %3388 = vmatprep.mubr.msk.f32.mxu1 %vm3675_vm1, %v3674_v0  ;;  %v63_v3 = vld [vmem:[%s5564_s4] sm:$0xff]  ;;  %vm551_vm3 = vcmask 556032   ;;  %vm741_vm4 = vcmask 1043456  }
   0x2   :  { %3541 = vmatpush3.msk.msra.mxu1 %vm143_vm0, %v65_v1  ;;  %3358 = vmatprep.subr.mxu0 %v3674_v0  ;;  %v46_v4 = vld [vmem:[%s5565_s0 + $0x40] sm:$0xff]  ;;  %v47_v6 = vld [vmem:[%s5565_s0 + $0x48] sm:$0xff]  ;;  %v48_v8 = vld [vmem:[%s5565_s0 + $0x50] sm:$0xff]  ;;  %vm1293_vm5 = vcmask 261120   ;;  %vm1301_vm6 = vcmask 523264   ;;  %vm1309_vm7 = vcmask 785408  }
   0x3   :  { %3539 = vmatprep.subr.mxu1 %v3674_v0  ;;  %3359 = vmatpush3.msk.msra.mxu0 %vm143_vm0, %v65_v1  ;;  %v38_v5 = vld [vmem:[%s5565_s0] sm:$0xff]  ;;  %v39_v7 = vld [vmem:[%s5565_s0 + $0x8] sm:$0xff]  ;;  %v40_v9 = vld [vmem:[%s5565_s0 + $0x10] sm:$0xff]  ;;  %vm1639_vm8 = vcmask 457728   ;;  %vm2203_vm9 = vcmask 130048   ;;  %vm2823_vm10 = vcmask 588800  }
   0x4   :  { %3542 = vmatpush3.msra.mxu1 %v64_v2  ;;  %3360 = vmatprep.subr.mxu0 %v3674_v0  ;;  %v49_v10 = vld [vmem:[%s5565_s0 + $0x58] sm:$0xff]  ;;  %v50_v12 = vld [vmem:[%s5565_s0 + $0x60] sm:$0xff]  ;;  %v51_v14 = vld [vmem:[%s5565_s0 + $0x68] sm:$0xff]  ;;  %vm2897_vm11 = vcmask 155648  }
   0x5   :  { %3540 = vmatprep.subr.mxu1 %v3674_v0  ;;  %3361 = vmatpush3.msra.mxu0 %v64_v2  ;;  %v41_v11 = vld [vmem:[%s5565_s0 + $0x18] sm:$0xff]  ;;  %v42_v13 = vld [vmem:[%s5565_s0 + $0x20] sm:$0xff]  ;;  %v43_v15 = vld [vmem:[%s5565_s0 + $0x28] sm:$0xff] }
   0x6   :  { %3543 = vmatpush3.msra.mxu1 %v63_v3  ;;  %3362 = vmatprep.subr.mxu0 %v3674_v0  ;;  %v52_v16 = vld [vmem:[%s5565_s0 + $0x70] sm:$0xff]  ;;  %v53_v18 = vld [vmem:[%s5565_s0 + $0x78] sm:$0xff]  ;;  %v54_v20 = vld [vmem:[%s5565_s0 + $0x80] sm:$0xff] }
   0x7   :  { %3389 = vmatmul.mubr.msk.f32.vlgmr.msra.gmra.mxu1 %vm67_vm2, %v46_v4  ;;  %3363 = vmatpush3.msra.mxu0 %v63_v3  ;;  %v44_v17 = vld [vmem:[%s5565_s0 + $0x30] sm:$0xff]  ;;  %v45_v19 = vld [vmem:[%s5565_s0 + $0x38] sm:$0xff]  ;;  %v55_v21 = vld [vmem:[%s5565_s0 + $0x88] sm:$0xff] }
   0x8   :  { %3391 = vmatprep.mubr.msk.f32.mxu1 %vm3675_vm1, %v3674_v0  ;;  %3364 = vmatprep.mubr.msk.f32.mxu0 %vm3675_vm1, %v3674_v0  ;;  %v56_v22 = vld [vmem:[%s5565_s0 + $0x90] sm:$0xff]  ;;  %v57_v23 = vld [vmem:[%s5565_s0 + $0x98] sm:$0xff]  ;;  %v58_v24 = vld [vmem:[%s5565_s0 + $0xa0] sm:$0xff] }
   0x9   :  { %3365 = vmatmul.mubr.msk.f32.vlgmr.msra.gmra.mxu0 %vm67_vm2, %v38_v5  ;;  %745 = vmatprep.subr.mxu1 %v3674_v0  ;;  %v59_v25 = vld [vmem:[%s5565_s0 + $0xa8] sm:$0xff]  ;;  %v60_v26 = vld [vmem:[%s5565_s0 + $0xb0] sm:$0xff]  ;;  %v61_v27 = vld [vmem:[%s5565_s0 + $0xb8] sm:$0xff] }
   0xa   :  { %3367 = vmatprep.mubr.msk.f32.mxu0 %vm3675_vm1, %v3674_v0  ;;  %v62_v28 = vld [vmem:[%s5565_s0 + $0xc0] sm:$0xf] }
   0xb   :  { %3392 = vmatmul.mubr.msk.f32.gmra.mxu1 %vm67_vm2, %v47_v6  ;;  %v3908_v29 = vld [vmem:[%s5566_s1] sm:$0xff] }
   0xc   :  { %3394 = vmatprep.mubr.msk.f32.mxu1 %vm3675_vm1, %v3674_v0  ;;  %v426_v30 = vunpack.c.h.bf16 %v3908_v29  ;;  %v3923_v58 = vld [vmem:[%s5567_s10] ss:$0 sm:$0xff] }
   0xd   :  { %3368 = vmatmul.mubr.msk.f32.gmra.mxu0 %vm67_vm2, %v39_v7 }
   0xe   :  { %3370 = vmatprep.mubr.msk.f32.mxu0 %vm3675_vm1, %v3674_v0 }
   0xf   :  { %3395 = vmatmul.mubr.msk.f32.gmra.mxu1 %vm67_vm2, %v48_v8 }
  0x10   :  { %3397 = vmatprep.mubr.msk.f32.mxu1 %vm3675_vm1, %v3674_v0 }
  0x11   :  { %3371 = vmatmul.mubr.msk.f32.gmra.mxu0 %vm67_vm2, %v40_v9 }
  0x12   :  { %3373 = vmatprep.mubr.msk.f32.mxu0 %vm3675_vm1, %v3674_v0 }
  0x13   :  { %3398 = vmatmul.mubr.msk.f32.gmra.mxu1 %vm67_vm2, %v49_v10 }
  0x14   :  { %3400 = vmatprep.mubr.msk.f32.mxu1 %vm3675_vm1, %v3674_v0 }
  0x15   :  { %3374 = vmatmul.mubr.msk.f32.gmra.mxu0 %vm67_vm2, %v41_v11 }
  0x16   :  { %3376 = vmatprep.mubr.msk.f32.mxu0 %vm3675_vm1, %v3674_v0 }
  0x17   :  { %3401 = vmatmul.mubr.msk.f32.gmra.mxu1 %vm67_vm2, %v50_v12 }
  0x18   :  { %3403 = vmatprep.mubr.msk.f32.mxu1 %vm3675_vm1, %v3674_v0 }
  0x19   :  { %3377 = vmatmul.mubr.msk.f32.gmra.mxu0 %vm67_vm2, %v42_v13 }
  0x1a   :  { %3379 = vmatprep.mubr.msk.f32.mxu0 %vm3675_vm1, %v3674_v0 }
  0x1b   :  { %3404 = vmatmul.mubr.msk.f32.gmra.mxu1 %vm67_vm2, %v51_v14 }
  0x1c   :  { %3406 = vmatprep.mubr.msk.f32.mxu1 %vm3675_vm1, %v3674_v0 }
  0x1d   :  { %3380 = vmatmul.mubr.msk.f32.gmra.mxu0 %vm67_vm2, %v43_v15 }
  0x1e   :  { %3382 = vmatprep.mubr.msk.f32.mxu0 %vm3675_vm1, %v3674_v0 }
  0x1f   :  { %3407 = vmatmul.mubr.msk.f32.gmra.mxu1 %vm67_vm2, %v52_v16 }
  0x20   :  { %3409 = vmatprep.mubr.msk.f32.mxu1 %vm3675_vm1, %v3674_v0 }
  0x21   :  { %3383 = vmatmul.mubr.msk.f32.gmra.mxu0 %vm67_vm2, %v44_v17 }
  0x22   :  { %3385 = vmatprep.mubr.msk.f32.mxu0 %vm3675_vm1, %v3674_v0 }
  0x23   :  { %3410 = vmatmul.mubr.msk.f32.gmra.mxu1 %vm67_vm2, %v53_v18 }
  0x24   :  { %3412 = vmatprep.mubr.msk.f32.mxu1 %vm3675_vm1, %v3674_v0 }
  0x25   :  { %3386 = vmatmul.mubr.msk.f32.gmra.mxu0 %vm67_vm2, %v45_v19 }
  0x27   :  { %3413 = vmatmul.mubr.msk.f32.gmra.mxu1 %vm67_vm2, %v54_v20 }
  0x28   :  { %3415 = vmatprep.mubr.msk.f32.mxu1 %vm3675_vm1, %v3674_v0 }
  0x2b   :  { %3416 = vmatmul.mubr.msk.f32.gmra.mxu1 %vm67_vm2, %v55_v21 }
  0x2c   :  { %3418 = vmatprep.mubr.msk.f32.mxu1 %vm3675_vm1, %v3674_v0 }
  0x2f   :  { %3419 = vmatmul.mubr.msk.f32.gmra.mxu1 %vm67_vm2, %v56_v22 }
  0x30   :  { %3421 = vmatprep.mubr.msk.f32.mxu1 %vm3675_vm1, %v3674_v0 }
  0x33   :  { %3422 = vmatmul.mubr.msk.f32.gmra.mxu1 %vm67_vm2, %v57_v23 }
  0x34   :  { %3424 = vmatprep.mubr.msk.f32.mxu1 %vm3675_vm1, %v3674_v0 }
  0x37   :  { %3425 = vmatmul.mubr.msk.f32.gmra.mxu1 %vm67_vm2, %v58_v24 }
  0x38   :  { %3427 = vmatprep.mubr.msk.f32.mxu1 %vm3675_vm1, %v3674_v0 }
  0x3b   :  { %3428 = vmatmul.mubr.msk.f32.gmra.mxu1 %vm67_vm2, %v59_v25 }
  0x3c   :  { %3430 = vmatprep.mubr.msk.f32.mxu1 %vm3675_vm1, %v3674_v0 }
  0x3f   :  { %3431 = vmatmul.mubr.msk.f32.gmra.mxu1 %vm67_vm2, %v60_v26 }
  0x40   :  { %3433 = vmatprep.mubr.msk.f32.mxu1 %vm3675_vm1, %v3674_v0 }
  0x43   :  { %3434 = vmatmul.mubr.msk.f32.gmra.mxu1 %vm67_vm2, %v61_v27 }
  0x44   :  { %3436 = vmatprep.mubr.msk.f32.mxu1 %vm3675_vm1, %v3674_v0 }
  0x47   :  { %3437 = vmatmul.mubr.msk.f32.gmra.mxu1 %vm67_vm2, %v62_v28 }
  0x48   :  { %2930 = vmatprep.mubr.msk.f32.mxu1 %vm551_vm3, %v426_v30 }
  0xc7   :  { %v253_v31 = vpop.f32.mrf.mxu1 }
  0xc8   :  { %v254_v18 = vadd.f32 %v253_v31, %v3923_v58 }
  0xc9   :  { %v3390_v32 = vpop.f32.mrf.mxu1  ;;  %v3912_v33 = vpop.f32.mrf.mxu0 }
  0xca   :  { %v345_v24 = vmax.f32 %v254_v18, 0.0  ;;  %v367_v18 = vld [vmem:[%s5566_s1 + $0x28] sm:$0xff] }
  0xcb   :  { %v258_v34 = vpop.f32.mrf.mxu1  ;;  %v3366_v35 = vpop.f32.mrf.mxu0 }
  0xcc   :  { %v259_v15 = vadd.f32 %v258_v34, %v3923_v58 }
  0xcd   :  { %v3393_v36 = vpop.f32.mrf.mxu1  ;;  %v3914_v37 = vpop.f32.mrf.mxu0 }
  0xce   :  { %v346_v22 = vmax.f32 %v259_v15, 0.0  ;;  %v366_v15 = vld [vmem:[%s5566_s1 + $0x20] sm:$0xff] }
  0xcf   :  { %v263_v38 = vpop.f32.mrf.mxu1  ;;  %v3369_v39 = vpop.f32.mrf.mxu0 }
  0xd0   :  { %v264_v12 = vadd.f32 %v263_v38, %v3923_v58 }
  0xd1   :  { %v3396_v40 = vpop.f32.mrf.mxu1  ;;  %v3916_v41 = vpop.f32.mrf.mxu0 }
  0xd2   :  { %v347_v19 = vmax.f32 %v264_v12, 0.0  ;;  %v224_v39 = vadd.f32 %v3916_v41, %v3923_v58 }
  0xd3   :  { %v268_v42 = vpop.f32.mrf.mxu1  ;;  %v3372_v43 = vpop.f32.mrf.mxu0 }
  0xd4   :  { %v269_v9 = vadd.f32 %v268_v42, %v3923_v58  ;;  %v219_v43 = vadd.f32 %v3914_v37, %v3923_v58 }
  0xd5   :  { %v3399_v44 = vpop.f32.mrf.mxu1  ;;  %v3918_v45 = vpop.f32.mrf.mxu0 }
  0xd6   :  { %v348_v16 = vmax.f32 %v269_v9, 0.0  ;;  %v229_v35 = vadd.f32 %v3918_v45, %v3923_v58  ;;  %v214_v45 = vadd.f32 %v3912_v33, %v3923_v58  ;;  %v338_v41 = vmax.f32 %v219_v43, 0.0  ;;  %v374_v43 = vld [vmem:[%s5566_s1 + $0x60] sm:$0xff] }
  0xd7   :  { %v273_v46 = vpop.f32.mrf.mxu1  ;;  %v3375_v47 = vpop.f32.mrf.mxu0  ;;  %v425_v9 = vunpack.c.l.bf16 %v3908_v29 }
  0xd8   :  { %v274_v6 = vadd.f32 %v273_v46, %v3923_v58  ;;  %v340_v44 = vmax.f32 %v229_v35, 0.0  ;;  %v339_v47 = vmax.f32 %v224_v39, 0.0  ;;  %v372_v35 = vld [vmem:[%s5566_s1 + $0x50] sm:$0xff]  ;;  %v373_v39 = vld [vmem:[%s5566_s1 + $0x58] sm:$0xff] }
  0xd9   :  { %v3402_v48 = vpop.f32.mrf.mxu1  ;;  %v233_v49 = vpop.f32.mrf.mxu0 }
  0xda   :  { %v349_v13 = vmax.f32 %v274_v6, 0.0  ;;  %v234_v31 = vadd.f32 %v233_v49, %v3923_v58 }
  0xdb   :  { %v278_v50 = vpop.f32.mrf.mxu1  ;;  %v3378_v51 = vpop.f32.mrf.mxu0 }
  0xdc   :  { %v279_v2 = vadd.f32 %v278_v50, %v3923_v58  ;;  %v341_v40 = vmax.f32 %v234_v31, 0.0  ;;  %v337_v50 = vmax.f32 %v214_v45, 0.0  ;;  %v371_v31 = vld [vmem:[%s5566_s1 + $0x48] sm:$0xff] }
  0xdd   :  { %v3405_v52 = vpop.f32.mrf.mxu1  ;;  %v238_v53 = vpop.f32.mrf.mxu0  ;;  %v375_v45 = vld [vmem:[%s5566_s1 + $0x68] sm:$0xff] }
  0xde   :  { %v350_v10 = vmax.f32 %v279_v2, 0.0  ;;  %v239_v28 = vadd.f32 %v238_v53, %v3923_v58 }
  0xdf   :  { %v283_v54 = vpop.f32.mrf.mxu1  ;;  %v3381_v55 = vpop.f32.mrf.mxu0 }
  0xe0   :  { %v284_v61 = vadd.f32 %v283_v54, %v3923_v58  ;;  %v342_v36 = vmax.f32 %v239_v28, 0.0 }
  0xe1   :  { %v3408_v56 = vpop.f32.mrf.mxu1  ;;  %v243_v57 = vpop.f32.mrf.mxu0 }
  0xe2   :  { %v351_v7 = vmax.f32 %v284_v61, 0.0  ;;  %v244_v25 = vadd.f32 %v243_v57, %v3923_v58 }
  0xe3   :  { %v288_v59 = vpop.f32.mrf.mxu1  ;;  %v3384_v60 = vpop.f32.mrf.mxu0 }
  0xe4   :  { %v289_v62 = vadd.f32 %v288_v59, %v3923_v58  ;;  %v343_v32 = vmax.f32 %v244_v25, 0.0 }
  0xe5   :  { %v3411_v63 = vpop.f32.mrf.mxu1  ;;  %v248_v1 = vpop.f32.mrf.mxu0 }
  0xe6   :  { %v352_v3 = vmax.f32 %v289_v62, 0.0  ;;  %v249_v20 = vadd.f32 %v248_v1, %v3923_v58 }
  0xe7   :  { %v3928_v4 = vpop.f32.mrf.mxu1  ;;  %v3387_v5 = vpop.f32.mrf.mxu0 }
  0xe8   :  { %746 = vmatpush1.msra.mxu1 %v352_v3  ;;  %v344_v26 = vmax.f32 %v249_v20, 0.0  ;;  %v294_v5 = vadd.f32 %v3928_v4, %v3923_v58  ;;  %v436_v20 = vunpack.c.h.bf16 %v367_v18 }
  0xe9   :  { %v3414_v8 = vpop.f32.mrf.mxu1  ;;  %747 = vmatprep.subr.mxu1 %v3674_v0 }
  0xea   :  { %748 = vmatpush1.msra.mxu1 %v351_v7  ;;  %v363_v7 = vld [vmem:[%s5566_s1 + $0x8] sm:$0xff] }
  0xeb   :  { %v3933_v11 = vpop.f32.mrf.mxu1  ;;  %749 = vmatprep.subr.mxu1 %v3674_v0  ;;  %v427_v4 = vunpack.c.l.bf16 %v363_v7 }
  0xec   :  { %750 = vmatpush1.msra.mxu1 %v350_v10  ;;  %v299_v2 = vadd.f32 %v3933_v11, %v3923_v58  ;;  %v353_v10 = vmax.f32 %v294_v5, 0.0  ;;  %v428_v11 = vunpack.c.h.bf16 %v363_v7 }
  0xed   :  { %v3417_v14 = vpop.f32.mrf.mxu1  ;;  %751 = vmatprep.subr.mxu1 %v3674_v0 }
  0xee   :  { %752 = vmatpush1.msra.mxu1 %v349_v13  ;;  %v354_v8 = vmax.f32 %v299_v2, 0.0  ;;  %v365_v13 = vld [vmem:[%s5566_s1 + $0x18] sm:$0xff]  ;;  %v382_v2 = vld [vmem:[%s5566_s1 + $0xa0] sm:$0xff] }
  0xef   :  { %v3939_v17 = vpop.f32.mrf.mxu1  ;;  %753 = vmatprep.subr.mxu1 %v3674_v0  ;;  %v432_v14 = vunpack.c.h.bf16 %v365_v13  ;;  %v466_v5 = vunpack.c.h.bf16 %v382_v2  ;;  %v465_v7 = vunpack.c.l.bf16 %v382_v2  ;;  %v403_v2 = vld [vmem:[%s5566_s1 + $0x148] sm:$0xff] }
  0xf0   :  { %754 = vmatpush1.msra.mxu1 %v348_v16  ;;  %v304_v63 = vadd.f32 %v3939_v17, %v3923_v58  ;;  %v431_v16 = vunpack.c.l.bf16 %v365_v13  ;;  %v434_v17 = vunpack.c.h.bf16 %v366_v15  ;;  %v386_v13 = vld [vmem:[%s5566_s1 + $0xc0] sm:$0xff] }
  0xf1   :  { %v3420_v21 = vpop.f32.mrf.mxu1  ;;  %755 = vmatprep.subr.mxu1 %v3674_v0 }
  0xf2   :  { %756 = vmatpush1.msra.mxu1 %v347_v19  ;;  %v355_v6 = vmax.f32 %v304_v63, 0.0  ;;  %v433_v19 = vunpack.c.l.bf16 %v366_v15  ;;  %v368_v21 = vld [vmem:[%s5566_s1 + $0x30] sm:$0xff]  ;;  %v387_v15 = vld [vmem:[%s5566_s1 + $0xc8] sm:$0xff] }
  0xf3   :  { %v308_v23 = vpop.f32.mrf.mxu1  ;;  %757 = vmatprep.subr.mxu1 %v3674_v0  ;;  %v437_v25 = vunpack.c.l.bf16 %v368_v21 }
  0xf4   :  { %758 = vmatpush1.msra.mxu1 %v346_v22  ;;  %v309_v61 = vadd.f32 %v308_v23, %v3923_v58  ;;  %v435_v22 = vunpack.c.l.bf16 %v367_v18  ;;  %v438_v23 = vunpack.c.h.bf16 %v368_v21  ;;  %v388_v18 = vld [vmem:[%s5566_s1 + $0xd0] sm:$0xff]  ;;  %v389_v21 = vld [vmem:[%s5566_s1 + $0xd8] sm:$0xff] }
  0xf5   :  { %v3423_v27 = vpop.f32.mrf.mxu1  ;;  %759 = vmatprep.subr.mxu1 %v3674_v0 }
  0xf6   :  { %760 = vmatpush1.msra.mxu1 %v345_v24  ;;  %v356_v3 = vmax.f32 %v309_v61, 0.0  ;;  %v369_v24 = vld [vmem:[%s5566_s1 + $0x38] sm:$0xff]  ;;  %v370_v27 = vld [vmem:[%s5566_s1 + $0x40] sm:$0xff] }
  0xf7   :  { %v313_v30 = vpop.f32.mrf.mxu1  ;;  %761 = vmatprep.subr.mxu1 %v3674_v0  ;;  %v439_v28 = vunpack.c.l.bf16 %v369_v24 }
  0xf8   :  { %762 = vmatpush1.msra.mxu1 %v344_v26  ;;  %v314_v59 = vadd.f32 %v313_v30, %v3923_v58  ;;  %v440_v26 = vunpack.c.h.bf16 %v369_v24  ;;  %v442_v30 = vunpack.c.h.bf16 %v370_v27  ;;  %v390_v24 = vld [vmem:[%s5566_s1 + $0xe0] sm:$0xff] }
  0xf9   :  { %v3426_v34 = vpop.f32.mrf.mxu1  ;;  %763 = vmatprep.subr.mxu1 %v3674_v0 }
  0xfa   :  { %764 = vmatpush1.msra.mxu1 %v343_v32  ;;  %v357_v1 = vmax.f32 %v314_v59, 0.0  ;;  %v441_v32 = vunpack.c.l.bf16 %v370_v27  ;;  %v444_v34 = vunpack.c.h.bf16 %v371_v31  ;;  %v380_v59 = vld [vmem:[%s5566_s1 + $0x90] sm:$0xff]  ;;  %v391_v27 = vld [vmem:[%s5566_s1 + $0xe8] sm:$0xff] }
  0xfb   :  { %v318_v38 = vpop.f32.mrf.mxu1  ;;  %765 = vmatprep.subr.mxu1 %v3674_v0  ;;  %v462_v61 = vunpack.c.h.bf16 %v380_v59  ;;  %v461_v63 = vunpack.c.l.bf16 %v380_v59  ;;  %v401_v59 = vld [vmem:[%s5566_s1 + $0x138] sm:$0xff] }
  0xfc   :  { %766 = vmatpush1.msra.mxu1 %v342_v36  ;;  %v319_v56 = vadd.f32 %v318_v38, %v3923_v58  ;;  %v443_v36 = vunpack.c.l.bf16 %v371_v31  ;;  %v446_v38 = vunpack.c.h.bf16 %v372_v35  ;;  %v392_v31 = vld [vmem:[%s5566_s1 + $0xf0] sm:$0xff] }
  0xfd   :  { %v3429_v42 = vpop.f32.mrf.mxu1  ;;  %767 = vmatprep.subr.mxu1 %v3674_v0 }
  0xfe   :  { %768 = vmatpush1.msra.mxu1 %v341_v40  ;;  %v358_v62 = vmax.f32 %v319_v56, 0.0  ;;  %v445_v40 = vunpack.c.l.bf16 %v372_v35  ;;  %v448_v42 = vunpack.c.h.bf16 %v373_v39  ;;  %v393_v35 = vld [vmem:[%s5566_s1 + $0xf8] sm:$0xff] }
  0xff   :  { %v323_v46 = vpop.f32.mrf.mxu1  ;;  %769 = vmatprep.subr.mxu1 %v3674_v0 }
 0x100   :  { %770 = vmatpush1.msra.mxu1 %v340_v44  ;;  %v324_v54 = vadd.f32 %v323_v46, %v3923_v58  ;;  %v447_v44 = vunpack.c.l.bf16 %v373_v39  ;;  %v450_v46 = vunpack.c.h.bf16 %v374_v43  ;;  %v394_v39 = vld [vmem:[%s5566_s1 + $0x100] sm:$0xff] }
 0x101   :  { %v3432_v48 = vpop.f32.mrf.mxu1  ;;  %771 = vmatprep.subr.mxu1 %v3674_v0 }
 0x102   :  { %772 = vmatpush1.msra.mxu1 %v339_v47  ;;  %v359_v60 = vmax.f32 %v324_v54, 0.0  ;;  %v449_v47 = vunpack.c.l.bf16 %v374_v43  ;;  %v452_v48 = vunpack.c.h.bf16 %v375_v45  ;;  %v395_v43 = vld [vmem:[%s5566_s1 + $0x108] sm:$0xff] }
 0x103   :  { %v328_v49 = vpop.f32.mrf.mxu1  ;;  %773 = vmatprep.subr.mxu1 %v3674_v0 }
 0x104   :  { %774 = vmatpush1.msra.mxu1 %v338_v41  ;;  %v329_v33 = vadd.f32 %v328_v49, %v3923_v58  ;;  %v376_v41 = vld [vmem:[%s5566_s1 + $0x70] sm:$0xff]  ;;  %v451_v49 = vunpack.c.l.bf16 %v375_v45 }
 0x105   :  { %v3435_v37 = vpop.f32.mrf.mxu1  ;;  %775 = vmatprep.subr.mxu1 %v3674_v0  ;;  %v396_v45 = vld [vmem:[%s5566_s1 + $0x110] sm:$0xff] }
 0x106   :  { %776 = vmatpush1.msra.mxu1 %v337_v50  ;;  %v360_v57 = vmax.f32 %v329_v33, 0.0  ;;  %v454_v50 = vunpack.c.h.bf16 %v376_v41  ;;  %v377_v37 = vld [vmem:[%s5566_s1 + $0x78] sm:$0xff] }
 0x107   :  { %v333_v51 = vpop.f32.mrf.mxu1  ;;  %791 = vmatprep.subr.mxu1 %v3674_v0  ;;  %v456_v33 = vunpack.c.h.bf16 %v377_v37 }
 0x108   :  { %v334_v52 = vadd.f32 %v333_v51, %v3923_v58  ;;  %v364_v58 = vld [vmem:[%s5566_s1 + $0x10] sm:$0xff]  ;;  %v453_v51 = vunpack.c.l.bf16 %v376_v41  ;;  %v397_v41 = vld [vmem:[%s5566_s1 + $0x118] sm:$0xff] }
 0x109   :  { %v3438_v53 = vpop.f32.mrf.mxu1  ;;  %v430_v12 = vunpack.c.h.bf16 %v364_v58  ;;  %v429_v29 = vunpack.c.l.bf16 %v364_v58  ;;  %v385_v58 = vld [vmem:[%s5566_s1 + $0xb8] sm:$0xff] }
 0x10a   :  { %v361_v55 = vmax.f32 %v334_v52, 0.0  ;;  %v378_v52 = vld [vmem:[%s5566_s1 + $0x80] sm:$0xff]  ;;  %v455_v53 = vunpack.c.l.bf16 %v377_v37 }
 0x10b   :  { %v458_v54 = vunpack.c.h.bf16 %v378_v52  ;;  %v457_v56 = vunpack.c.l.bf16 %v378_v52  ;;  %v398_v37 = vld [vmem:[%s5566_s1 + $0x120] sm:$0xff]  ;;  %v399_v52 = vld [vmem:[%s5566_s1 + $0x128] sm:$0xff] }
 0x10c   :  { %2929 = vmatpush2.msk.msra.mxu1 %vm741_vm4, %v361_v55  ;;  %v379_v55 = vld [vmem:[%s5566_s1 + $0x88] sm:$0xff] }
 0x10d   :  { %793 = vmatprep.subr.mxu1 %v3674_v0 }
 0x10e   :  { %794 = vmatpush2.msra.mxu1 %v360_v57  ;;  %v460_v57 = vunpack.c.h.bf16 %v379_v55 }
 0x10f   :  { %795 = vmatprep.subr.mxu1 %v3674_v0 }
 0x110   :  { %796 = vmatpush2.msra.mxu1 %v359_v60  ;;  %v459_v60 = vunpack.c.l.bf16 %v379_v55  ;;  %v400_v55 = vld [vmem:[%s5566_s1 + $0x130] sm:$0xff] }
 0x111   :  { %797 = vmatprep.subr.mxu1 %v3674_v0 }
 0x112   :  { %798 = vmatpush2.msra.mxu1 %v358_v62  ;;  %v381_v62 = vld [vmem:[%s5566_s1 + $0x98] sm:$0xff] }
 0x113   :  { %799 = vmatprep.subr.mxu1 %v3674_v0 }
 0x114   :  { %800 = vmatpush2.msra.mxu1 %v357_v1  ;;  %v464_v1 = vunpack.c.h.bf16 %v381_v62 }
 0x115   :  { %801 = vmatprep.subr.mxu1 %v3674_v0 }
 0x116   :  { %802 = vmatpush2.msra.mxu1 %v356_v3  ;;  %v463_v3 = vunpack.c.l.bf16 %v381_v62  ;;  %v402_v62 = vld [vmem:[%s5566_s1 + $0x140] sm:$0xff] }
 0x117   :  { %803 = vmatprep.subr.mxu1 %v3674_v0 }
 0x118   :  { %804 = vmatpush2.msra.mxu1 %v355_v6  ;;  %v383_v6 = vld [vmem:[%s5566_s1 + $0xa8] sm:$0xff] }
 0x119   :  { %805 = vmatprep.subr.mxu1 %v3674_v0 }
 0x11a   :  { %806 = vmatpush2.msra.mxu1 %v354_v8  ;;  %v468_v8 = vunpack.c.h.bf16 %v383_v6 }
 0x11b   :  { %807 = vmatprep.subr.mxu1 %v3674_v0 }
 0x11c   :  { %808 = vmatpush2.msra.mxu1 %v353_v10  ;;  %v467_v10 = vunpack.c.l.bf16 %v383_v6  ;;  %v404_v6 = vld [vmem:[%s5566_s1 + $0x150] sm:$0xff] }
 0x11d   :  { %810 = vmatmul.mubr.f32.vlgmr.msra.gmra.mxu1 %v425_v9  ;;  %v384_v9 = vld [vmem:[%s5566_s1 + $0xb0] sm:$0xff] }
 0x11e   :  { %2931 = vmatprep.mubr.msk.f32.mxu1 %vm551_vm3, %v428_v11  ;;  %v470_v11 = vunpack.c.h.bf16 %v384_v9 }
 0x121   :  { %815 = vmatmul.mubr.f32.gmra.mxu1 %v427_v4  ;;  %v469_v4 = vunpack.c.l.bf16 %v384_v9  ;;  %v405_v9 = vld [vmem:[%s5566_s1 + $0x158] sm:$0xff] }
 0x122   :  { %2932 = vmatprep.mubr.msk.f32.mxu1 %vm551_vm3, %v430_v12  ;;  %v472_v12 = vunpack.c.h.bf16 %v385_v58 }
 0x125   :  { %820 = vmatmul.mubr.f32.gmra.mxu1 %v429_v29  ;;  %v471_v29 = vunpack.c.l.bf16 %v385_v58  ;;  %v406_v58 = vld [vmem:[%s5566_s1 + $0x160] sm:$0xff] }
 0x126   :  { %2933 = vmatprep.mubr.msk.f32.mxu1 %vm551_vm3, %v432_v14  ;;  %v474_v14 = vunpack.c.h.bf16 %v386_v13 }
 0x129   :  { %825 = vmatmul.mubr.f32.gmra.mxu1 %v431_v16  ;;  %v473_v16 = vunpack.c.l.bf16 %v386_v13  ;;  %v407_v13 = vld [vmem:[%s5566_s1 + $0x168] sm:$0xff] }
 0x12a   :  { %2934 = vmatprep.mubr.msk.f32.mxu1 %vm551_vm3, %v434_v17  ;;  %v476_v17 = vunpack.c.h.bf16 %v387_v15 }
 0x12d   :  { %830 = vmatmul.mubr.f32.gmra.mxu1 %v433_v19  ;;  %v475_v19 = vunpack.c.l.bf16 %v387_v15  ;;  %v408_v15 = vld [vmem:[%s5566_s1 + $0x170] sm:$0xff] }
 0x12e   :  { %2935 = vmatprep.mubr.msk.f32.mxu1 %vm551_vm3, %v436_v20  ;;  %v478_v20 = vunpack.c.h.bf16 %v388_v18 }
 0x131   :  { %835 = vmatmul.mubr.f32.gmra.mxu1 %v435_v22  ;;  %v477_v22 = vunpack.c.l.bf16 %v388_v18  ;;  %v409_v18 = vld [vmem:[%s5566_s1 + $0x178] sm:$0xff] }
 0x132   :  { %2936 = vmatprep.mubr.msk.f32.mxu1 %vm551_vm3, %v438_v23  ;;  %v480_v23 = vunpack.c.h.bf16 %v389_v21 }
 0x135   :  { %840 = vmatmul.mubr.f32.gmra.mxu1 %v437_v25  ;;  %v479_v25 = vunpack.c.l.bf16 %v389_v21  ;;  %v410_v21 = vld [vmem:[%s5566_s1 + $0x180] sm:$0xff] }
 0x136   :  { %2937 = vmatprep.mubr.msk.f32.mxu1 %vm551_vm3, %v440_v26  ;;  %v482_v26 = vunpack.c.h.bf16 %v390_v24 }
 0x139   :  { %845 = vmatmul.mubr.f32.gmra.mxu1 %v439_v28  ;;  %v481_v28 = vunpack.c.l.bf16 %v390_v24  ;;  %v411_v24 = vld [vmem:[%s5566_s1 + $0x188] sm:$0xff] }
 0x13a   :  { %2938 = vmatprep.mubr.msk.f32.mxu1 %vm551_vm3, %v442_v30  ;;  %v484_v30 = vunpack.c.h.bf16 %v391_v27 }
 0x13d   :  { %850 = vmatmul.mubr.f32.gmra.mxu1 %v441_v32  ;;  %v483_v32 = vunpack.c.l.bf16 %v391_v27  ;;  %v412_v27 = vld [vmem:[%s5566_s1 + $0x190] sm:$0xff] }
 0x13e   :  { %2939 = vmatprep.mubr.msk.f32.mxu1 %vm551_vm3, %v444_v34  ;;  %v486_v34 = vunpack.c.h.bf16 %v392_v31 }
 0x141   :  { %855 = vmatmul.mubr.f32.gmra.mxu1 %v443_v36  ;;  %v485_v36 = vunpack.c.l.bf16 %v392_v31  ;;  %v526_v31 = vunpack.c.h.bf16 %v412_v27 }
 0x142   :  { %2940 = vmatprep.mubr.msk.f32.mxu1 %vm551_vm3, %v446_v38  ;;  %v488_v38 = vunpack.c.h.bf16 %v393_v35 }
 0x145   :  { %860 = vmatmul.mubr.f32.gmra.mxu1 %v445_v40  ;;  %v487_v40 = vunpack.c.l.bf16 %v393_v35 }
 0x146   :  { %2941 = vmatprep.mubr.msk.f32.mxu1 %vm551_vm3, %v448_v42  ;;  %v490_v42 = vunpack.c.h.bf16 %v394_v39 }
 0x149   :  { %865 = vmatmul.mubr.f32.gmra.mxu1 %v447_v44  ;;  %v489_v44 = vunpack.c.l.bf16 %v394_v39 }
 0x14a   :  { %2942 = vmatprep.mubr.msk.f32.mxu1 %vm551_vm3, %v450_v46  ;;  %v492_v46 = vunpack.c.h.bf16 %v395_v43 }
 0x14d   :  { %870 = vmatmul.mubr.f32.gmra.mxu1 %v449_v47  ;;  %v491_v47 = vunpack.c.l.bf16 %v395_v43 }
 0x14e   :  { %2943 = vmatprep.mubr.msk.f32.mxu1 %vm551_vm3, %v452_v48  ;;  %v494_v48 = vunpack.c.h.bf16 %v396_v45 }
 0x151   :  { %875 = vmatmul.mubr.f32.gmra.mxu1 %v451_v49  ;;  %v493_v49 = vunpack.c.l.bf16 %v396_v45  ;;  %v415_v45 = vld [vmem:[%s5566_s1 + $0x1a8] sm:$0xff] }
 0x152   :  { %2944 = vmatprep.mubr.msk.f32.mxu1 %vm551_vm3, %v454_v50  ;;  %v496_v50 = vunpack.c.h.bf16 %v397_v41 }
 0x155   :  { %880 = vmatmul.mubr.f32.gmra.mxu1 %v453_v51  ;;  %v495_v51 = vunpack.c.l.bf16 %v397_v41  ;;  %v532_v41 = vunpack.c.h.bf16 %v415_v45 }
 0x156   :  { %2945 = vmatprep.mubr.msk.f32.mxu1 %vm551_vm3, %v456_v33  ;;  %v498_v33 = vunpack.c.h.bf16 %v398_v37 }
 0x159   :  { %885 = vmatmul.mubr.f32.gmra.mxu1 %v455_v53  ;;  %v497_v53 = vunpack.c.l.bf16 %v398_v37 }
 0x15a   :  { %2946 = vmatprep.mubr.msk.f32.mxu1 %vm551_vm3, %v458_v54  ;;  %v500_v54 = vunpack.c.h.bf16 %v399_v52 }
 0x15d   :  { %890 = vmatmul.mubr.f32.gmra.mxu1 %v457_v56  ;;  %v499_v56 = vunpack.c.l.bf16 %v399_v52 }
 0x15e   :  { %2947 = vmatprep.mubr.msk.f32.mxu1 %vm551_vm3, %v460_v57  ;;  %v502_v57 = vunpack.c.h.bf16 %v400_v55 }
 0x161   :  { %895 = vmatmul.mubr.f32.gmra.mxu1 %v459_v60  ;;  %v501_v60 = vunpack.c.l.bf16 %v400_v55 }
 0x162   :  { %2948 = vmatprep.mubr.msk.f32.mxu1 %vm551_vm3, %v462_v61  ;;  %v504_v61 = vunpack.c.h.bf16 %v401_v59 }
 0x165   :  { %900 = vmatmul.mubr.f32.gmra.mxu1 %v461_v63  ;;  %v503_v63 = vunpack.c.l.bf16 %v401_v59  ;;  %v418_v59 = vld [vmem:[%s5566_s1 + $0x1c0] sm:$0xff] }
 0x166   :  { %2949 = vmatprep.mubr.msk.f32.mxu1 %vm551_vm3, %v464_v1  ;;  %v506_v1 = vunpack.c.h.bf16 %v402_v62 }
 0x169   :  { %905 = vmatmul.mubr.f32.gmra.mxu1 %v463_v3  ;;  %v505_v3 = vunpack.c.l.bf16 %v402_v62  ;;  %v538_v62 = vunpack.c.h.bf16 %v418_v59 }
 0x16a   :  { %2950 = vmatprep.mubr.msk.f32.mxu1 %vm551_vm3, %v466_v5  ;;  %v508_v5 = vunpack.c.h.bf16 %v403_v2 }
 0x16d   :  { %910 = vmatmul.mubr.f32.gmra.mxu1 %v465_v7  ;;  %v507_v7 = vunpack.c.l.bf16 %v403_v2 }
 0x16e   :  { %2951 = vmatprep.mubr.msk.f32.mxu1 %vm551_vm3, %v468_v8  ;;  %v510_v8 = vunpack.c.h.bf16 %v404_v6 }
 0x171   :  { %915 = vmatmul.mubr.f32.gmra.mxu1 %v467_v10  ;;  %v509_v10 = vunpack.c.l.bf16 %v404_v6 }
 0x172   :  { %2952 = vmatprep.mubr.msk.f32.mxu1 %vm551_vm3, %v470_v11  ;;  %v512_v11 = vunpack.c.h.bf16 %v405_v9 }
 0x175   :  { %920 = vmatmul.mubr.f32.gmra.mxu1 %v469_v4  ;;  %v511_v4 = vunpack.c.l.bf16 %v405_v9 }
 0x176   :  { %2953 = vmatprep.mubr.msk.f32.mxu1 %vm551_vm3, %v472_v12  ;;  %v514_v12 = vunpack.c.h.bf16 %v406_v58 }
 0x179   :  { %925 = vmatmul.mubr.f32.gmra.mxu1 %v471_v29  ;;  %v513_v29 = vunpack.c.l.bf16 %v406_v58  ;;  %v421_v58 = vld [vmem:[%s5566_s1 + $0x1d8] sm:$0xff] }
 0x17a   :  { %2954 = vmatprep.mubr.msk.f32.mxu1 %vm551_vm3, %v474_v14  ;;  %v516_v14 = vunpack.c.h.bf16 %v407_v13 }
 0x17d   :  { %930 = vmatmul.mubr.f32.gmra.mxu1 %v473_v16  ;;  %v515_v16 = vunpack.c.l.bf16 %v407_v13  ;;  %v544_v13 = vunpack.c.h.bf16 %v421_v58 }
 0x17e   :  { %2955 = vmatprep.mubr.msk.f32.mxu1 %vm551_vm3, %v476_v17  ;;  %v518_v17 = vunpack.c.h.bf16 %v408_v15 }
 0x181   :  { %935 = vmatmul.mubr.f32.gmra.mxu1 %v475_v19  ;;  %v517_v19 = vunpack.c.l.bf16 %v408_v15 }
 0x182   :  { %2956 = vmatprep.mubr.msk.f32.mxu1 %vm551_vm3, %v478_v20  ;;  %v520_v20 = vunpack.c.h.bf16 %v409_v18 }
 0x185   :  { %940 = vmatmul.mubr.f32.gmra.mxu1 %v477_v22  ;;  %v519_v22 = vunpack.c.l.bf16 %v409_v18 }
 0x186   :  { %2957 = vmatprep.mubr.msk.f32.mxu1 %vm551_vm3, %v480_v23  ;;  %v522_v23 = vunpack.c.h.bf16 %v410_v21 }
 0x189   :  { %945 = vmatmul.mubr.f32.gmra.mxu1 %v479_v25  ;;  %v521_v25 = vunpack.c.l.bf16 %v410_v21 }
 0x18a   :  { %2958 = vmatprep.mubr.msk.f32.mxu1 %vm551_vm3, %v482_v26  ;;  %v524_v26 = vunpack.c.h.bf16 %v411_v24 }
 0x18d   :  { %950 = vmatmul.mubr.f32.gmra.mxu1 %v481_v28 }
 0x18e   :  { %2959 = vmatprep.mubr.msk.f32.mxu1 %vm551_vm3, %v484_v30  ;;  %v523_v30 = vunpack.c.l.bf16 %v411_v24  ;;  %v424_v24 = vld [vmem:[%s5566_s1 + $0x1f0] sm:$0xff] }
 0x191   :  { %955 = vmatmul.mubr.f32.gmra.mxu1 %v483_v32 }
 0x192   :  { %2960 = vmatprep.mubr.msk.f32.mxu1 %vm551_vm3, %v486_v34  ;;  %v413_v34 = vld [vmem:[%s5566_s1 + $0x198] sm:$0xff] }
 0x193   :  { %v527_v43 = vunpack.c.l.bf16 %v413_v34 }
 0x195   :  { %960 = vmatmul.mubr.f32.gmra.mxu1 %v485_v36  ;;  %v525_v36 = vunpack.c.l.bf16 %v412_v27  ;;  %v550_v27 = vunpack.c.h.bf16 %v424_v24 }
 0x196   :  { %2961 = vmatprep.mubr.msk.f32.mxu1 %vm551_vm3, %v488_v38  ;;  %v528_v38 = vunpack.c.h.bf16 %v413_v34 }
 0x199   :  { %965 = vmatmul.mubr.f32.gmra.mxu1 %v487_v40  ;;  %v414_v40 = vld [vmem:[%s5566_s1 + $0x1a0] sm:$0xff] }
 0x19a   :  { %2962 = vmatprep.mubr.msk.f32.mxu1 %vm551_vm3, %v490_v42 }
 0x19d   :  { %970 = vmatmul.mubr.f32.gmra.mxu1 %v489_v44  ;;  %v530_v44 = vunpack.c.h.bf16 %v414_v40 }
 0x19e   :  { %2963 = vmatprep.mubr.msk.f32.mxu1 %vm551_vm3, %v492_v46 }
 0x1a1   :  { %975 = vmatmul.mubr.f32.gmra.mxu1 %v491_v47 }
 0x1a2   :  { %2964 = vmatprep.mubr.msk.f32.mxu1 %vm551_vm3, %v494_v48  ;;  %v529_v48 = vunpack.c.l.bf16 %v414_v40 }
 0x1a5   :  { %980 = vmatmul.mubr.f32.gmra.mxu1 %v493_v49 }
 0x1a6   :  { %2965 = vmatprep.mubr.msk.f32.mxu1 %vm551_vm3, %v496_v50  ;;  %v416_v50 = vld [vmem:[%s5566_s1 + $0x1b0] sm:$0xff] }
 0x1a7   :  { %v533_v55 = vunpack.c.l.bf16 %v416_v50 }
 0x1a9   :  { %985 = vmatmul.mubr.f32.gmra.mxu1 %v495_v51  ;;  %v531_v51 = vunpack.c.l.bf16 %v415_v45 }
 0x1aa   :  { %2966 = vmatprep.mubr.msk.f32.mxu1 %vm551_vm3, %v498_v33  ;;  %v534_v33 = vunpack.c.h.bf16 %v416_v50 }
 0x1ad   :  { %990 = vmatmul.mubr.f32.gmra.mxu1 %v497_v53  ;;  %v417_v53 = vld [vmem:[%s5566_s1 + $0x1b8] sm:$0xff] }
 0x1ae   :  { %2967 = vmatprep.mubr.msk.f32.mxu1 %vm551_vm3, %v500_v54 }
 0x1b1   :  { %995 = vmatmul.mubr.f32.gmra.mxu1 %v499_v56  ;;  %v536_v56 = vunpack.c.h.bf16 %v417_v53 }
 0x1b2   :  { %2968 = vmatprep.mubr.msk.f32.mxu1 %vm551_vm3, %v502_v57 }
 0x1b5   :  { %1000 = vmatmul.mubr.f32.gmra.mxu1 %v501_v60 }
 0x1b6   :  { %2969 = vmatprep.mubr.msk.f32.mxu1 %vm551_vm3, %v504_v61  ;;  %v535_v61 = vunpack.c.l.bf16 %v417_v53 }
 0x1b9   :  { %1005 = vmatmul.mubr.f32.gmra.mxu1 %v503_v63 }
 0x1ba   :  { %2970 = vmatprep.mubr.msk.f32.mxu1 %vm551_vm3, %v506_v1  ;;  %v419_v1 = vld [vmem:[%s5566_s1 + $0x1c8] sm:$0xff] }
 0x1bb   :  { %v539_v9 = vunpack.c.l.bf16 %v419_v1 }
 0x1bd   :  { %1010 = vmatmul.mubr.f32.gmra.mxu1 %v505_v3  ;;  %v537_v3 = vunpack.c.l.bf16 %v418_v59 }
 0x1be   :  { %2971 = vmatprep.mubr.msk.f32.mxu1 %vm551_vm3, %v508_v5  ;;  %v540_v5 = vunpack.c.h.bf16 %v419_v1 }
 0x1c1   :  { %1015 = vmatmul.mubr.f32.gmra.mxu1 %v507_v7  ;;  %v420_v7 = vld [vmem:[%s5566_s1 + $0x1d0] sm:$0xff] }
 0x1c2   :  { %2972 = vmatprep.mubr.msk.f32.mxu1 %vm551_vm3, %v510_v8 }
 0x1c5   :  { %1020 = vmatmul.mubr.f32.gmra.mxu1 %v509_v10  ;;  %v542_v10 = vunpack.c.h.bf16 %v420_v7 }
 0x1c6   :  { %2973 = vmatprep.mubr.msk.f32.mxu1 %vm551_vm3, %v512_v11 }
 0x1c9   :  { %1025 = vmatmul.mubr.f32.gmra.mxu1 %v511_v4 }
 0x1ca   :  { %2974 = vmatprep.mubr.msk.f32.mxu1 %vm551_vm3, %v514_v12  ;;  %v541_v12 = vunpack.c.l.bf16 %v420_v7 }
 0x1cd   :  { %1030 = vmatmul.mubr.f32.gmra.mxu1 %v513_v29 }
 0x1ce   :  { %2975 = vmatprep.mubr.msk.f32.mxu1 %vm551_vm3, %v516_v14  ;;  %v422_v14 = vld [vmem:[%s5566_s1 + $0x1e0] sm:$0xff] }
 0x1cf   :  { %v545_v21 = vunpack.c.l.bf16 %v422_v14 }
 0x1d1   :  { %1035 = vmatmul.mubr.f32.gmra.mxu1 %v515_v16  ;;  %v543_v16 = vunpack.c.l.bf16 %v421_v58 }
 0x1d2   :  { %2976 = vmatprep.mubr.msk.f32.mxu1 %vm551_vm3, %v518_v17  ;;  %v546_v17 = vunpack.c.h.bf16 %v422_v14 }
 0x1d5   :  { %1040 = vmatmul.mubr.f32.gmra.mxu1 %v517_v19  ;;  %v423_v19 = vld [vmem:[%s5566_s1 + $0x1e8] sm:$0xff]  ;;  %s3676_s1 = smov 32  }
 0x1d6   :  { %2977 = vmatprep.mubr.msk.f32.mxu1 %vm551_vm3, %v520_v20 }
 0x1d9   :  { %1045 = vmatmul.mubr.f32.gmra.mxu1 %v519_v22  ;;  %v548_v22 = vunpack.c.h.bf16 %v423_v19 }
 0x1da   :  { %2978 = vmatprep.mubr.msk.f32.mxu1 %vm551_vm3, %v522_v23 }
 0x1dd   :  { %v4186_v28 = vpop.f32.mrf.mxu1  ;;  %1050 = vmatmul.mubr.f32.gmra.mxu1 %v521_v25 }
 0x1de   :  { %2979 = vmatprep.mubr.msk.f32.mxu1 %vm551_vm3, %v524_v26  ;;  %v547_v26 = vunpack.c.l.bf16 %v423_v19 }
 0x1df   :  { %v813_v32 = vpop.f32.mrf.mxu1 }
 0x1e0   :  { %v549_v32 = vunpack.c.l.bf16 %v424_v24 }
 0x1e1   :  { %v4192_v35 = vpop.f32.mrf.mxu1  ;;  %1055 = vmatmul.mubr.f32.gmra.mxu1 %v523_v30 }
 0x1e2   :  { %2980 = vmatprep.mubr.msk.f32.mxu1 %vm551_vm3, %v526_v31 }
 0x1e3   :  { %v818_v39 = vpop.f32.mrf.mxu1 }
 0x1e5   :  { %v4198_v42 = vpop.f32.mrf.mxu1  ;;  %1060 = vmatmul.mubr.f32.gmra.mxu1 %v525_v36 }
 0x1e6   :  { %2981 = vmatprep.mubr.msk.f32.mxu1 %vm551_vm3, %v528_v38 }
 0x1e7   :  { %v823_v46 = vpop.f32.mrf.mxu1 }
 0x1e9   :  { %v4204_v47 = vpop.f32.mrf.mxu1  ;;  %1065 = vmatmul.mubr.f32.gmra.mxu1 %v527_v43 }
 0x1ea   :  { %2982 = vmatprep.mubr.msk.f32.mxu1 %vm551_vm3, %v530_v44 }
 0x1eb   :  { %v828_v49 = vpop.f32.mrf.mxu1 }
 0x1ed   :  { %v4210_v37 = vpop.f32.mrf.mxu1  ;;  %1070 = vmatmul.mubr.f32.gmra.mxu1 %v529_v48 }
 0x1ee   :  { %2983 = vmatprep.mubr.msk.f32.mxu1 %vm551_vm3, %v532_v41 }
 0x1ef   :  { %v833_v52 = vpop.f32.mrf.mxu1 }
 0x1f1   :  { %v4216_v54 = vpop.f32.mrf.mxu1  ;;  %1075 = vmatmul.mubr.f32.gmra.mxu1 %v531_v51 }
 0x1f2   :  { %2984 = vmatprep.mubr.msk.f32.mxu1 %vm551_vm3, %v534_v33 }
 0x1f3   :  { %v838_v57 = vpop.f32.mrf.mxu1 }
 0x1f5   :  { %v4222_v60 = vpop.f32.mrf.mxu1  ;;  %1080 = vmatmul.mubr.f32.gmra.mxu1 %v533_v55 }
 0x1f6   :  { %2985 = vmatprep.mubr.msk.f32.mxu1 %vm551_vm3, %v536_v56 }
 0x1f7   :  { %v843_v63 = vpop.f32.mrf.mxu1 }
 0x1f9   :  { %v4228_v2 = vpop.f32.mrf.mxu1  ;;  %1085 = vmatmul.mubr.f32.gmra.mxu1 %v535_v61 }
 0x1fa   :  { %2986 = vmatprep.mubr.msk.f32.mxu1 %vm551_vm3, %v538_v62 }
 0x1fb   :  { %v848_v6 = vpop.f32.mrf.mxu1 }
 0x1fd   :  { %v4234_v8 = vpop.f32.mrf.mxu1  ;;  %1090 = vmatmul.mubr.f32.gmra.mxu1 %v537_v3 }
 0x1fe   :  { %2987 = vmatprep.mubr.msk.f32.mxu1 %vm551_vm3, %v540_v5 }
 0x1ff   :  { %v853_v11 = vpop.f32.mrf.mxu1 }
 0x201   :  { %v4240_v4 = vpop.f32.mrf.mxu1  ;;  %1095 = vmatmul.mubr.f32.gmra.mxu1 %v539_v9 }
 0x202   :  { %2988 = vmatprep.mubr.msk.f32.mxu1 %vm551_vm3, %v542_v10 }
 0x203   :  { %v858_v29 = vpop.f32.mrf.mxu1 }
 0x205   :  { %v4246_v15 = vpop.f32.mrf.mxu1  ;;  %1100 = vmatmul.mubr.f32.gmra.mxu1 %v541_v12 }
 0x206   :  { %2989 = vmatprep.mubr.msk.f32.mxu1 %vm551_vm3, %v544_v13 }
 0x207   :  { %v863_v18 = vpop.f32.mrf.mxu1 }
 0x209   :  { %v4252_v20 = vpop.f32.mrf.mxu1  ;;  %1105 = vmatmul.mubr.f32.gmra.mxu1 %v543_v16 }
 0x20a   :  { %2990 = vmatprep.mubr.msk.f32.mxu1 %vm551_vm3, %v546_v17 }
 0x20b   :  { %v868_v23 = vpop.f32.mrf.mxu1 }
 0x20d   :  { %v4258_v25 = vpop.f32.mrf.mxu1  ;;  %1110 = vmatmul.mubr.f32.gmra.mxu1 %v545_v21 }
 0x20e   :  { %2991 = vmatprep.mubr.msk.f32.mxu1 %vm551_vm3, %v548_v22 }
 0x20f   :  { %v873_v30 = vpop.f32.mrf.mxu1 }
 0x211   :  { %v4261_v31 = vpop.f32.mrf.mxu1  ;;  %1115 = vmatmul.mubr.f32.gmra.mxu1 %v547_v26 }
 0x212   :  { %2992 = vmatprep.mubr.msk.f32.mxu1 %vm551_vm3, %v550_v27 }
 0x213   :  { %v878_v34 = vpop.f32.mrf.mxu1 }
 0x215   :  { %v4264_v36 = vpop.f32.mrf.mxu1  ;;  %1120 = vmatmul.mubr.f32.gmra.mxu1 %v549_v32 }
 0x217   :  { %v883_v38 = vpop.f32.mrf.mxu1 }
 0x219   :  { %v4266_v39 = vpop.f32.mrf.mxu1 }
 0x21b   :  { %v888_v40 = vpop.f32.mrf.mxu1 }
 0x21d   :  { %v4268_v43 = vpop.f32.mrf.mxu1 }
 0x21f   :  { %v893_v44 = vpop.f32.mrf.mxu1 }
 0x221   :  { %v4270_v46 = vpop.f32.mrf.mxu1 }
 0x223   :  { %v898_v45 = vpop.f32.mrf.mxu1 }
 0x225   :  { %v4272_v48 = vpop.f32.mrf.mxu1 }
 0x227   :  { %v903_v41 = vpop.f32.mrf.mxu1 }
 0x229   :  { %v4274_v49 = vpop.f32.mrf.mxu1 }
 0x22b   :  { %v908_v50 = vpop.f32.mrf.mxu1 }
 0x22d   :  { %v4276_v51 = vpop.f32.mrf.mxu1 }
 0x22f   :  { %v913_v33 = vpop.f32.mrf.mxu1 }
 0x231   :  { %v4278_v52 = vpop.f32.mrf.mxu1 }
 0x233   :  { %v918_v53 = vpop.f32.mrf.mxu1 }
 0x235   :  { %v4280_v55 = vpop.f32.mrf.mxu1 }
 0x237   :  { %v923_v56 = vpop.f32.mrf.mxu1 }
 0x238   :  { %v1367_v56 = vld [vmem:[%s5568_s5 + $0xe8] sm:$0xff] }
 0x239   :  { %v4282_v57 = vpop.f32.mrf.mxu1 }
 0x23b   :  { %v928_v59 = vpop.f32.mrf.mxu1 }
 0x23d   :  { %v4284_v61 = vpop.f32.mrf.mxu1 }
 0x23f   :  { %v933_v62 = vpop.f32.mrf.mxu1 }
 0x240   :  { %v1351_v62 = vld [vmem:[%s5568_s5 + $0x68] sm:$0xff] }
 0x241   :  { %v4286_v63 = vpop.f32.mrf.mxu1 }
 0x243   :  { %v938_v1 = vpop.f32.mrf.mxu1 }
 0x244   :  { %v1366_v1 = vld [vmem:[%s5568_s5 + $0xe0] sm:$0xff] }
 0x245   :  { %v4288_v3 = vpop.f32.mrf.mxu1 }
 0x247   :  { %v943_v5 = vpop.f32.mrf.mxu1 }
 0x248   :  { %v1350_v5 = vld [vmem:[%s5568_s5 + $0x60] sm:$0xff] }
 0x249   :  { %v4290_v6 = vpop.f32.mrf.mxu1 }
 0x24b   :  { %v948_v7 = vpop.f32.mrf.mxu1 }
 0x24d   :  { %v4292_v9 = vpop.f32.mrf.mxu1 }
 0x24f   :  { %v953_v10 = vpop.f32.mrf.mxu1 }
 0x250   :  { %v1365_v10 = vld [vmem:[%s5568_s5 + $0xd8] sm:$0xff] }
 0x251   :  { %v4294_v11 = vpop.f32.mrf.mxu1 }
 0x253   :  { %v958_v58 = vpop.f32.mrf.mxu1 }
 0x255   :  { %v4296_v12 = vpop.f32.mrf.mxu1 }
 0x257   :  { %v963_v13 = vpop.f32.mrf.mxu1 }
 0x258   :  { %v1349_v13 = vld [vmem:[%s5568_s5 + $0x58] sm:$0xff] }
 0x259   :  { %v4298_v29 = vpop.f32.mrf.mxu1 }
 0x25b   :  { %v968_v14 = vpop.f32.mrf.mxu1 }
 0x25c   :  { %v1364_v14 = vld [vmem:[%s5568_s5 + $0xd0] sm:$0xff] }
 0x25d   :  { %v4300_v16 = vpop.f32.mrf.mxu1 }
 0x25f   :  { %v973_v17 = vpop.f32.mrf.mxu1 }
 0x260   :  { %v1348_v17 = vld [vmem:[%s5568_s5 + $0x50] sm:$0xff] }
 0x261   :  { %v4302_v18 = vpop.f32.mrf.mxu1 }
 0x263   :  { %v978_v19 = vpop.f32.mrf.mxu1 }
 0x265   :  { %v4304_v21 = vpop.f32.mrf.mxu1 }
 0x267   :  { %v983_v22 = vpop.f32.mrf.mxu1 }
 0x269   :  { %v986_v23 = vpop.f32.mrf.mxu1 }
 0x26a   :  { %v3549_v24 = vpack.i.bf16 %v4228_v2, %v986_v23  ;;  %v1363_v23 = vld [vmem:[%s5568_s5 + $0xc8] sm:$0xff] }
 0x26b   :  { %v988_v26 = vpop.f32.mrf.mxu1 }
 0x26c   :  { %3550 = vrot.lane.b32.xlu0 %v3549_v24, %s3676_s1  ;;  %v1347_v26 = vld [vmem:[%s5568_s5 + $0x48] sm:$0xff] }
 0x26d   :  { %v991_v27 = vpop.f32.mrf.mxu1 }
 0x26e   :  { %v3554_v30 = vpack.i.bf16 %v4234_v8, %v991_v27  ;;  %v1369_v8 = vld [vmem:[%s5568_s5 + $0xf8] sm:$0xff]  ;;  %v1362_v27 = vld [vmem:[%s5568_s5 + $0xc0] sm:$0xff] }
 0x26f   :  { %v993_v32 = vpop.f32.mrf.mxu1  ;;  %3107 = vmatprep.subr.mxu0 %v1369_v8  ;;  %v1358_v8 = vld [vmem:[%s5568_s5 + $0xa0] sm:$0xff] }
 0x270   :  { %3555 = vrot.lane.b32.xlu1 %v3554_v30, %s3676_s1  ;;  %v1346_v30 = vld [vmem:[%s5568_s5 + $0x40] sm:$0xff] }
 0x271   :  { %v996_v34 = vpop.f32.mrf.mxu1 }
 0x272   :  { %v3559_v38 = vpack.i.bf16 %v4240_v4, %v996_v34  ;;  %v1353_v4 = vld [vmem:[%s5568_s5 + $0x78] sm:$0xff] }
 0x273   :  { %v998_v40 = vpop.f32.mrf.mxu1  ;;  %3108 = vmatpush3.msra.mxu0 %v1353_v4  ;;  %v1345_v34 = vld [vmem:[%s5568_s5 + $0x38] sm:$0xff]  ;;  %v1342_v4 = vld [vmem:[%s5568_s5 + $0x20] sm:$0xff] }
 0x274   :  { %3560 = vrot.lane.b32.xlu0 %v3559_v38, %s3676_s1  ;;  %v1360_v40 = vld [vmem:[%s5568_s5 + $0xb0] sm:$0xff] }
 0x275   :  { %v1001_v44 = vpop.f32.mrf.mxu1 }
 0x276   :  { %v3564_v45 = vpack.i.bf16 %v4246_v15, %v1001_v44  ;;  %v1368_v15 = vld [vmem:[%s5568_s5 + $0xf0] sm:$0xff] }
 0x277   :  { %v1003_v2 = vpop.f32.mrf.mxu1  ;;  %3109 = vmatprep.subr.mxu0 %v1368_v15  ;;  %v1357_v15 = vld [vmem:[%s5568_s5 + $0x98] sm:$0xff] }
 0x278   :  { %3565 = vrot.lane.b32.xlu1 %v3564_v45, %s3676_s1  ;;  %v1344_v45 = vld [vmem:[%s5568_s5 + $0x30] sm:$0xff]  ;;  %v1359_v2 = vld [vmem:[%s5568_s5 + $0xa8] sm:$0xff] }
 0x279   :  { %v1006_v41 = vpop.f32.mrf.mxu1 }
 0x27a   :  { %v3569_v50 = vpack.i.bf16 %v4252_v20, %v1006_v41  ;;  %v1352_v20 = vld [vmem:[%s5568_s5 + $0x70] sm:$0xff] }
 0x27b   :  { %v1008_v33 = vpop.f32.mrf.mxu1  ;;  %3110 = vmatpush3.msra.mxu0 %v1352_v20 }
 0x27c   :  { %3570 = vrot.lane.b32.xlu0 %v3569_v50, %s3676_s1  ;;  %3111 = vmatprep.subr.mxu0 %v1367_v56 }
 0x27d   :  { %v4325_v53 = vpop.f32.mrf.mxu1  ;;  %3112 = vmatpush3.msra.mxu0 %v1351_v62 }
 0x27e   :  { %3113 = vmatprep.subr.mxu0 %v1366_v1  ;;  %v1340_v1 = vld [vmem:[%s5568_s5 + $0x10] sm:$0xff] }
 0x27f   :  { %v1013_v59 = vpop.f32.mrf.mxu1  ;;  %3114 = vmatpush3.msra.mxu0 %v1350_v5 }
 0x280   :  { %3115 = vmatprep.subr.mxu0 %v1365_v10  ;;  %v1356_v59 = vld [vmem:[%s5568_s5 + $0x90] sm:$0xff] }
 0x281   :  { %v4342_v7 = vpop.f32.mrf.mxu1  ;;  %3116 = vmatpush3.msra.mxu0 %v1349_v13  ;;  %v1354_v13 = vld [vmem:[%s5568_s5 + $0x80] sm:$0xff] }
 0x282   :  { %3117 = vmatprep.subr.mxu0 %v1364_v14  ;;  %v1338_v14 = vld [vmem:[%s5568_s5] sm:$0xff] }
 0x283   :  { %v1018_v58 = vpop.f32.mrf.mxu1  ;;  %3118 = vmatpush3.msra.mxu0 %v1348_v17 }
 0x284   :  { %3119 = vmatprep.subr.mxu0 %v1363_v23  ;;  %v1339_v58 = vld [vmem:[%s5568_s5 + $0x8] sm:$0xff] }
 0x285   :  { %v1021_v19 = vpop.f32.mrf.mxu1  ;;  %3120 = vmatpush3.msra.mxu0 %v1347_v26 }
 0x286   :  { %v3574_v22 = vpack.i.bf16 %v4264_v36, %v1021_v19  ;;  %v1361_v36 = vld [vmem:[%s5568_s5 + $0xb8] sm:$0xff]  ;;  %3121 = vmatprep.subr.mxu0 %v1362_v27 }
 0x287   :  { %v1023_v24 = vpop.f32.mrf.mxu1  ;;  %3122 = vmatpush3.msra.mxu0 %v1346_v30 }
 0x288   :  { %3575 = vrot.lane.b32.xlu0 %v3574_v22, %s3677_s25  ;;  %3123 = vmatprep.subr.mxu0 %v1361_v36 }
 0x289   :  { %v1026_v32 = vpop.f32.mrf.mxu1  ;;  %3124 = vmatpush3.msra.mxu0 %v1345_v34 }
 0x28a   :  { %v3579_v38 = vpack.i.bf16 %v4266_v39, %v1026_v32  ;;  %3125 = vmatprep.subr.mxu0 %v1360_v40  ;;  %v1343_v39 = vld [vmem:[%s5568_s5 + $0x28] sm:$0xff] }
 0x28b   :  { %v1028_v44 = vpop.f32.mrf.mxu1  ;;  %3126 = vmatpush3.msra.mxu0 %v1344_v45 }
 0x28c   :  { %3580 = vrot.lane.b32.xlu0 %v3579_v38, %s3677_s25  ;;  %3127 = vmatprep.subr.mxu0 %v1359_v2 }
 0x28d   :  { %v1031_v41 = vpop.f32.mrf.mxu1  ;;  %3128 = vmatpush3.msra.mxu0 %v1343_v39 }
 0x28e   :  { %v3584_v50 = vpack.i.bf16 %v4268_v43, %v1031_v41  ;;  %3129 = vmatprep.subr.mxu0 %v1358_v8  ;;  %v1341_v43 = vld [vmem:[%s5568_s5 + $0x18] sm:$0xff] }
 0x28f   :  { %v1033_v33 = vpop.f32.mrf.mxu1  ;;  %3130 = vmatpush3.msra.mxu0 %v1342_v4 }
 0x290   :  { %3585 = vrot.lane.b32.xlu1 %v3584_v50, %s3677_s25  ;;  %3131 = vmatprep.subr.mxu0 %v1357_v15 }
 0x291   :  { %v1036_v20 = vpop.f32.mrf.mxu1  ;;  %3132 = vmatpush3.msra.mxu0 %v1341_v43 }
 0x292   :  { %v3589_v56 = vpack.i.bf16 %v4270_v46, %v1036_v20  ;;  %3133 = vmatprep.subr.mxu0 %v1356_v59  ;;  %v1355_v46 = vld [vmem:[%s5568_s5 + $0x88] sm:$0xff] }
 0x293   :  { %v1038_v62 = vpop.f32.mrf.mxu1  ;;  %3134 = vmatpush3.msra.mxu0 %v1340_v1 }
 0x294   :  { %3590 = vrot.lane.b32.xlu0 %v3589_v56, %s3677_s25  ;;  %3135 = vmatprep.subr.mxu0 %v1355_v46 }
 0x295   :  { %v1041_v5 = vpop.f32.mrf.mxu1  ;;  %3136 = vmatpush3.msra.mxu0 %v1339_v58 }
 0x296   :  { %3137 = vmatprep.subr.mxu0 %v1354_v13  ;;  %v3604_v38 = vpack.i.bf16 %v4272_v48, %v1041_v5  ;;  %v3619_v48 = vpack.i.bf16 %v4258_v25, %v4325_v53 }
 0x297   :  { %v1043_v10 = vpop.f32.mrf.mxu1  ;;  %3138 = vmatpush3.msra.mxu0 %v1338_v14 }
 0x298   :  { %3439 = vmatprep.subr.mxu0 %v3674_v0 }
 0x299   :  { %v1046_v17 = vpop.f32.mrf.mxu1 }
 0x29a   :  { %v3624_v45 = vpack.i.bf16 %v4274_v49, %v1046_v17  ;;  %v3634_v49 = vpack.i.bf16 %v4261_v31, %v4342_v7 }
 0x29b   :  { %v1048_v19 = vpop.f32.mrf.mxu1 }
 0x29d   :  { %v1051_v22 = vpop.f32.mrf.mxu1 }
 0x29e   :  { %v3644_v25 = vpack.i.bf16 %v4276_v51, %v1051_v22 }
 0x29f   :  { %v1053_v23 = vpop.f32.mrf.mxu1 }
 0x2a1   :  { %v1056_v24 = vpop.f32.mrf.mxu1 }
 0x2a2   :  { %v3594_v26 = vpack.i.bf16 %v4278_v52, %v1056_v24 }
 0x2a3   :  { %v1058_v27 = vpop.f32.mrf.mxu1 }
 0x2a4   :  { %3595 = vrot.lane.b32.xlu1 %v3594_v26, %s3678_s17 }
 0x2a5   :  { %v1061_v30 = vpop.f32.mrf.mxu1 }
 0x2a6   :  { %v3599_v36 = vpack.i.bf16 %v4280_v55, %v1061_v30 }
 0x2a7   :  { %v1063_v32 = vpop.f32.mrf.mxu1 }
 0x2a8   :  { %3600 = vrot.lane.b32.xlu1 %v3599_v36, %s3678_s17 }
 0x2a9   :  { %v1066_v34 = vpop.f32.mrf.mxu1 }
 0x2aa   :  { %v3609_v40 = vpack.i.bf16 %v4282_v57, %v1066_v34 }
 0x2ab   :  { %v1068_v44 = vpop.f32.mrf.mxu1 }
 0x2ac   :  { %3605 = vrot.lane.b32.xlu1 %v3604_v38, %s3677_s25  ;;  %3610 = vrot.lane.b32.xlu0 %v3609_v40, %s3678_s17 }
 0x2ad   :  { %v1071_v52 = vpop.f32.mrf.mxu1 }
 0x2ae   :  { %v3614_v2 = vpack.i.bf16 %v4284_v61, %v1071_v52 }
 0x2af   :  { %v1073_v41 = vpop.f32.mrf.mxu1 }
 0x2b0   :  { %3625 = vrot.lane.b32.xlu0 %v3624_v45, %s3677_s25  ;;  %3615 = vrot.lane.b32.xlu1 %v3614_v2, %s3678_s17 }
 0x2b1   :  { %v1076_v55 = vpop.f32.mrf.mxu1 }
 0x2b2   :  { %v3629_v57 = vpack.i.bf16 %v4286_v63, %v1076_v55 }
 0x2b3   :  { %v1078_v39 = vpop.f32.mrf.mxu1 }
 0x2b4   :  { %3620 = vrot.lane.b32.xlu1 %v3619_v48, %s3676_s1  ;;  %3630 = vrot.lane.b32.xlu0 %v3629_v57, %s3678_s17 }
 0x2b5   :  { %v1081_v50 = vpop.f32.mrf.mxu1 }
 0x2b6   :  { %v3639_v61 = vpack.i.bf16 %v4288_v3, %v1081_v50 }
 0x2b7   :  { %v1083_v8 = vpop.f32.mrf.mxu1 }
 0x2b8   :  { %3635 = vrot.lane.b32.xlu0 %v3634_v49, %s3676_s1  ;;  %3640 = vrot.lane.b32.xlu1 %v3639_v61, %s3678_s17 }
 0x2b9   :  { %v1086_v33 = vpop.f32.mrf.mxu1 }
 0x2ba   :  { %v3649_v63 = vpack.i.bf16 %v4290_v6, %v1086_v33 }
 0x2bb   :  { %v1088_v53 = vpop.f32.mrf.mxu1 }
 0x2bc   :  { %3645 = vrot.lane.b32.xlu1 %v3644_v25, %s3677_s25  ;;  %3650 = vrot.lane.b32.xlu0 %v3649_v63, %s3678_s17  ;;  %v1372_v25 = vld [vmem:[%s5568_s5 + $0x110] sm:$0xff] }
 0x2bd   :  { %v4451_v4 = vpop.f32.mrf.mxu1 }
 0x2bf   :  { %v1093_v31 = vpop.f32.mrf.mxu1 }
 0x2c1   :  { %v4453_v7 = vpop.f32.mrf.mxu1 }
 0x2c3   :  { %v1098_v3 = vpop.f32.mrf.mxu1 }
 0x2c5   :  { %v4455_v15 = vpop.f32.mrf.mxu1 }
 0x2c7   :  { %v1103_v20 = vpop.f32.mrf.mxu1 }
 0x2c9   :  { %v4457_v43 = vpop.f32.mrf.mxu1 }
 0x2cb   :  { %v1108_v56 = vpop.f32.mrf.mxu1 }
 0x2cd   :  { %v4459_v51 = vpop.f32.mrf.mxu1 }
 0x2cf   :  { %v1113_v6 = vpop.f32.mrf.mxu1 }
 0x2d1   :  { %v4461_v59 = vpop.f32.mrf.mxu1 }
 0x2d3   :  { %v1118_v62 = vpop.f32.mrf.mxu1 }
 0x2d5   :  { %v4463_v1 = vpop.f32.mrf.mxu1 }
 0x2d7   :  { %v1123_v5 = vpop.f32.mrf.mxu1 }
 0x2de   :  { %v3551_v46 = vpop.permute.xlu0 %3550 }
 0x2df   :  { %v3553_v19 = vunpack.i.h.bf16 %v3551_v46  ;;  %v3552_v22 = vunpack.i.l.bf16 %v3551_v46 }
 0x2e1   :  { %v1294_v30 = vsel %vm1293_vm5, %v4186_v28, %v3553_v19  ;;  %v1317_v32 = vsel %vm1293_vm5, %v4292_v9, %v3552_v22  ;;  %v1373_v28 = vld [vmem:[%s5568_s5 + $0x118] sm:$0xff]  ;;  %v1370_v19 = vld [vmem:[%s5568_s5 + $0x100] sm:$0xff] }
 0x2e2   :  { %v3556_v58 = vpop.permute.xlu1 %3555 }
 0x2e3   :  { %v3558_v34 = vunpack.i.h.bf16 %v3556_v58  ;;  %v3557_v38 = vunpack.i.l.bf16 %v3556_v58 }
 0x2e5   :  { %v1318_v8 = vsel %vm1293_vm5, %v4294_v11, %v3557_v38  ;;  %v1295_v33 = vsel %vm1293_vm5, %v4192_v35, %v3558_v34  ;;  %v1371_v35 = vld [vmem:[%s5568_s5 + $0x108] sm:$0xff] }
 0x2e6   :  { %v3561_v10 = vpop.permute.xlu0 %3560 }
 0x2e7   :  { %v3563_v57 = vunpack.i.h.bf16 %v3561_v10  ;;  %v3562_v9 = vunpack.i.l.bf16 %v3561_v10 }
 0x2e9   :  { %v1319_v62 = vsel %vm1293_vm5, %v4296_v12, %v3562_v9  ;;  %v1296_v5 = vsel %vm1293_vm5, %v4198_v42, %v3563_v57 }
 0x2ea   :  { %v4467_v14 = vpop.permute.xlu1 %3565 }
 0x2eb   :  { %v3568_v46 = vunpack.i.h.bf16 %v4467_v14  ;;  %v3567_v10 = vunpack.i.l.bf16 %v4467_v14 }
 0x2ed   :  { %v1320_v38 = vsel %vm1293_vm5, %v4298_v29, %v3567_v10 }
 0x2ee   :  { %v4465_v13 = vpop.permute.xlu0 %3570 }
 0x2fa   :  { %v3576_v17 = vpop.permute.xlu0 %3575 }
 0x2fb   :  { %v3578_v24 = vunpack.i.h.bf16 %v3576_v17  ;;  %v3577_v26 = vunpack.i.l.bf16 %v3576_v17 }
 0x2fd   :  { %v1302_v52 = vsel %vm1301_vm6, %v1294_v30, %v3578_v24  ;;  %v1324_v41 = vsel %vm1301_vm6, %v1317_v32, %v3577_v26  ;;  %v3573_v26 = vunpack.i.h.bf16 %v4465_v13 }
 0x2fe   :  { %v3581_v27 = vpop.permute.xlu0 %3580 }
 0x2ff   :  { %v3583_v45 = vunpack.i.h.bf16 %v3581_v27  ;;  %v3582_v2 = vunpack.i.l.bf16 %v3581_v27  ;;  %v3572_v27 = vunpack.i.l.bf16 %v4465_v13  ;;  %v1298_v29 = vsel %vm1293_vm5, %v4210_v37, %v3573_v26 }
 0x301   :  { %v1325_v31 = vsel %vm1301_vm6, %v1318_v8, %v3582_v2  ;;  %v1303_v3 = vsel %vm1301_vm6, %v1295_v33, %v3583_v45 }
 0x302   :  { %v3586_v23 = vpop.permute.xlu1 %3585 }
 0x303   :  { %v3588_v63 = vunpack.i.h.bf16 %v3586_v23  ;;  %v3587_v53 = vunpack.i.l.bf16 %v3586_v23 }
 0x305   :  { %v1326_v12 = vsel %vm1301_vm6, %v1319_v62, %v3587_v53  ;;  %v1304_v42 = vsel %vm1301_vm6, %v1296_v5, %v3588_v63 }
 0x306   :  { %v3591_v39 = vpop.permute.xlu0 %3590 }
 0x307   :  { %v3593_v22 = vunpack.i.h.bf16 %v3591_v39  ;;  %v3592_v23 = vunpack.i.l.bf16 %v3591_v39 }
 0x309   :  { %v1327_v45 = vsel %vm1301_vm6, %v1320_v38, %v3592_v23 }
 0x316   :  { %v3596_v36 = vpop.permute.xlu1 %3595 }
 0x317   :  { %v3598_v40 = vunpack.i.h.bf16 %v3596_v36  ;;  %v3597_v44 = vunpack.i.l.bf16 %v3596_v36 }
 0x319   :  { %v1331_v55 = vsel %vm1309_vm7, %v1324_v41, %v3597_v44  ;;  %v1310_v48 = vsel %vm1309_vm7, %v1302_v52, %v3598_v40  ;;  %v1297_v40 = vsel %vm1293_vm5, %v4204_v47, %v3568_v46 }
 0x31a   :  { %1460 = vmatprep.mubr.f32.mxu0 %v1331_v55  ;;  %v3601_v50 = vpop.permute.xlu1 %3600  ;;  %v1305_v2 = vsel %vm1301_vm6, %v1297_v40, %v3593_v22 }
 0x31b   :  { %v3603_v49 = vunpack.i.h.bf16 %v3601_v50  ;;  %v3602_v61 = vunpack.i.l.bf16 %v3601_v50  ;;  %1461 = vmatmul.mubr.f32.vlgmr.msra.gmra.mxu0 %v1310_v48 }
 0x31c   :  { %3440 = vmatpush3.msra.mxu0 %v1373_v28  ;;  %v1321_v28 = vsel %vm1293_vm5, %v4300_v16, %v3572_v27 }
 0x31d   :  { %v1332_v20 = vsel %vm1309_vm7, %v1325_v31, %v3602_v61  ;;  %v1311_v56 = vsel %vm1309_vm7, %v1303_v3, %v3603_v49  ;;  %3441 = vmatprep.subr.mxu0 %v3674_v0 }
 0x31e   :  { %v3606_v11 = vpop.permute.xlu1 %3605  ;;  %1465 = vmatprep.mubr.f32.mxu0 %v1332_v20  ;;  %v3611_v6 = vpop.permute.xlu0 %3610  ;;  %3442 = vmatpush3.msra.mxu0 %v1372_v25 }
 0x31f   :  { %v3613_v58 = vunpack.i.h.bf16 %v3611_v6  ;;  %v3612_v17 = vunpack.i.l.bf16 %v3611_v6  ;;  %1466 = vmatmul.mubr.f32.gmra.mxu0 %v1311_v56  ;;  %3443 = vmatprep.subr.mxu0 %v3674_v0  ;;  %v3608_v44 = vunpack.i.h.bf16 %v3606_v11  ;;  %v3607_v52 = vunpack.i.l.bf16 %v3606_v11 }
 0x320   :  { %3444 = vmatpush3.msra.mxu0 %v1371_v35 }
 0x321   :  { %v1333_v24 = vsel %vm1309_vm7, %v1326_v12, %v3612_v17  ;;  %v1312_v14 = vsel %vm1309_vm7, %v1304_v42, %v3613_v58  ;;  %3445 = vmatprep.subr.mxu0 %v3674_v0  ;;  %v1328_v50 = vsel %vm1301_vm6, %v1321_v28, %v3607_v52  ;;  %v1306_v49 = vsel %vm1301_vm6, %v1298_v29, %v3608_v44 }
 0x322   :  { %v3626_v30 = vpop.permute.xlu0 %3625  ;;  %1470 = vmatprep.mubr.f32.mxu0 %v1333_v24  ;;  %v3616_v36 = vpop.permute.xlu1 %3615  ;;  %3446 = vmatpush3.msra.mxu0 %v1370_v19 }
 0x323   :  { %v3618_v32 = vunpack.i.h.bf16 %v3616_v36  ;;  %v3617_v34 = vunpack.i.l.bf16 %v3616_v36  ;;  %1471 = vmatmul.mubr.f32.gmra.mxu0 %v1312_v14  ;;  %v3628_v37 = vunpack.i.h.bf16 %v3626_v30  ;;  %v3627_v25 = vunpack.i.l.bf16 %v3626_v30 }
 0x325   :  { %v1334_v13 = vsel %vm1309_vm7, %v1327_v45, %v3617_v34  ;;  %v1313_v41 = vsel %vm1309_vm7, %v1305_v2, %v3618_v32 }
 0x326   :  { %v3621_v55 = vpop.permute.xlu1 %3620  ;;  %1475 = vmatprep.mubr.f32.mxu0 %v1334_v13  ;;  %v3631_v48 = vpop.permute.xlu0 %3630 }
 0x327   :  { %v3623_v47 = vunpack.i.h.bf16 %v3621_v55  ;;  %v3622_v57 = vunpack.i.l.bf16 %v3621_v55  ;;  %v3633_v9 = vunpack.i.h.bf16 %v3631_v48  ;;  %v3632_v39 = vunpack.i.l.bf16 %v3631_v48  ;;  %1476 = vmatmul.mubr.f32.gmra.mxu0 %v1313_v41 }
 0x329   :  { %v1335_v61 = vsel %vm1309_vm7, %v1328_v50, %v3632_v39  ;;  %v1314_v8 = vsel %vm1309_vm7, %v1306_v49, %v3633_v9  ;;  %v1322_v33 = vsel %vm1293_vm5, %v4302_v18, %v3622_v57  ;;  %v1299_v16 = vsel %vm1293_vm5, %v4216_v54, %v3623_v47  ;;  %v1374_v57 = vld [vmem:[%s5567_s10 + $0x1] ss:$0 sm:$0xff] }
 0x32a   :  { %v3636_v63 = vpop.permute.xlu0 %3635  ;;  %1480 = vmatprep.mubr.f32.mxu0 %v1335_v61  ;;  %v3641_v53 = vpop.permute.xlu1 %3640  ;;  %v1329_v35 = vsel %vm1301_vm6, %v1322_v33, %v3627_v25  ;;  %v1307_v11 = vsel %vm1301_vm6, %v1299_v16, %v3628_v37 }
 0x32b   :  { %v3643_v31 = vunpack.i.h.bf16 %v3641_v53  ;;  %v3642_v3 = vunpack.i.l.bf16 %v3641_v53  ;;  %1481 = vmatmul.mubr.f32.gmra.mxu0 %v1314_v8  ;;  %v3638_v20 = vunpack.i.h.bf16 %v3636_v63  ;;  %v3637_v56 = vunpack.i.l.bf16 %v3636_v63 }
 0x32d   :  { %v1336_v6 = vsel %vm1309_vm7, %v1329_v35, %v3642_v3  ;;  %v1315_v18 = vsel %vm1309_vm7, %v1307_v11, %v3643_v31  ;;  %v1323_v17 = vsel %vm1293_vm5, %v4304_v21, %v3637_v56  ;;  %v1300_v19 = vsel %vm1293_vm5, %v4222_v60, %v3638_v20  ;;  %v4575_v60 = vld [vmem:[%s5569_s2] sm:$0xff]  }
 0x32e   :  { %v3646_v62 = vpop.permute.xlu1 %3645  ;;  %1485 = vmatprep.mubr.f32.mxu0 %v1336_v6  ;;  %v3651_v54 = vpop.permute.xlu0 %3650  ;;  %v3028_v21 = vunpack.c.l.bf16 %v4575_v60 }
 0x32f   :  { %v3648_v5 = vunpack.i.h.bf16 %v3646_v62  ;;  %v3647_v46 = vunpack.i.l.bf16 %v3646_v62  ;;  %v3653_v10 = vunpack.i.h.bf16 %v3651_v54  ;;  %v3652_v58 = vunpack.i.l.bf16 %v3651_v54  ;;  %1486 = vmatmul.mubr.f32.gmra.mxu0 %v1315_v18 }
 0x331   :  { %v1330_v22 = vsel %vm1301_vm6, %v1323_v17, %v3647_v46  ;;  %v1308_v23 = vsel %vm1301_vm6, %v1300_v19, %v3648_v5  ;;  %v3070_v19 = vld [vmem:[%s5569_s2 + $0x8] sm:$0xff]  }
 0x332   :  { %v1337_v12 = vsel %vm1309_vm7, %v1330_v22, %v3652_v58  ;;  %v1316_v42 = vsel %vm1309_vm7, %v1308_v23, %v3653_v10  ;;  %v3029_v23 = vunpack.c.h.bf16 %v4575_v60 }
 0x333   :  { %1490 = vmatprep.mubr.f32.mxu0 %v1337_v12  ;;  %v3032_v12 = vunpack.c.l.bf16 %v3070_v19 }
 0x334   :  { %1491 = vmatmul.mubr.f32.gmra.mxu0 %v1316_v42  ;;  %v3071_v42 = vld [vmem:[%s5569_s2 + $0x10] sm:$0xff]  }
 0x335   :  { %3447 = vmatprep.mubr.msk.f32.mxu0 %vm3675_vm1, %v3674_v0  ;;  %v3037_v60 = vunpack.c.h.bf16 %v3071_v42 }
 0x338   :  { %3448 = vmatmul.mubr.msk.f32.vlgmr.msra.gmra.mxu0 %vm1293_vm5, %v4451_v4 }
 0x339   :  { %3450 = vmatprep.mubr.msk.f32.mxu0 %vm3675_vm1, %v3674_v0 }
 0x33c   :  { %3451 = vmatmul.mubr.msk.f32.gmra.mxu0 %vm1293_vm5, %v4453_v7 }
 0x33d   :  { %3453 = vmatprep.mubr.msk.f32.mxu0 %vm3675_vm1, %v3674_v0 }
 0x340   :  { %3454 = vmatmul.mubr.msk.f32.gmra.mxu0 %vm1293_vm5, %v4455_v15 }
 0x341   :  { %3456 = vmatprep.mubr.msk.f32.mxu0 %vm3675_vm1, %v3674_v0 }
 0x344   :  { %3457 = vmatmul.mubr.msk.f32.gmra.mxu0 %vm1293_vm5, %v4457_v43 }
 0x345   :  { %3459 = vmatprep.mubr.msk.f32.mxu0 %vm3675_vm1, %v3674_v0 }
 0x348   :  { %3460 = vmatmul.mubr.msk.f32.gmra.mxu0 %vm1293_vm5, %v4459_v51 }
 0x349   :  { %3462 = vmatprep.mubr.msk.f32.mxu0 %vm3675_vm1, %v3674_v0 }
 0x34c   :  { %3463 = vmatmul.mubr.msk.f32.gmra.mxu0 %vm1293_vm5, %v4461_v59 }
 0x34d   :  { %3465 = vmatprep.mubr.msk.f32.mxu0 %vm3675_vm1, %v3674_v0 }
 0x350   :  { %3466 = vmatmul.mubr.msk.f32.gmra.mxu0 %vm1293_vm5, %v4463_v1 }
 0x351   :  { %3482 = vmatprep.mubr.msk.f32.mxu0 %vm1639_vm8, %v3028_v21  ;;  %v3033_v21 = vunpack.c.h.bf16 %v3070_v19 }
 0x3db   :  { %v3139_v4 = vpop.f32.mrf.mxu0 }
 0x3dd   :  { %v3140_v7 = vpop.f32.mrf.mxu0 }
 0x3de   :  { %v3141_v20 = vadd.f32 %v3140_v7, %v3139_v4  ;;  %v3036_v4 = vunpack.c.l.bf16 %v3071_v42  ;;  %v3072_v7 = vld [vmem:[%s5569_s2 + $0x18] sm:$0xff]  }
 0x3df   :  { %v3142_v15 = vpop.f32.mrf.mxu0 }
 0x3e0   :  { %v1463_v54 = vadd.f32 %v3141_v20, %v1374_v57  ;;  %v1908_v20 = vld [vmem:[%s5570_s6 + $0x98] sm:$0xff] }
 0x3e1   :  { %v3143_v43 = vpop.f32.mrf.mxu0 }
 0x3e2   :  { %v3144_v63 = vadd.f32 %v3143_v43, %v3142_v15  ;;  %v3040_v15 = vunpack.c.l.bf16 %v3072_v7  ;;  %v3073_v43 = vld [vmem:[%s5569_s2 + $0x20] sm:$0xff]  }
 0x3e3   :  { %v3145_v51 = vpop.f32.mrf.mxu0 }
 0x3e4   :  { %v1468_v6 = vadd.f32 %v3144_v63, %v1374_v57  ;;  %v1910_v63 = vld [vmem:[%s5570_s6 + $0xa8] sm:$0xff] }
 0x3e5   :  { %v3146_v59 = vpop.f32.mrf.mxu0 }
 0x3e6   :  { %v3147_v8 = vadd.f32 %v3146_v59, %v3145_v51  ;;  %v3041_v51 = vunpack.c.h.bf16 %v3072_v7  ;;  %v3044_v59 = vunpack.c.l.bf16 %v3073_v43 }
 0x3e7   :  { %v3148_v24 = vpop.f32.mrf.mxu0 }
 0x3e8   :  { %v1473_v56 = vadd.f32 %v3147_v8, %v1374_v57  ;;  %v1897_v8 = vld [vmem:[%s5570_s6 + $0x40] sm:$0xff] }
 0x3e9   :  { %v3149_v14 = vpop.f32.mrf.mxu0 }
 0x3ea   :  { %v3150_v39 = vadd.f32 %v3149_v14, %v3148_v24  ;;  %v3074_v24 = vld [vmem:[%s5569_s2 + $0x28] sm:$0xff]   ;;  %v3045_v14 = vunpack.c.h.bf16 %v3073_v43 }
 0x3eb   :  { %v3151_v26 = vpop.f32.mrf.mxu0 }
 0x3ec   :  { %v1478_v53 = vadd.f32 %v3150_v39, %v1374_v57  ;;  %v1899_v39 = vld [vmem:[%s5570_s6 + $0x50] sm:$0xff] }
 0x3ed   :  { %v3152_v1 = vpop.f32.mrf.mxu0 }
 0x3ee   :  { %v3153_v47 = vadd.f32 %v3152_v1, %v3151_v26  ;;  %v3048_v26 = vunpack.c.l.bf16 %v3074_v24  ;;  %v3075_v1 = vld [vmem:[%s5569_s2 + $0x30] sm:$0xff]  }
 0x3ef   :  { %v3154_v27 = vpop.f32.mrf.mxu0 }
 0x3f0   :  { %v1483_v33 = vadd.f32 %v3153_v47, %v1374_v57  ;;  %v1916_v47 = vld [vmem:[%s5570_s6 + $0xd8] sm:$0xff] }
 0x3f1   :  { %v3155_v30 = vpop.f32.mrf.mxu0 }
 0x3f2   :  { %v3156_v48 = vadd.f32 %v3155_v30, %v3154_v27  ;;  %v3049_v27 = vunpack.c.h.bf16 %v3074_v24  ;;  %v3052_v30 = vunpack.c.l.bf16 %v3075_v1 }
 0x3f4   :  { %v3157_v36 = vpop.f32.mrf.mxu0  ;;  %v1488_v50 = vadd.f32 %v3156_v48, %v1374_v57  ;;  %v1902_v48 = vld [vmem:[%s5570_s6 + $0x68] sm:$0xff] }
 0x3f6   :  { %v3158_v32 = vpop.f32.mrf.mxu0 }
 0x3f7   :  { %v3159_v28 = vadd.f32 %v3158_v32, %v3157_v36  ;;  %v3076_v36 = vld [vmem:[%s5569_s2 + $0x38] sm:$0xff]   ;;  %v3053_v32 = vunpack.c.h.bf16 %v3075_v1 }
 0x3f8   :  { %v1562_v34 = vpop.f32.mrf.mxu0 }
 0x3f9   :  { %v1493_v49 = vadd.f32 %v3159_v28, %v1374_v57  ;;  %v1563_v10 = vadd.f32 %v1562_v34, %v1463_v54  ;;  %v3056_v34 = vunpack.c.l.bf16 %v3076_v36  ;;  %v1917_v28 = vld [vmem:[%s5570_s6 + $0xe0] sm:$0xff]  ;;  %v1900_v57 = vld [vmem:[%s5570_s6 + $0x58] sm:$0xff]  ;;  %v1890_v54 = vld [vmem:[%s5570_s6 + $0x8] sm:$0xff] }
 0x3fa   :  { %v3449_v38 = vpop.f32.mrf.mxu0 }
 0x3fb   :  { %v1596_v22 = vmax.f32 %v1563_v10, 0.0  ;;  %v3077_v38 = vld [vmem:[%s5569_s2 + $0x40] sm:$0xff]  }
 0x3fc   :  { %v1567_v40 = vpop.f32.mrf.mxu0  ;;  %v1889_v10 = vld [vmem:[%s5570_s6] sm:$0xff] }
 0x3fd   :  { %v1568_v5 = vadd.f32 %v1567_v40, %v1468_v6  ;;  %v3057_v40 = vunpack.c.h.bf16 %v3076_v36  ;;  %v1891_v6 = vld [vmem:[%s5570_s6 + $0x10] sm:$0xff] }
 0x3fe   :  { %v3452_v44 = vpop.f32.mrf.mxu0 }
 0x3ff   :  { %v1597_v17 = vmax.f32 %v1568_v5, 0.0  ;;  %v3060_v44 = vunpack.c.l.bf16 %v3077_v38 }
 0x400   :  { %v1572_v52 = vpop.f32.mrf.mxu0 }
 0x401   :  { %v1573_v18 = vadd.f32 %v1572_v52, %v1473_v56  ;;  %v3061_v52 = vunpack.c.h.bf16 %v3077_v38  ;;  %v1892_v56 = vld [vmem:[%s5570_s6 + $0x18] sm:$0xff] }
 0x402   :  { %v3455_v45 = vpop.f32.mrf.mxu0 }
 0x403   :  { %v1598_v58 = vmax.f32 %v1573_v18, 0.0  ;;  %v1920_v45 = vld [vmem:[%s5570_s6 + $0xf8] sm:$0xff] }
 0x404   :  { %v1577_v2 = vpop.f32.mrf.mxu0 }
 0x405   :  { %v1578_v35 = vadd.f32 %v1577_v2, %v1478_v53  ;;  %v1904_v2 = vld [vmem:[%s5570_s6 + $0x78] sm:$0xff]  ;;  %v1894_v53 = vld [vmem:[%s5570_s6 + $0x28] sm:$0xff] }
 0x406   :  { %v3458_v13 = vpop.f32.mrf.mxu0 }
 0x407   :  { %v1599_v46 = vmax.f32 %v1578_v35, 0.0  ;;  %v1919_v13 = vld [vmem:[%s5570_s6 + $0xf0] sm:$0xff] }
 0x408   :  { %v1582_v41 = vpop.f32.mrf.mxu0  ;;  %v1907_v35 = vld [vmem:[%s5570_s6 + $0x90] sm:$0xff] }
 0x409   :  { %v1583_v31 = vadd.f32 %v1582_v41, %v1483_v33  ;;  %v1903_v41 = vld [vmem:[%s5570_s6 + $0x70] sm:$0xff]  ;;  %v1912_v33 = vld [vmem:[%s5570_s6 + $0xb8] sm:$0xff] }
 0x40a   :  { %v3461_v55 = vpop.f32.mrf.mxu0 }
 0x40b   :  { %v1600_v62 = vmax.f32 %v1583_v31, 0.0  ;;  %v1918_v55 = vld [vmem:[%s5570_s6 + $0xe8] sm:$0xff]  ;;  %v1909_v31 = vld [vmem:[%s5570_s6 + $0xa0] sm:$0xff] }
 0x40c   :  { %v1587_v29 = vpop.f32.mrf.mxu0 }
 0x40d   :  { %v1588_v16 = vadd.f32 %v1587_v29, %v1488_v50  ;;  %v1901_v29 = vld [vmem:[%s5570_s6 + $0x60] sm:$0xff]  ;;  %v1914_v50 = vld [vmem:[%s5570_s6 + $0xc8] sm:$0xff] }
 0x40e   :  { %v3464_v9 = vpop.f32.mrf.mxu0 }
 0x40f   :  { %v1601_v11 = vmax.f32 %v1588_v16, 0.0  ;;  %v1915_v9 = vld [vmem:[%s5570_s6 + $0xd0] sm:$0xff]  ;;  %v1896_v16 = vld [vmem:[%s5570_s6 + $0x38] sm:$0xff] }
 0x410   :  { %v1592_v61 = vpop.f32.mrf.mxu0 }
 0x411   :  { %v1593_v37 = vadd.f32 %v1592_v61, %v1493_v49  ;;  %v1898_v49 = vld [vmem:[%s5570_s6 + $0x48] sm:$0xff]  ;;  %v1913_v61 = vld [vmem:[%s5570_s6 + $0xc0] sm:$0xff] }
 0x412   :  { %v3467_v25 = vpop.f32.mrf.mxu0 }
 0x413   :  { %v1602_v3 = vmax.f32 %v1593_v37, 0.0  ;;  %v1911_v37 = vld [vmem:[%s5570_s6 + $0xb0] sm:$0xff] }
 0x414   :  { %v1895_v25 = vld [vmem:[%s5570_s6 + $0x30] sm:$0xff] }
 0x415   :  { %3468 = vmatprep.subr.mxu0 %v1602_v3 }
 0x416   :  { %3469 = vmatpush3.msra.mxu0 %v1602_v3  ;;  %v1893_v3 = vld [vmem:[%s5570_s6 + $0x20] sm:$0xff] }
 0x417   :  { %3470 = vmatprep.subr.mxu0 %v1601_v11 }
 0x418   :  { %3471 = vmatpush3.msra.mxu0 %v1601_v11 }
 0x419   :  { %3472 = vmatprep.subr.mxu0 %v1600_v62 }
 0x41a   :  { %3473 = vmatpush3.msra.mxu0 %v1600_v62  ;;  %v1906_v62 = vld [vmem:[%s5570_s6 + $0x88] sm:$0xff] }
 0x41b   :  { %3474 = vmatprep.subr.mxu0 %v1599_v46 }
 0x41c   :  { %3475 = vmatpush3.msra.mxu0 %v1599_v46  ;;  %v1905_v46 = vld [vmem:[%s5570_s6 + $0x80] sm:$0xff] }
 0x41d   :  { %3476 = vmatprep.subr.mxu0 %v1598_v58 }
 0x41e   :  { %3477 = vmatpush3.msra.mxu0 %v1598_v58 }
 0x41f   :  { %3478 = vmatprep.subr.mxu0 %v1597_v17 }
 0x420   :  { %3479 = vmatpush3.msra.mxu0 %v1597_v17  ;;  %v1952_v17 = vld [vmem:[%s5570_s6 + $0x1f8] sm:$0xff] }
 0x421   :  { %3480 = vmatprep.subr.mxu0 %v1596_v22 }
 0x422   :  { %3481 = vmatpush3.msra.mxu0 %v1596_v22 }
 0x423   :  { %3483 = vmatmul.mubr.msk.f32.vlgmr.msra.gmra.mxu0 %vm1639_vm8, %v3029_v23  ;;  %3196 = vmatprep.subr.mxu0 %v1920_v45 }
 0x424   :  { %3485 = vmatprep.mubr.msk.f32.mxu0 %vm1639_vm8, %v3032_v12  ;;  %3197 = vmatpush3.msra.mxu0 %v1904_v2  ;;  %v1935_v2 = vld [vmem:[%s5570_s6 + $0x170] sm:$0xff] }
 0x425   :  { %3198 = vmatprep.subr.mxu0 %v1919_v13  ;;  %v1950_v13 = vld [vmem:[%s5570_s6 + $0x1e8] sm:$0xff] }
 0x426   :  { %3199 = vmatpush3.msra.mxu0 %v1903_v41  ;;  %v1934_v41 = vld [vmem:[%s5570_s6 + $0x168] sm:$0xff] }
 0x427   :  { %3486 = vmatmul.mubr.msk.f32.gmra.mxu0 %vm1639_vm8, %v3033_v21  ;;  %3200 = vmatprep.subr.mxu0 %v1918_v55 }
 0x428   :  { %3488 = vmatprep.mubr.msk.f32.mxu0 %vm1639_vm8, %v3036_v4  ;;  %3201 = vmatpush3.msra.mxu0 %v1902_v48  ;;  %v1949_v48 = vld [vmem:[%s5570_s6 + $0x1e0] sm:$0xff] }
 0x429   :  { %3202 = vmatprep.subr.mxu0 %v1917_v28  ;;  %v1933_v28 = vld [vmem:[%s5570_s6 + $0x160] sm:$0xff] }
 0x42a   :  { %3203 = vmatpush3.msra.mxu0 %v1901_v29  ;;  %v1948_v29 = vld [vmem:[%s5570_s6 + $0x1d8] sm:$0xff] }
 0x42b   :  { %3489 = vmatmul.mubr.msk.f32.gmra.mxu0 %vm1639_vm8, %v3037_v60  ;;  %3204 = vmatprep.subr.mxu0 %v1916_v47  ;;  %v1932_v47 = vld [vmem:[%s5570_s6 + $0x158] sm:$0xff] }
 0x42c   :  { %3491 = vmatprep.mubr.msk.f32.mxu0 %vm1639_vm8, %v3040_v15  ;;  %3205 = vmatpush3.msra.mxu0 %v1900_v57  ;;  %v1947_v57 = vld [vmem:[%s5570_s6 + $0x1d0] sm:$0xff] }
 0x42d   :  { %3206 = vmatprep.subr.mxu0 %v1915_v9  ;;  %v1931_v9 = vld [vmem:[%s5570_s6 + $0x150] sm:$0xff] }
 0x42e   :  { %3207 = vmatpush3.msra.mxu0 %v1899_v39  ;;  %v1946_v39 = vld [vmem:[%s5570_s6 + $0x1c8] sm:$0xff] }
 0x42f   :  { %3492 = vmatmul.mubr.msk.f32.gmra.mxu0 %vm1639_vm8, %v3041_v51  ;;  %3208 = vmatprep.subr.mxu0 %v1914_v50  ;;  %v1930_v50 = vld [vmem:[%s5570_s6 + $0x148] sm:$0xff] }
 0x430   :  { %3494 = vmatprep.mubr.msk.f32.mxu0 %vm1639_vm8, %v3044_v59  ;;  %3209 = vmatpush3.msra.mxu0 %v1898_v49 }
 0x431   :  { %3210 = vmatprep.subr.mxu0 %v1913_v61  ;;  %v1945_v61 = vld [vmem:[%s5570_s6 + $0x1c0] sm:$0xff] }
 0x432   :  { %3211 = vmatpush3.msra.mxu0 %v1897_v8 }
 0x433   :  { %3495 = vmatmul.mubr.msk.f32.gmra.mxu0 %vm1639_vm8, %v3045_v14  ;;  %3212 = vmatprep.subr.mxu0 %v1912_v33  ;;  %v1929_v33 = vld [vmem:[%s5570_s6 + $0x140] sm:$0xff] }
 0x434   :  { %3497 = vmatprep.mubr.msk.f32.mxu0 %vm1639_vm8, %v3048_v26  ;;  %3213 = vmatpush3.msra.mxu0 %v1896_v16  ;;  %v1944_v16 = vld [vmem:[%s5570_s6 + $0x1b8] sm:$0xff] }
 0x435   :  { %3214 = vmatprep.subr.mxu0 %v1911_v37 }
 0x436   :  { %3215 = vmatpush3.msra.mxu0 %v1895_v25  ;;  %v1928_v25 = vld [vmem:[%s5570_s6 + $0x138] sm:$0xff] }
 0x437   :  { %3498 = vmatmul.mubr.msk.f32.gmra.mxu0 %vm1639_vm8, %v3049_v27  ;;  %3216 = vmatprep.subr.mxu0 %v1910_v63  ;;  %v1943_v63 = vld [vmem:[%s5570_s6 + $0x1b0] sm:$0xff] }
 0x438   :  { %3500 = vmatprep.mubr.msk.f32.mxu0 %vm1639_vm8, %v3052_v30  ;;  %3217 = vmatpush3.msra.mxu0 %v1894_v53  ;;  %v1927_v53 = vld [vmem:[%s5570_s6 + $0x130] sm:$0xff] }
 0x439   :  { %3218 = vmatprep.subr.mxu0 %v1909_v31  ;;  %v1942_v31 = vld [vmem:[%s5570_s6 + $0x1a8] sm:$0xff] }
 0x43a   :  { %3219 = vmatpush3.msra.mxu0 %v1893_v3  ;;  %v1926_v3 = vld [vmem:[%s5570_s6 + $0x128] sm:$0xff] }
 0x43b   :  { %3501 = vmatmul.mubr.msk.f32.gmra.mxu0 %vm1639_vm8, %v3053_v32  ;;  %3220 = vmatprep.subr.mxu0 %v1908_v20  ;;  %v1941_v20 = vld [vmem:[%s5570_s6 + $0x1a0] sm:$0xff] }
 0x43c   :  { %3503 = vmatprep.mubr.msk.f32.mxu0 %vm1639_vm8, %v3056_v34  ;;  %3221 = vmatpush3.msra.mxu0 %v1892_v56  ;;  %v1925_v56 = vld [vmem:[%s5570_s6 + $0x120] sm:$0xff] }
 0x43d   :  { %3222 = vmatprep.subr.mxu0 %v1907_v35  ;;  %v1940_v35 = vld [vmem:[%s5570_s6 + $0x198] sm:$0xff] }
 0x43e   :  { %3223 = vmatpush3.msra.mxu0 %v1891_v6  ;;  %v1939_v6 = vld [vmem:[%s5570_s6 + $0x190] sm:$0xff] }
 0x43f   :  { %3504 = vmatmul.mubr.msk.f32.gmra.mxu0 %vm1639_vm8, %v3057_v40  ;;  %3224 = vmatprep.subr.mxu0 %v1906_v62  ;;  %v1936_v40 = vld [vmem:[%s5570_s6 + $0x178] sm:$0xff] }
 0x440   :  { %3506 = vmatprep.mubr.msk.f32.mxu0 %vm1639_vm8, %v3060_v44  ;;  %3225 = vmatpush3.msra.mxu0 %v1890_v54  ;;  %v1938_v54 = vld [vmem:[%s5570_s6 + $0x188] sm:$0xff] }
 0x441   :  { %3226 = vmatprep.subr.mxu0 %v1905_v46 }
 0x442   :  { %3227 = vmatpush3.msra.mxu0 %v1889_v10  ;;  %v1937_v10 = vld [vmem:[%s5570_s6 + $0x180] sm:$0xff] }
 0x443   :  { %3507 = vmatmul.mubr.msk.f32.gmra.mxu0 %vm1639_vm8, %v3061_v52  ;;  %3234 = vmatprep.subr.mxu0 %v1952_v17  ;;  %v1951_v52 = vld [vmem:[%s5570_s6 + $0x1f0] sm:$0xff]  ;;  %v1921_v17 = vld [vmem:[%s5570_s6 + $0x100] sm:$0xff] }
 0x4e3   :  { %v3484_v11 = vpop.f32.mrf.mxu0 }
 0x4e5   :  { %v1760_v18 = vpop.f32.mrf.mxu0 }
 0x4e7   :  { %v3487_v5 = vpop.f32.mrf.mxu0 }
 0x4e9   :  { %v1770_v58 = vpop.f32.mrf.mxu0 }
 0x4eb   :  { %v3490_v19 = vpop.f32.mrf.mxu0 }
 0x4ed   :  { %v1780_v22 = vpop.f32.mrf.mxu0 }
 0x4ef   :  { %v3493_v23 = vpop.f32.mrf.mxu0 }
 0x4f0   :  { %v3659_v12 = vpack.i.bf16 %v3487_v5, %v3493_v23  ;;  %v1922_v5 = vld [vmem:[%s5570_s6 + $0x108] sm:$0xff] }
 0x4f1   :  { %v1790_v42 = vpop.f32.mrf.mxu0 }
 0x4f2   :  { %v3654_v21 = vpack.i.bf16 %v1770_v58, %v1790_v42  ;;  %3660 = vrot.lane.b32.xlu0 %v3659_v12, %s3677_s25  ;;  %v1959_v42 = vld [vmem:[%s5570_s6 + $0x230] sm:$0xff] }
 0x4f3   :  { %v4724_v4 = vpop.f32.mrf.mxu0 }
 0x4f4   :  { %3655 = vrot.lane.b32.xlu1 %v3654_v21, %s3677_s25 }
 0x4f5   :  { %v4727_v7 = vpop.f32.mrf.mxu0 }
 0x4f7   :  { %v3499_v60 = vpop.f32.mrf.mxu0 }
 0x4f9   :  { %v1810_v15 = vpop.f32.mrf.mxu0 }
 0x4fb   :  { %v4729_v43 = vpop.f32.mrf.mxu0 }
 0x4fd   :  { %v1820_v51 = vpop.f32.mrf.mxu0 }
 0x4ff   :  { %v3505_v59 = vpop.f32.mrf.mxu0 }
 0x500   :  { %v3669_v24 = vpack.i.bf16 %v3499_v60, %v3505_v59  ;;  %v1958_v60 = vld [vmem:[%s5570_s6 + $0x228] sm:$0xff]  ;;  %v1955_v59 = vld [vmem:[%s5570_s6 + $0x210] sm:$0xff] }
 0x501   :  { %v1830_v14 = vpop.f32.mrf.mxu0 }
 0x502   :  { %v3664_v26 = vpack.i.bf16 %v1810_v15, %v1830_v14  ;;  %3670 = vrot.lane.b32.xlu0 %v3669_v24, %s3677_s25  ;;  %v1953_v24 = vld [vmem:[%s5570_s6 + $0x200] sm:$0xff] }
 0x503   :  { %v3063_v14 = vld [vmem:[%s5571_s3] sm:$0xff]  }
 0x504   :  { %3665 = vrot.lane.b32.xlu1 %v3664_v26, %s3677_s25  ;;  %v3064_v26 = vunpack.c.l.bf16 %v3063_v14 }
 0x564   :  { %v3661_v1 = vpop.permute.xlu0 %3660 }
 0x565   :  { %v3662_v30 = vunpack.i.l.bf16 %v3661_v1  ;;  %v3663_v44 = vunpack.i.h.bf16 %v3661_v1 }
 0x566   :  { %v3656_v27 = vpop.permute.xlu1 %3655 }
 0x567   :  { %v3658_v36 = vunpack.i.h.bf16 %v3656_v27  ;;  %v3657_v32 = vunpack.i.l.bf16 %v3656_v27  ;;  %v1884_v45 = vsel %vm1301_vm6, %v3490_v19, %v3662_v30  ;;  %v1882_v55 = vsel %vm1301_vm6, %v3484_v11, %v3663_v44  ;;  %v1924_v11 = vld [vmem:[%s5570_s6 + $0x118] sm:$0xff] }
 0x568   :  { %v1960_v19 = vld [vmem:[%s5570_s6 + $0x238] sm:$0xff] }
 0x569   :  { %v1883_v34 = vsel %vm1301_vm6, %v1780_v22, %v3657_v32  ;;  %v1881_v38 = vsel %vm1301_vm6, %v1760_v18, %v3658_v36  ;;  %v1923_v18 = vld [vmem:[%s5570_s6 + $0x110] sm:$0xff]  ;;  %v3508_v22 = vpop.f32.mrf.mxu0 }
 0x56a   :  { %2032 = vmatprep.mubr.f32.mxu0 %v1883_v34 }
 0x56b   :  { %2033 = vmatmul.mubr.f32.vlgmr.msra.gmra.mxu0 %v1881_v38  ;;  %v1840_v15 = vpop.f32.mrf.mxu0 }
 0x56c   :  { %3235 = vmatpush3.msra.mxu0 %v1936_v40  ;;  %2037 = vmatprep.mubr.f32.mxu0 %v1884_v45 }
 0x56d   :  { %3236 = vmatprep.subr.mxu0 %v1951_v52 }
 0x56e   :  { %3237 = vmatpush3.msra.mxu0 %v1935_v2  ;;  %v1961_v2 = vld [vmem:[%s5567_s10 + $0x2] ss:$0 sm:$0xff] }
 0x56f   :  { %3238 = vmatprep.subr.mxu0 %v1950_v13  ;;  %2038 = vmatmul.mubr.f32.gmra.mxu0 %v1882_v55 }
 0x570   :  { %3239 = vmatpush3.msra.mxu0 %v1934_v41 }
 0x571   :  { %3240 = vmatprep.subr.mxu0 %v1949_v48 }
 0x572   :  { %3241 = vmatpush3.msra.mxu0 %v1933_v28 }
 0x573   :  { %3242 = vmatprep.subr.mxu0 %v1948_v29 }
 0x574   :  { %3243 = vmatpush3.msra.mxu0 %v1932_v47  ;;  %v3671_v62 = vpop.permute.xlu0 %3670 }
 0x575   :  { %3244 = vmatprep.subr.mxu0 %v1947_v57  ;;  %v3672_v58 = vunpack.i.l.bf16 %v3671_v62  ;;  %v3673_v23 = vunpack.i.h.bf16 %v3671_v62  ;;  %v2310_v62 = vld [vmem:[%s5572_s7 + $0x48] sm:$0xff] }
 0x576   :  { %3245 = vmatpush3.msra.mxu0 %v1931_v9  ;;  %v3666_v49 = vpop.permute.xlu1 %3665 }
 0x577   :  { %3246 = vmatprep.subr.mxu0 %v1946_v39  ;;  %v3667_v8 = vunpack.i.l.bf16 %v3666_v49  ;;  %v3668_v46 = vunpack.i.h.bf16 %v3666_v49  ;;  %v1888_v21 = vsel %vm1301_vm6, %v4729_v43, %v3672_v58  ;;  %v1956_v43 = vld [vmem:[%s5570_s6 + $0x218] sm:$0xff]  ;;  %v2323_v58 = vld [vmem:[%s5572_s7 + $0xb0] sm:$0xff] }
 0x578   :  { %3247 = vmatpush3.msra.mxu0 %v1930_v50  ;;  %v3078_v50 = vld [vmem:[%s5571_s3 + $0x8] sm:$0xff]  }
 0x579   :  { %3248 = vmatprep.subr.mxu0 %v1945_v61  ;;  %v1887_v37 = vsel %vm1301_vm6, %v1820_v51, %v3667_v8  ;;  %v1885_v12 = vsel %vm1301_vm6, %v4727_v7, %v3668_v46  ;;  %v1886_v7 = vsel %vm1301_vm6, %v4724_v4, %v3673_v23  ;;  %v1957_v51 = vld [vmem:[%s5570_s6 + $0x220] sm:$0xff]  ;;  %v1954_v4 = vld [vmem:[%s5570_s6 + $0x208] sm:$0xff]  ;;  %v3065_v61 = vunpack.c.h.bf16 %v3063_v14  ;;  %v2324_v46 = vld [vmem:[%s5572_s7 + $0xb8] sm:$0xff] }
 0x57a   :  { %3249 = vmatpush3.msra.mxu0 %v1929_v33  ;;  %2107 = vmatprep.mubr.f32.mxu0 %v1887_v37  ;;  %v3068_v8 = vunpack.c.l.bf16 %v3078_v50  ;;  %v2332_v33 = vld [vmem:[%s5572_s7 + $0xf8] sm:$0xff]  ;;  %v2331_v37 = vld [vmem:[%s5572_s7 + $0xf0] sm:$0xff]  ;;  %v2321_v23 = vld [vmem:[%s5572_s7 + $0xa0] sm:$0xff] }
 0x57b   :  { %3250 = vmatprep.subr.mxu0 %v1944_v16  ;;  %v2316_v16 = vld [vmem:[%s5572_s7 + $0x78] sm:$0xff]  ;;  %v2608_v14 = vld [vmem:[%s5573_s8 + $0x2f0] sm:$0xff] }
 0x57c   :  { %3251 = vmatpush3.msra.mxu0 %v1928_v25  ;;  %v3069_v25 = vunpack.c.h.bf16 %v3078_v50  ;;  %v2584_v50 = vld [vmem:[%s5573_s8 + $0x230] sm:$0xff] }
 0x57d   :  { %3252 = vmatprep.subr.mxu0 %v1943_v63  ;;  %v2315_v63 = vld [vmem:[%s5572_s7 + $0x70] sm:$0xff] }
 0x57e   :  { %3253 = vmatpush3.msra.mxu0 %v1927_v53  ;;  %v2330_v53 = vld [vmem:[%s5572_s7 + $0xe8] sm:$0xff] }
 0x57f   :  { %3254 = vmatprep.subr.mxu0 %v1942_v31  ;;  %v2314_v31 = vld [vmem:[%s5572_s7 + $0x68] sm:$0xff] }
 0x580   :  { %3255 = vmatpush3.msra.mxu0 %v1926_v3  ;;  %v2329_v3 = vld [vmem:[%s5572_s7 + $0xe0] sm:$0xff] }
 0x581   :  { %3256 = vmatprep.subr.mxu0 %v1941_v20  ;;  %v2313_v20 = vld [vmem:[%s5572_s7 + $0x60] sm:$0xff] }
 0x582   :  { %3257 = vmatpush3.msra.mxu0 %v1925_v56  ;;  %v2328_v56 = vld [vmem:[%s5572_s7 + $0xd8] sm:$0xff] }
 0x583   :  { %3258 = vmatprep.subr.mxu0 %v1940_v35  ;;  %v2312_v35 = vld [vmem:[%s5572_s7 + $0x58] sm:$0xff] }
 0x584   :  { %3259 = vmatpush3.msra.mxu0 %v1924_v11  ;;  %v2327_v11 = vld [vmem:[%s5572_s7 + $0xd0] sm:$0xff] }
 0x585   :  { %3260 = vmatprep.subr.mxu0 %v1939_v6  ;;  %v2311_v6 = vld [vmem:[%s5572_s7 + $0x50] sm:$0xff] }
 0x586   :  { %3261 = vmatpush3.msra.mxu0 %v1923_v18  ;;  %v2326_v18 = vld [vmem:[%s5572_s7 + $0xc8] sm:$0xff] }
 0x587   :  { %3262 = vmatprep.subr.mxu0 %v1938_v54  ;;  %v2325_v54 = vld [vmem:[%s5572_s7 + $0xc0] sm:$0xff] }
 0x588   :  { %3263 = vmatpush3.msra.mxu0 %v1922_v5  ;;  %v2309_v5 = vld [vmem:[%s5572_s7 + $0x40] sm:$0xff] }
 0x589   :  { %3264 = vmatprep.subr.mxu0 %v1937_v10  ;;  %v2308_v10 = vld [vmem:[%s5572_s7 + $0x38] sm:$0xff] }
 0x58a   :  { %3265 = vmatpush3.msra.mxu0 %v1921_v17  ;;  %v2307_v17 = vld [vmem:[%s5572_s7 + $0x30] sm:$0xff] }
 0x58b   :  { %2108 = vmatmul.mubr.f32.vlgmr.msra.gmra.mxu0 %v1885_v12  ;;  %3509 = vmatprep.subr.mxu0 %v1960_v19  ;;  %v2305_v12 = vld [vmem:[%s5572_s7 + $0x20] sm:$0xff] }
 0x58c   :  { %2112 = vmatprep.mubr.f32.mxu0 %v1888_v21  ;;  %3510 = vmatpush3.msra.mxu0 %v1960_v19  ;;  %v2322_v19 = vld [vmem:[%s5572_s7 + $0xa8] sm:$0xff]  ;;  %v2304_v21 = vld [vmem:[%s5572_s7 + $0x18] sm:$0xff] }
 0x58d   :  { %3511 = vmatprep.subr.mxu0 %v1959_v42 }
 0x58e   :  { %3512 = vmatpush3.msra.mxu0 %v1959_v42  ;;  %v2320_v42 = vld [vmem:[%s5572_s7 + $0x98] sm:$0xff] }
 0x58f   :  { %2113 = vmatmul.mubr.f32.gmra.mxu0 %v1886_v7  ;;  %3513 = vmatprep.subr.mxu0 %v1958_v60  ;;  %v2318_v7 = vld [vmem:[%s5572_s7 + $0x88] sm:$0xff] }
 0x590   :  { %3514 = vmatpush3.msra.mxu0 %v1958_v60  ;;  %3525 = vmatprep.mubr.msk.f32.mxu0 %vm1301_vm6, %v1840_v15  ;;  %v2319_v60 = vld [vmem:[%s5572_s7 + $0x90] sm:$0xff] }
 0x591   :  { %3515 = vmatprep.subr.mxu0 %v1957_v51  ;;  %v2303_v15 = vld [vmem:[%s5572_s7 + $0x10] sm:$0xff] }
 0x592   :  { %3516 = vmatpush3.msra.mxu0 %v1957_v51  ;;  %v2302_v51 = vld [vmem:[%s5572_s7 + $0x8] sm:$0xff] }
 0x593   :  { %3517 = vmatprep.subr.mxu0 %v1956_v43 }
 0x594   :  { %3518 = vmatpush3.msra.mxu0 %v1956_v43  ;;  %v2317_v43 = vld [vmem:[%s5572_s7 + $0x80] sm:$0xff] }
 0x595   :  { %3519 = vmatprep.subr.mxu0 %v1955_v59 }
 0x596   :  { %3520 = vmatpush3.msra.mxu0 %v1955_v59  ;;  %v2301_v59 = vld [vmem:[%s5572_s7] sm:$0xff] }
 0x597   :  { %3521 = vmatprep.subr.mxu0 %v1954_v4 }
 0x598   :  { %3522 = vmatpush3.msra.mxu0 %v1954_v4  ;;  %v2364_v4 = vld [vmem:[%s5572_s7 + $0x1f8] sm:$0xff] }
 0x599   :  { %3523 = vmatprep.subr.mxu0 %v1953_v24 }
 0x59a   :  { %3524 = vmatpush3.msra.mxu0 %v1953_v24  ;;  %v2609_v24 = vld [vmem:[%s5573_s8 + $0x2f8] sm:$0xff] }
 0x59b   :  { %3526 = vmatmul.mubr.msk.f32.vlgmr.msra.gmra.mxu0 %vm1301_vm6, %v3508_v22  ;;  %v2306_v22 = vld [vmem:[%s5572_s7 + $0x28] sm:$0xff]  ;;  %2726 = vmatprep.subr.mxu1 %v2609_v24  ;;  %v2344_v24 = vld [vmem:[%s5572_s7 + $0x158] sm:$0xff] }
 0x59c   :  { %3532 = vmatprep.mubr.msk.f32.mxu0 %vm2203_vm9, %v3064_v26  ;;  %2727 = vmatpush1.msra.mxu1 %v2608_v14  ;;  %v2607_v26 = vld [vmem:[%s5573_s8 + $0x2e8] sm:$0xff]  ;;  %v2359_v14 = vld [vmem:[%s5572_s7 + $0x1d0] sm:$0xff] }
 0x59d   :  { %2728 = vmatprep.subr.mxu1 %v2607_v26  ;;  %v2343_v26 = vld [vmem:[%s5572_s7 + $0x150] sm:$0xff] }
 0x62b   :  { %v3228_v1 = vpop.f32.mrf.mxu0 }
 0x62d   :  { %v3229_v27 = vpop.f32.mrf.mxu0 }
 0x62e   :  { %v3230_v52 = vadd.f32 %v3229_v27, %v3228_v1  ;;  %v2606_v1 = vld [vmem:[%s5573_s8 + $0x2e0] sm:$0xff]  ;;  %v2605_v27 = vld [vmem:[%s5573_s8 + $0x2d8] sm:$0xff] }
 0x62f   :  { %v3231_v30 = vpop.f32.mrf.mxu0  ;;  %2729 = vmatpush1.msra.mxu1 %v2606_v1  ;;  %v2358_v1 = vld [vmem:[%s5572_s7 + $0x1c8] sm:$0xff] }
 0x630   :  { %v2035_v55 = vadd.f32 %v3230_v52, %v1961_v2  ;;  %2730 = vmatprep.subr.mxu1 %v2605_v27  ;;  %v2597_v52 = vld [vmem:[%s5573_s8 + $0x298] sm:$0xff]  ;;  %v2342_v27 = vld [vmem:[%s5572_s7 + $0x148] sm:$0xff] }
 0x631   :  { %v3232_v36 = vpop.f32.mrf.mxu0 }
 0x632   :  { %v3233_v44 = vadd.f32 %v3232_v36, %v3231_v30  ;;  %v2604_v30 = vld [vmem:[%s5573_s8 + $0x2d0] sm:$0xff]  ;;  %v2603_v36 = vld [vmem:[%s5573_s8 + $0x2c8] sm:$0xff] }
 0x633   :  { %2731 = vmatpush1.msra.mxu1 %v2604_v30  ;;  %v2357_v30 = vld [vmem:[%s5572_s7 + $0x1c0] sm:$0xff] }
 0x634   :  { %v2040_v13 = vadd.f32 %v3233_v44, %v1961_v2  ;;  %2732 = vmatprep.subr.mxu1 %v2603_v36  ;;  %v2598_v44 = vld [vmem:[%s5573_s8 + $0x2a0] sm:$0xff]  ;;  %v2595_v2 = vld [vmem:[%s5573_s8 + $0x288] sm:$0xff] }
 0x635   :  { %v2341_v36 = vld [vmem:[%s5572_s7 + $0x140] sm:$0xff] }
 0x64b   :  { %v3266_v32 = vpop.f32.mrf.mxu0 }
 0x64d   :  { %v3267_v34 = vpop.f32.mrf.mxu0 }
 0x64e   :  { %v3268_v41 = vadd.f32 %v3267_v34, %v3266_v32  ;;  %v2602_v32 = vld [vmem:[%s5573_s8 + $0x2c0] sm:$0xff]  ;;  %v2601_v34 = vld [vmem:[%s5573_s8 + $0x2b8] sm:$0xff] }
 0x64f   :  { %v3269_v38 = vpop.f32.mrf.mxu0  ;;  %2733 = vmatpush1.msra.mxu1 %v2602_v32  ;;  %v2356_v32 = vld [vmem:[%s5572_s7 + $0x1b8] sm:$0xff] }
 0x650   :  { %v2110_v47 = vadd.f32 %v3268_v41, %v2035_v55  ;;  %2734 = vmatprep.subr.mxu1 %v2601_v34  ;;  %v2593_v41 = vld [vmem:[%s5573_s8 + $0x278] sm:$0xff]  ;;  %v2592_v55 = vld [vmem:[%s5573_s8 + $0x270] sm:$0xff] }
 0x651   :  { %v3270_v40 = vpop.f32.mrf.mxu0  ;;  %v2340_v34 = vld [vmem:[%s5572_s7 + $0x138] sm:$0xff] }
 0x652   :  { %v3271_v45 = vadd.f32 %v3270_v40, %v3269_v38  ;;  %v2600_v38 = vld [vmem:[%s5573_s8 + $0x2b0] sm:$0xff]  ;;  %v2599_v40 = vld [vmem:[%s5573_s8 + $0x2a8] sm:$0xff] }
 0x653   :  { %2735 = vmatpush1.msra.mxu1 %v2600_v38  ;;  %v2355_v38 = vld [vmem:[%s5572_s7 + $0x1b0] sm:$0xff] }
 0x654   :  { %v2115_v48 = vadd.f32 %v3271_v45, %v2040_v13  ;;  %2736 = vmatprep.subr.mxu1 %v2599_v40  ;;  %v2596_v45 = vld [vmem:[%s5573_s8 + $0x290] sm:$0xff]  ;;  %v2594_v13 = vld [vmem:[%s5573_s8 + $0x280] sm:$0xff] }
 0x655   :  { %2737 = vmatpush1.msra.mxu1 %v2598_v44  ;;  %v2339_v40 = vld [vmem:[%s5572_s7 + $0x130] sm:$0xff]  ;;  %v2354_v44 = vld [vmem:[%s5572_s7 + $0x1a8] sm:$0xff] }
 0x656   :  { %2738 = vmatprep.subr.mxu1 %v2597_v52  ;;  %v2338_v52 = vld [vmem:[%s5572_s7 + $0x128] sm:$0xff] }
 0x657   :  { %2739 = vmatpush1.msra.mxu1 %v2596_v45  ;;  %v2353_v45 = vld [vmem:[%s5572_s7 + $0x1a0] sm:$0xff] }
 0x658   :  { %2740 = vmatprep.subr.mxu1 %v2595_v2  ;;  %v2337_v2 = vld [vmem:[%s5572_s7 + $0x120] sm:$0xff] }
 0x659   :  { %2741 = vmatpush1.msra.mxu1 %v2594_v13  ;;  %v2352_v13 = vld [vmem:[%s5572_s7 + $0x198] sm:$0xff] }
 0x65a   :  { %2742 = vmatprep.subr.mxu1 %v2593_v41  ;;  %v2336_v41 = vld [vmem:[%s5572_s7 + $0x118] sm:$0xff] }
 0x65b   :  { %v3527_v28 = vpop.f32.mrf.mxu0  ;;  %2743 = vmatpush1.msra.mxu1 %v2592_v55  ;;  %v2351_v55 = vld [vmem:[%s5572_s7 + $0x190] sm:$0xff] }
 0x65c   :  { %v2190_v29 = vadd.f32 %v3527_v28, %v2115_v48  ;;  %v2591_v48 = vld [vmem:[%s5573_s8 + $0x268] sm:$0xff]  ;;  %v2590_v28 = vld [vmem:[%s5573_s8 + $0x260] sm:$0xff] }
 0x65d   :  { %v2184_v57 = vpop.f32.mrf.mxu0  ;;  %2744 = vmatprep.subr.mxu1 %v2591_v48  ;;  %v2335_v48 = vld [vmem:[%s5572_s7 + $0x110] sm:$0xff] }
 0x65e   :  { %v2194_v9 = vmax.f32 %v2190_v29, 0.0  ;;  %v2185_v39 = vadd.f32 %v2184_v57, %v2110_v47  ;;  %v2589_v29 = vld [vmem:[%s5573_s8 + $0x258] sm:$0xff]  ;;  %v2588_v47 = vld [vmem:[%s5573_s8 + $0x250] sm:$0xff]  ;;  %2745 = vmatpush1.msra.mxu1 %v2590_v28  ;;  %v2587_v57 = vld [vmem:[%s5573_s8 + $0x248] sm:$0xff] }
 0x65f   :  { %2746 = vmatprep.subr.mxu1 %v2589_v29  ;;  %v2350_v28 = vld [vmem:[%s5572_s7 + $0x188] sm:$0xff] }
 0x660   :  { %v2193_v49 = vmax.f32 %v2185_v39, 0.0  ;;  %3528 = vmatprep.subr.mxu0 %v2194_v9  ;;  %2747 = vmatpush1.msra.mxu1 %v2588_v47  ;;  %v2585_v39 = vld [vmem:[%s5573_s8 + $0x238] sm:$0xff]  ;;  %v2334_v29 = vld [vmem:[%s5572_s7 + $0x108] sm:$0xff]  ;;  %v2349_v47 = vld [vmem:[%s5572_s7 + $0x180] sm:$0xff] }
 0x661   :  { %3529 = vmatpush3.msra.mxu0 %v2194_v9  ;;  %v2586_v9 = vld [vmem:[%s5573_s8 + $0x240] sm:$0xff]  ;;  %2748 = vmatprep.subr.mxu1 %v2587_v57 }
 0x662   :  { %3530 = vmatprep.subr.mxu0 %v2193_v49  ;;  %2749 = vmatpush1.msra.mxu1 %v2586_v9  ;;  %v2333_v57 = vld [vmem:[%s5572_s7 + $0x100] sm:$0xff]  ;;  %v2545_v9 = vld [vmem:[%s5573_s8 + $0xf8] sm:$0xff] }
 0x663   :  { %3531 = vmatpush3.msra.mxu0 %v2193_v49  ;;  %v2583_v49 = vld [vmem:[%s5573_s8 + $0x228] sm:$0xff]  ;;  %2750 = vmatprep.subr.mxu1 %v2585_v39  ;;  %v2544_v39 = vld [vmem:[%s5573_s8 + $0xf0] sm:$0xff] }
 0x664   :  { %3533 = vmatmul.mubr.msk.f32.vlgmr.msra.gmra.mxu0 %vm2203_vm9, %v3065_v61  ;;  %3288 = vmatprep.subr.mxu0 %v2332_v33  ;;  %v2582_v61 = vld [vmem:[%s5573_s8 + $0x220] sm:$0xff]  ;;  %v2580_v33 = vld [vmem:[%s5573_s8 + $0x210] sm:$0xff] }
 0x665   :  { %3535 = vmatprep.mubr.msk.f32.mxu0 %vm2203_vm9, %v3068_v8  ;;  %3289 = vmatpush3.msra.mxu0 %v2316_v16  ;;  %v2581_v8 = vld [vmem:[%s5573_s8 + $0x218] sm:$0xff]  ;;  %v2579_v16 = vld [vmem:[%s5573_s8 + $0x208] sm:$0xff] }
 0x666   :  { %3290 = vmatprep.subr.mxu0 %v2331_v37  ;;  %2751 = vmatpush1.msra.mxu1 %v2584_v50  ;;  %v2578_v37 = vld [vmem:[%s5573_s8 + $0x200] sm:$0xff] }
 0x667   :  { %3291 = vmatpush3.msra.mxu0 %v2315_v63  ;;  %2752 = vmatprep.subr.mxu1 %v2583_v49  ;;  %v2640_v63 = vld [vmem:[%s5573_s8 + $0x3f0] sm:$0xff]  ;;  %v2543_v49 = vld [vmem:[%s5573_s8 + $0xe8] sm:$0xff] }
 0x668   :  { %3536 = vmatmul.mubr.msk.f32.gmra.mxu0 %vm2203_vm9, %v3069_v25  ;;  %3292 = vmatprep.subr.mxu0 %v2330_v53  ;;  %v2641_v25 = vld [vmem:[%s5573_s8 + $0x3f8] sm:$0xff]  ;;  %v2639_v53 = vld [vmem:[%s5573_s8 + $0x3e8] sm:$0xff] }
 0x669   :  { %3293 = vmatpush3.msra.mxu0 %v2314_v31  ;;  %2753 = vmatpush1.msra.mxu1 %v2582_v61  ;;  %v2638_v31 = vld [vmem:[%s5573_s8 + $0x3e0] sm:$0xff] }
 0x66a   :  { %3294 = vmatprep.subr.mxu0 %v2329_v3  ;;  %2754 = vmatprep.subr.mxu1 %v2581_v8  ;;  %v2637_v3 = vld [vmem:[%s5573_s8 + $0x3d8] sm:$0xff]  ;;  %v2542_v61 = vld [vmem:[%s5573_s8 + $0xe0] sm:$0xff] }
 0x66b   :  { %3295 = vmatpush3.msra.mxu0 %v2313_v20  ;;  %2755 = vmatpush1.msra.mxu1 %v2580_v33  ;;  %v2636_v20 = vld [vmem:[%s5573_s8 + $0x3d0] sm:$0xff]  ;;  %v2541_v8 = vld [vmem:[%s5573_s8 + $0xd8] sm:$0xff] }
 0x66c   :  { %3296 = vmatprep.subr.mxu0 %v2328_v56  ;;  %2756 = vmatprep.subr.mxu1 %v2579_v16  ;;  %v2635_v56 = vld [vmem:[%s5573_s8 + $0x3c8] sm:$0xff]  ;;  %v2540_v33 = vld [vmem:[%s5573_s8 + $0xd0] sm:$0xff] }
 0x66d   :  { %3297 = vmatpush3.msra.mxu0 %v2312_v35  ;;  %2757 = vmatpush1.msra.mxu1 %v2578_v37  ;;  %v2634_v35 = vld [vmem:[%s5573_s8 + $0x3c0] sm:$0xff]  ;;  %v2539_v16 = vld [vmem:[%s5573_s8 + $0xc8] sm:$0xff] }
 0x66e   :  { %3298 = vmatprep.subr.mxu0 %v2327_v11  ;;  %2758 = vmatprep.subr.mxu1 %v2641_v25  ;;  %v2633_v11 = vld [vmem:[%s5573_s8 + $0x3b8] sm:$0xff]  ;;  %v2538_v37 = vld [vmem:[%s5573_s8 + $0xc0] sm:$0xff] }
 0x66f   :  { %3299 = vmatpush3.msra.mxu0 %v2311_v6  ;;  %2759 = vmatpush2.msra.mxu1 %v2640_v63  ;;  %v2632_v6 = vld [vmem:[%s5573_s8 + $0x3b0] sm:$0xff]  ;;  %v2537_v25 = vld [vmem:[%s5573_s8 + $0xb8] sm:$0xff] }
 0x670   :  { %3300 = vmatprep.subr.mxu0 %v2326_v18  ;;  %2760 = vmatprep.subr.mxu1 %v2639_v53  ;;  %v2631_v18 = vld [vmem:[%s5573_s8 + $0x3a8] sm:$0xff]  ;;  %v2536_v63 = vld [vmem:[%s5573_s8 + $0xb0] sm:$0xff] }
 0x671   :  { %3301 = vmatpush3.msra.mxu0 %v2310_v62  ;;  %2761 = vmatpush2.msra.mxu1 %v2638_v31  ;;  %v2630_v62 = vld [vmem:[%s5573_s8 + $0x3a0] sm:$0xff]  ;;  %v2535_v53 = vld [vmem:[%s5573_s8 + $0xa8] sm:$0xff] }
 0x672   :  { %3302 = vmatprep.subr.mxu0 %v2325_v54  ;;  %2762 = vmatprep.subr.mxu1 %v2637_v3  ;;  %v2629_v54 = vld [vmem:[%s5573_s8 + $0x398] sm:$0xff]  ;;  %v2534_v31 = vld [vmem:[%s5573_s8 + $0xa0] sm:$0xff] }
 0x673   :  { %3303 = vmatpush3.msra.mxu0 %v2309_v5  ;;  %2763 = vmatpush2.msra.mxu1 %v2636_v20  ;;  %v2628_v5 = vld [vmem:[%s5573_s8 + $0x390] sm:$0xff]  ;;  %v2533_v3 = vld [vmem:[%s5573_s8 + $0x98] sm:$0xff] }
 0x674   :  { %3304 = vmatprep.subr.mxu0 %v2324_v46  ;;  %2764 = vmatprep.subr.mxu1 %v2635_v56  ;;  %v2627_v46 = vld [vmem:[%s5573_s8 + $0x388] sm:$0xff]  ;;  %v2532_v20 = vld [vmem:[%s5573_s8 + $0x90] sm:$0xff] }
 0x675   :  { %3305 = vmatpush3.msra.mxu0 %v2308_v10  ;;  %2765 = vmatpush2.msra.mxu1 %v2634_v35  ;;  %v2626_v10 = vld [vmem:[%s5573_s8 + $0x380] sm:$0xff]  ;;  %v2531_v56 = vld [vmem:[%s5573_s8 + $0x88] sm:$0xff] }
 0x676   :  { %3306 = vmatprep.subr.mxu0 %v2323_v58  ;;  %2766 = vmatprep.subr.mxu1 %v2633_v11  ;;  %v2625_v58 = vld [vmem:[%s5573_s8 + $0x378] sm:$0xff]  ;;  %v2530_v35 = vld [vmem:[%s5573_s8 + $0x80] sm:$0xff] }
 0x677   :  { %3307 = vmatpush3.msra.mxu0 %v2307_v17  ;;  %2767 = vmatpush2.msra.mxu1 %v2632_v6  ;;  %v2624_v17 = vld [vmem:[%s5573_s8 + $0x370] sm:$0xff]  ;;  %v2529_v11 = vld [vmem:[%s5573_s8 + $0x78] sm:$0xff] }
 0x678   :  { %3308 = vmatprep.subr.mxu0 %v2322_v19  ;;  %2768 = vmatprep.subr.mxu1 %v2631_v18  ;;  %v2623_v19 = vld [vmem:[%s5573_s8 + $0x368] sm:$0xff]  ;;  %v2528_v6 = vld [vmem:[%s5573_s8 + $0x70] sm:$0xff] }
 0x679   :  { %3309 = vmatpush3.msra.mxu0 %v2306_v22  ;;  %2769 = vmatpush2.msra.mxu1 %v2630_v62  ;;  %v2622_v22 = vld [vmem:[%s5573_s8 + $0x360] sm:$0xff]  ;;  %v2527_v18 = vld [vmem:[%s5573_s8 + $0x68] sm:$0xff] }
 0x67a   :  { %3310 = vmatprep.subr.mxu0 %v2321_v23  ;;  %2770 = vmatprep.subr.mxu1 %v2629_v54  ;;  %v2526_v62 = vld [vmem:[%s5573_s8 + $0x60] sm:$0xff]  ;;  %v2525_v54 = vld [vmem:[%s5573_s8 + $0x58] sm:$0xff] }
 0x67b   :  { %3311 = vmatpush3.msra.mxu0 %v2305_v12  ;;  %2771 = vmatpush2.msra.mxu1 %v2628_v5  ;;  %v2348_v12 = vld [vmem:[%s5572_s7 + $0x178] sm:$0xff]  ;;  %v2524_v5 = vld [vmem:[%s5573_s8 + $0x50] sm:$0xff] }
 0x67c   :  { %3312 = vmatprep.subr.mxu0 %v2320_v42  ;;  %2772 = vmatprep.subr.mxu1 %v2627_v46  ;;  %v2523_v46 = vld [vmem:[%s5573_s8 + $0x48] sm:$0xff] }
 0x67d   :  { %3313 = vmatpush3.msra.mxu0 %v2304_v21  ;;  %2773 = vmatpush2.msra.mxu1 %v2626_v10  ;;  %v2363_v21 = vld [vmem:[%s5572_s7 + $0x1f0] sm:$0xff]  ;;  %v2522_v10 = vld [vmem:[%s5573_s8 + $0x40] sm:$0xff] }
 0x67e   :  { %3314 = vmatprep.subr.mxu0 %v2319_v60  ;;  %2774 = vmatprep.subr.mxu1 %v2625_v58  ;;  %v2347_v60 = vld [vmem:[%s5572_s7 + $0x170] sm:$0xff]  ;;  %v2521_v58 = vld [vmem:[%s5573_s8 + $0x38] sm:$0xff] }
 0x67f   :  { %3315 = vmatpush3.msra.mxu0 %v2303_v15  ;;  %2775 = vmatpush2.msra.mxu1 %v2624_v17  ;;  %v2362_v15 = vld [vmem:[%s5572_s7 + $0x1e8] sm:$0xff]  ;;  %v2520_v17 = vld [vmem:[%s5573_s8 + $0x30] sm:$0xff] }
 0x680   :  { %3316 = vmatprep.subr.mxu0 %v2318_v7  ;;  %2776 = vmatprep.subr.mxu1 %v2623_v19  ;;  %v2519_v19 = vld [vmem:[%s5573_s8 + $0x28] sm:$0xff] }
 0x681   :  { %3317 = vmatpush3.msra.mxu0 %v2302_v51  ;;  %2777 = vmatpush2.msra.mxu1 %v2622_v22  ;;  %v2346_v51 = vld [vmem:[%s5572_s7 + $0x168] sm:$0xff]  ;;  %v2518_v22 = vld [vmem:[%s5573_s8 + $0x20] sm:$0xff] }
 0x682   :  { %3318 = vmatprep.subr.mxu0 %v2317_v43  ;;  %v2361_v43 = vld [vmem:[%s5572_s7 + $0x1e0] sm:$0xff] }
 0x683   :  { %3319 = vmatpush3.msra.mxu0 %v2301_v59  ;;  %v2345_v59 = vld [vmem:[%s5572_s7 + $0x160] sm:$0xff] }
 0x684   :  { %3323 = vmatprep.subr.mxu0 %v2364_v4  ;;  %v2360_v4 = vld [vmem:[%s5572_s7 + $0x1d8] sm:$0xff] }
 0x724   :  { %v3534_v23 = vpop.f32.mrf.mxu0 }
 0x725   :  { %2430 = vmatprep.mubr.f32.mxu0 %v3534_v23  ;;  %v2517_v23 = vld [vmem:[%s5573_s8 + $0x18] sm:$0xff] }
 0x726   :  { %v2282_v42 = vpop.f32.mrf.mxu0 }
 0x727   :  { %2431 = vmatmul.mubr.f32.vlgmr.msra.gmra.mxu0 %v2282_v42  ;;  %v2515_v42 = vld [vmem:[%s5573_s8 + $0x8] sm:$0xff] }
 0x728   :  { %3324 = vmatpush3.msra.mxu0 %v2348_v12  ;;  %v3537_v7 = vpop.f32.mrf.mxu0  ;;  %v2516_v12 = vld [vmem:[%s5573_s8 + $0x10] sm:$0xff] }
 0x729   :  { %3325 = vmatprep.subr.mxu0 %v2363_v21  ;;  %2500 = vmatprep.mubr.f32.mxu0 %v3537_v7  ;;  %v2514_v21 = vld [vmem:[%s5573_s8] sm:$0xff]  ;;  %v2621_v7 = vld [vmem:[%s5573_s8 + $0x358] sm:$0xff] }
 0x72a   :  { %3326 = vmatpush3.msra.mxu0 %v2347_v60  ;;  %v2292_v50 = vpop.f32.mrf.mxu0  ;;  %v2577_v60 = vld [vmem:[%s5573_s8 + $0x1f8] sm:$0xff]  ;;  %2778 = vmatprep.subr.mxu1 %v2621_v7 }
 0x72b   :  { %3327 = vmatprep.subr.mxu0 %v2362_v15  ;;  %v2576_v15 = vld [vmem:[%s5573_s8 + $0x1f0] sm:$0xff]  ;;  %v2804_v7 = vld [vmem:[%s5574_s9 + $0x38] sm:$0xff] }
 0x72c   :  { %3328 = vmatpush3.msra.mxu0 %v2346_v51  ;;  %v2575_v51 = vld [vmem:[%s5573_s8 + $0x1e8] sm:$0xff] }
 0x72d   :  { %3329 = vmatprep.subr.mxu0 %v2361_v43  ;;  %v2620_v43 = vld [vmem:[%s5573_s8 + $0x350] sm:$0xff] }
 0x72e   :  { %3330 = vmatpush3.msra.mxu0 %v2345_v59  ;;  %v2574_v59 = vld [vmem:[%s5573_s8 + $0x1e0] sm:$0xff]  ;;  %2779 = vmatpush2.msra.mxu1 %v2620_v43  ;;  %v2802_v43 = vld [vmem:[%s5574_s9 + $0x28] sm:$0xff] }
 0x72f   :  { %3331 = vmatprep.subr.mxu0 %v2360_v4  ;;  %v2573_v4 = vld [vmem:[%s5573_s8 + $0x1d8] sm:$0xff] }
 0x730   :  { %3332 = vmatpush3.msra.mxu0 %v2344_v24  ;;  %v2572_v24 = vld [vmem:[%s5573_s8 + $0x1d0] sm:$0xff] }
 0x731   :  { %3333 = vmatprep.subr.mxu0 %v2359_v14  ;;  %v2571_v14 = vld [vmem:[%s5573_s8 + $0x1c8] sm:$0xff] }
 0x732   :  { %3334 = vmatpush3.msra.mxu0 %v2343_v26  ;;  %v2570_v26 = vld [vmem:[%s5573_s8 + $0x1c0] sm:$0xff] }
 0x733   :  { %3335 = vmatprep.subr.mxu0 %v2358_v1  ;;  %v2619_v1 = vld [vmem:[%s5573_s8 + $0x348] sm:$0xff] }
 0x734   :  { %3336 = vmatpush3.msra.mxu0 %v2342_v27  ;;  %v2618_v27 = vld [vmem:[%s5573_s8 + $0x340] sm:$0xff]  ;;  %2780 = vmatprep.subr.mxu1 %v2619_v1 }
 0x735   :  { %3337 = vmatprep.subr.mxu0 %v2357_v30  ;;  %v2569_v30 = vld [vmem:[%s5573_s8 + $0x1b8] sm:$0xff]  ;;  %2781 = vmatpush2.msra.mxu1 %v2618_v27  ;;  %v2821_v1 = vld [vmem:[%s5574_s9 + $0xc0] sm:$0xff] }
 0x736   :  { %3338 = vmatpush3.msra.mxu0 %v2341_v36  ;;  %v2568_v36 = vld [vmem:[%s5573_s8 + $0x1b0] sm:$0xff]  ;;  %v2820_v27 = vld [vmem:[%s5574_s9 + $0xb8] sm:$0xff] }
 0x737   :  { %3339 = vmatprep.subr.mxu0 %v2356_v32  ;;  %v2567_v32 = vld [vmem:[%s5573_s8 + $0x1a8] sm:$0xff] }
 0x738   :  { %3340 = vmatpush3.msra.mxu0 %v2340_v34  ;;  %v2617_v34 = vld [vmem:[%s5573_s8 + $0x338] sm:$0xff] }
 0x739   :  { %3341 = vmatprep.subr.mxu0 %v2355_v38  ;;  %v2566_v38 = vld [vmem:[%s5573_s8 + $0x1a0] sm:$0xff]  ;;  %2782 = vmatprep.subr.mxu1 %v2617_v34  ;;  %v2816_v34 = vld [vmem:[%s5574_s9 + $0x98] sm:$0xff] }
 0x73a   :  { %3342 = vmatpush3.msra.mxu0 %v2339_v40  ;;  %v2616_v40 = vld [vmem:[%s5573_s8 + $0x330] sm:$0xff] }
 0x73b   :  { %3343 = vmatprep.subr.mxu0 %v2354_v44  ;;  %v2565_v44 = vld [vmem:[%s5573_s8 + $0x198] sm:$0xff]  ;;  %2783 = vmatpush2.msra.mxu1 %v2616_v40  ;;  %v2814_v40 = vld [vmem:[%s5574_s9 + $0x88] sm:$0xff] }
 0x73c   :  { %3344 = vmatpush3.msra.mxu0 %v2338_v52  ;;  %v2564_v52 = vld [vmem:[%s5573_s8 + $0x190] sm:$0xff] }
 0x73d   :  { %3345 = vmatprep.subr.mxu0 %v2353_v45  ;;  %v2563_v45 = vld [vmem:[%s5573_s8 + $0x188] sm:$0xff] }
 0x73e   :  { %3346 = vmatpush3.msra.mxu0 %v2337_v2  ;;  %v2562_v2 = vld [vmem:[%s5573_s8 + $0x180] sm:$0xff] }
 0x73f   :  { %3347 = vmatprep.subr.mxu0 %v2352_v13  ;;  %v2561_v13 = vld [vmem:[%s5573_s8 + $0x178] sm:$0xff] }
 0x740   :  { %3348 = vmatpush3.msra.mxu0 %v2336_v41  ;;  %v2560_v41 = vld [vmem:[%s5573_s8 + $0x170] sm:$0xff] }
 0x741   :  { %3349 = vmatprep.subr.mxu0 %v2351_v55  ;;  %v2559_v55 = vld [vmem:[%s5573_s8 + $0x168] sm:$0xff] }
 0x742   :  { %3350 = vmatpush3.msra.mxu0 %v2335_v48  ;;  %v2558_v48 = vld [vmem:[%s5573_s8 + $0x160] sm:$0xff] }
 0x743   :  { %3351 = vmatprep.subr.mxu0 %v2350_v28  ;;  %v2557_v28 = vld [vmem:[%s5573_s8 + $0x158] sm:$0xff] }
 0x744   :  { %3352 = vmatpush3.msra.mxu0 %v2334_v29  ;;  %v2556_v29 = vld [vmem:[%s5573_s8 + $0x150] sm:$0xff] }
 0x745   :  { %3353 = vmatprep.subr.mxu0 %v2349_v47  ;;  %v2555_v47 = vld [vmem:[%s5573_s8 + $0x148] sm:$0xff] }
 0x746   :  { %3354 = vmatpush3.msra.mxu0 %v2333_v57  ;;  %v2554_v57 = vld [vmem:[%s5573_s8 + $0x140] sm:$0xff] }
 0x747   :  { %2501 = vmatmul.mubr.f32.vlgmr.msra.gmra.mxu0 %v2292_v50  ;;  %2655 = vmatprep.subr.mxu0 %v2545_v9  ;;  %v2553_v9 = vld [vmem:[%s5573_s8 + $0x138] sm:$0xff]  ;;  %v2615_v50 = vld [vmem:[%s5573_s8 + $0x328] sm:$0xff] }
 0x748   :  { %2656 = vmatpush1.msra.mxu0 %v2544_v39  ;;  %v2552_v39 = vld [vmem:[%s5573_s8 + $0x130] sm:$0xff]  ;;  %2784 = vmatprep.subr.mxu1 %v2615_v50 }
 0x749   :  { %2657 = vmatprep.subr.mxu0 %v2543_v49  ;;  %v2551_v49 = vld [vmem:[%s5573_s8 + $0x128] sm:$0xff] }
 0x74a   :  { %2658 = vmatpush1.msra.mxu0 %v2542_v61  ;;  %v2614_v61 = vld [vmem:[%s5573_s8 + $0x320] sm:$0xff] }
 0x74b   :  { %2659 = vmatprep.subr.mxu0 %v2541_v8  ;;  %v2550_v8 = vld [vmem:[%s5573_s8 + $0x120] sm:$0xff]  ;;  %2785 = vmatpush2.msra.mxu1 %v2614_v61 }
 0x74c   :  { %2660 = vmatpush1.msra.mxu0 %v2540_v33  ;;  %v2549_v33 = vld [vmem:[%s5573_s8 + $0x118] sm:$0xff] }
 0x74d   :  { %2661 = vmatprep.subr.mxu0 %v2539_v16  ;;  %v2613_v16 = vld [vmem:[%s5573_s8 + $0x318] sm:$0xff] }
 0x74e   :  { %2662 = vmatpush1.msra.mxu0 %v2538_v37  ;;  %2786 = vmatprep.subr.mxu1 %v2613_v16  ;;  %v2548_v37 = vld [vmem:[%s5573_s8 + $0x110] sm:$0xff] }
 0x74f   :  { %2663 = vmatprep.subr.mxu0 %v2537_v25  ;;  %v2612_v25 = vld [vmem:[%s5573_s8 + $0x310] sm:$0xff] }
 0x750   :  { %2664 = vmatpush1.msra.mxu0 %v2536_v63  ;;  %2787 = vmatpush2.msra.mxu1 %v2612_v25  ;;  %v2547_v63 = vld [vmem:[%s5573_s8 + $0x108] sm:$0xff] }
 0x751   :  { %2665 = vmatprep.subr.mxu0 %v2535_v53  ;;  %v2611_v53 = vld [vmem:[%s5573_s8 + $0x308] sm:$0xff] }
 0x752   :  { %2666 = vmatpush1.msra.mxu0 %v2534_v31  ;;  %v2546_v31 = vld [vmem:[%s5573_s8 + $0x100] sm:$0xff]  ;;  %2788 = vmatprep.subr.mxu1 %v2611_v53 }
 0x753   :  { %2667 = vmatprep.subr.mxu0 %v2533_v3  ;;  %v2610_v3 = vld [vmem:[%s5573_s8 + $0x300] sm:$0xff] }
 0x754   :  { %2668 = vmatpush1.msra.mxu0 %v2532_v20  ;;  %2789 = vmatpush2.msra.mxu1 %v2610_v3 }
 0x755   :  { %2669 = vmatprep.subr.mxu0 %v2531_v56 }
 0x756   :  { %2670 = vmatpush1.msra.mxu0 %v2530_v35 }
 0x757   :  { %2671 = vmatprep.subr.mxu0 %v2529_v11  ;;  %v2365_v11 = vld [vmem:[%s5567_s10 + $0x3] ss:$0 sm:$0xff] }
 0x758   :  { %2672 = vmatpush1.msra.mxu0 %v2528_v6 }
 0x759   :  { %2673 = vmatprep.subr.mxu0 %v2527_v18 }
 0x75a   :  { %2674 = vmatpush1.msra.mxu0 %v2526_v62 }
 0x75b   :  { %2675 = vmatprep.subr.mxu0 %v2525_v54 }
 0x75c   :  { %2676 = vmatpush1.msra.mxu0 %v2524_v5 }
 0x75d   :  { %2677 = vmatprep.subr.mxu0 %v2523_v46 }
 0x75e   :  { %2678 = vmatpush1.msra.mxu0 %v2522_v10 }
 0x75f   :  { %2679 = vmatprep.subr.mxu0 %v2521_v58 }
 0x760   :  { %2680 = vmatpush1.msra.mxu0 %v2520_v17 }
 0x761   :  { %2681 = vmatprep.subr.mxu0 %v2519_v19  ;;  %v2812_v19 = vld [vmem:[%s5574_s9 + $0x78] sm:$0xff] }
 0x762   :  { %2682 = vmatpush1.msra.mxu0 %v2518_v22  ;;  %v2811_v22 = vld [vmem:[%s5574_s9 + $0x70] sm:$0xff] }
 0x763   :  { %2683 = vmatprep.subr.mxu0 %v2517_v23  ;;  %v2810_v23 = vld [vmem:[%s5574_s9 + $0x68] sm:$0xff] }
 0x764   :  { %2684 = vmatpush1.msra.mxu0 %v2516_v12  ;;  %v2809_v12 = vld [vmem:[%s5574_s9 + $0x60] sm:$0xff] }
 0x765   :  { %2685 = vmatprep.subr.mxu0 %v2515_v42  ;;  %v2808_v42 = vld [vmem:[%s5574_s9 + $0x58] sm:$0xff] }
 0x766   :  { %2686 = vmatpush1.msra.mxu0 %v2514_v21  ;;  %v2807_v21 = vld [vmem:[%s5574_s9 + $0x50] sm:$0xff] }
 0x767   :  { %2687 = vmatprep.subr.mxu0 %v2577_v60  ;;  %v2806_v60 = vld [vmem:[%s5574_s9 + $0x48] sm:$0xff] }
 0x768   :  { %2688 = vmatpush2.msra.mxu0 %v2576_v15  ;;  %v2805_v15 = vld [vmem:[%s5574_s9 + $0x40] sm:$0xff] }
 0x769   :  { %2689 = vmatprep.subr.mxu0 %v2575_v51  ;;  %v2803_v51 = vld [vmem:[%s5574_s9 + $0x30] sm:$0xff] }
 0x76a   :  { %2690 = vmatpush2.msra.mxu0 %v2574_v59  ;;  %v2801_v59 = vld [vmem:[%s5574_s9 + $0x20] sm:$0xff] }
 0x76b   :  { %2691 = vmatprep.subr.mxu0 %v2573_v4  ;;  %v2800_v4 = vld [vmem:[%s5574_s9 + $0x18] sm:$0xff] }
 0x76c   :  { %2692 = vmatpush2.msra.mxu0 %v2572_v24  ;;  %v2799_v24 = vld [vmem:[%s5574_s9 + $0x10] sm:$0xff] }
 0x76d   :  { %2693 = vmatprep.subr.mxu0 %v2571_v14  ;;  %v2798_v14 = vld [vmem:[%s5574_s9 + $0x8] sm:$0xff] }
 0x76e   :  { %2694 = vmatpush2.msra.mxu0 %v2570_v26  ;;  %v2797_v26 = vld [vmem:[%s5574_s9] sm:$0xff] }
 0x76f   :  { %2695 = vmatprep.subr.mxu0 %v2569_v30  ;;  %v2819_v30 = vld [vmem:[%s5574_s9 + $0xb0] sm:$0xff] }
 0x770   :  { %2696 = vmatpush2.msra.mxu0 %v2568_v36  ;;  %v2818_v36 = vld [vmem:[%s5574_s9 + $0xa8] sm:$0xff] }
 0x771   :  { %2697 = vmatprep.subr.mxu0 %v2567_v32  ;;  %v2817_v32 = vld [vmem:[%s5574_s9 + $0xa0] sm:$0xff] }
 0x772   :  { %2698 = vmatpush2.msra.mxu0 %v2566_v38  ;;  %v2815_v38 = vld [vmem:[%s5574_s9 + $0x90] sm:$0xff] }
 0x773   :  { %2699 = vmatprep.subr.mxu0 %v2565_v44  ;;  %v2813_v44 = vld [vmem:[%s5574_s9 + $0x80] sm:$0xff] }
 0x774   :  { %2700 = vmatpush2.msra.mxu0 %v2564_v52  ;;  %v2645_v52 = vlaneseq }
 0x775   :  { %2701 = vmatprep.subr.mxu0 %v2563_v45 }
 0x776   :  { %2702 = vmatpush2.msra.mxu0 %v2562_v2  ;;  %v2646_v45 = vshrl.u32 %v2645_v52, 7 }
 0x777   :  { %2703 = vmatprep.subr.mxu0 %v2561_v13  ;;  %v3024_v13 = vld [vmem:[%s5567_s10 + $0x4] ss:$8 sm:$0x3] }
 0x778   :  { %2704 = vmatpush2.msra.mxu0 %v2560_v41  ;;  %v2647_v2 = vsub.s32 0, %v2646_v45  ;;  %v2651_v41 = vsub.s32 1, %v2646_v45 }
 0x779   :  { %2705 = vmatprep.subr.mxu0 %v2559_v55 }
 0x77a   :  { %2706 = vmatpush2.msra.mxu0 %v2558_v48  ;;  %v2648_v55 = vrot.slane %v3024_v13, %v2647_v2  ;;  %v2652_v48 = vrot.slane %v3024_v13, %v2651_v41 }
 0x77b   :  { %2707 = vmatprep.subr.mxu0 %v2557_v28 }
 0x77c   :  { %2708 = vmatpush2.msra.mxu0 %v2556_v29 }
 0x77d   :  { %2709 = vmatprep.subr.mxu0 %v2555_v47 }
 0x77e   :  { %2710 = vmatpush2.msra.mxu0 %v2554_v57 }
 0x77f   :  { %2711 = vmatprep.subr.mxu0 %v2553_v9 }
 0x780   :  { %2712 = vmatpush2.msra.mxu0 %v2552_v39 }
 0x781   :  { %2713 = vmatprep.subr.mxu0 %v2551_v49  ;;  %v2822_v49 = vld [vmem:[%s5567_s10 + $0x5] ss:$0 sm:$0xff] }
 0x782   :  { %2714 = vmatpush2.msra.mxu0 %v2550_v8 }
 0x783   :  { %2715 = vmatprep.subr.mxu0 %v2549_v33 }
 0x784   :  { %2716 = vmatpush2.msra.mxu0 %v2548_v37 }
 0x785   :  { %2717 = vmatprep.subr.mxu0 %v2547_v63 }
 0x786   :  { %2718 = vmatpush2.msra.mxu0 %v2546_v31 }
 0x787   :  { %2827 = vmatprep.subr.mxu0 %v3674_v0 }
 0x7e7   :  { %v3320_v20 = vpop.f32.mrf.mxu0 }
 0x7e9   :  { %v3321_v56 = vpop.f32.mrf.mxu0 }
 0x7ea   :  { %v3322_v35 = vadd.f32 %v3321_v56, %v3320_v20 }
 0x7ec   :  { %v2433_v62 = vadd.f32 %v3322_v35, %v2365_v11 }
 0x807   :  { %v3355_v6 = vpop.f32.mrf.mxu0 }
 0x809   :  { %v3356_v18 = vpop.f32.mrf.mxu0 }
 0x80a   :  { %v3357_v54 = vadd.f32 %v3356_v18, %v3355_v6 }
 0x80c   :  { %v2503_v5 = vadd.f32 %v3357_v54, %v2433_v62 }
 0x80e   :  { %v2506_v46 = vmax.f32 %v2503_v5, 0.0 }
 0x810   :  { %v2510_v10 = vrot.slane %v2506_v46, 2  ;;  %v2508_v58 = vrot.slane %v2506_v46, 1  ;;  %v2512_v17 = vrot.slane %v2506_v46, 3 }
 0x812   :  { %2719 = vmatprep.mubr.f32.mxu0 %v2508_v58  ;;  %2790 = vmatprep.mubr.f32.mxu1 %v2512_v17 }
 0x813   :  { %2720 = vmatmul.mubr.f32.vlgmr.msra.gmra.mxu0 %v2506_v46  ;;  %2791 = vmatmul.mubr.f32.vlgmr.msra.gmra.mxu1 %v2510_v10 }
 0x814   :  { %2828 = vmatpush1.msra.mxu0 %v2812_v19 }
 0x815   :  { %2829 = vmatprep.subr.mxu0 %v3674_v0 }
 0x816   :  { %2830 = vmatpush1.msra.mxu0 %v2811_v22 }
 0x817   :  { %2831 = vmatprep.subr.mxu0 %v3674_v0 }
 0x818   :  { %2832 = vmatpush1.msra.mxu0 %v2810_v23 }
 0x819   :  { %2833 = vmatprep.subr.mxu0 %v3674_v0 }
 0x81a   :  { %2834 = vmatpush1.msra.mxu0 %v2809_v12 }
 0x81b   :  { %2835 = vmatprep.subr.mxu0 %v3674_v0 }
 0x81c   :  { %2836 = vmatpush1.msra.mxu0 %v2808_v42 }
 0x81d   :  { %2837 = vmatprep.subr.mxu0 %v3674_v0 }
 0x81e   :  { %2838 = vmatpush1.msra.mxu0 %v2807_v21 }
 0x81f   :  { %2839 = vmatprep.subr.mxu0 %v3674_v0 }
 0x820   :  { %2840 = vmatpush1.msra.mxu0 %v2806_v60 }
 0x821   :  { %2841 = vmatprep.subr.mxu0 %v3674_v0 }
 0x822   :  { %2842 = vmatpush1.msra.mxu0 %v2805_v15 }
 0x823   :  { %2843 = vmatprep.subr.mxu0 %v3674_v0 }
 0x824   :  { %2844 = vmatpush1.msra.mxu0 %v2804_v7 }
 0x825   :  { %2845 = vmatprep.subr.mxu0 %v3674_v0 }
 0x826   :  { %2846 = vmatpush1.msra.mxu0 %v2803_v51 }
 0x827   :  { %2847 = vmatprep.subr.mxu0 %v3674_v0 }
 0x828   :  { %2848 = vmatpush1.msra.mxu0 %v2802_v43 }
 0x829   :  { %2849 = vmatprep.subr.mxu0 %v3674_v0 }
 0x82a   :  { %2850 = vmatpush1.msra.mxu0 %v2801_v59 }
 0x82b   :  { %2851 = vmatprep.subr.mxu0 %v3674_v0 }
 0x82c   :  { %2852 = vmatpush1.msra.mxu0 %v2800_v4 }
 0x82d   :  { %2853 = vmatprep.subr.mxu0 %v3674_v0 }
 0x82e   :  { %2854 = vmatpush1.msra.mxu0 %v2799_v24 }
 0x82f   :  { %2855 = vmatprep.subr.mxu0 %v3674_v0 }
 0x830   :  { %2856 = vmatpush1.msra.mxu0 %v2798_v14 }
 0x831   :  { %2857 = vmatprep.subr.mxu0 %v3674_v0 }
 0x832   :  { %2858 = vmatpush1.msra.mxu0 %v2797_v26 }
 0x833   :  { %2873 = vmatprep.subr.mxu0 %v3674_v0 }
 0x834   :  { %2874 = vmatpush2.msra.mxu0 %v2821_v1 }
 0x835   :  { %2875 = vmatprep.subr.mxu0 %v3674_v0 }
 0x836   :  { %2876 = vmatpush2.msra.mxu0 %v2820_v27 }
 0x837   :  { %2877 = vmatprep.subr.mxu0 %v3674_v0 }
 0x838   :  { %2878 = vmatpush2.msra.mxu0 %v2819_v30 }
 0x839   :  { %2879 = vmatprep.subr.mxu0 %v3674_v0 }
 0x83a   :  { %2880 = vmatpush2.msra.mxu0 %v2818_v36 }
 0x83b   :  { %2881 = vmatprep.subr.mxu0 %v3674_v0 }
 0x83c   :  { %2882 = vmatpush2.msra.mxu0 %v2817_v32 }
 0x83d   :  { %2883 = vmatprep.subr.mxu0 %v3674_v0 }
 0x83e   :  { %2884 = vmatpush2.msra.mxu0 %v2816_v34 }
 0x83f   :  { %2885 = vmatprep.subr.mxu0 %v3674_v0 }
 0x840   :  { %2886 = vmatpush2.msra.mxu0 %v2815_v38 }
 0x841   :  { %2887 = vmatprep.subr.mxu0 %v3674_v0 }
 0x842   :  { %2888 = vmatpush2.msra.mxu0 %v2814_v40 }
 0x843   :  { %2889 = vmatprep.subr.mxu0 %v3674_v0 }
 0x844   :  { %2890 = vmatpush2.msra.mxu0 %v2813_v44 }
 0x8d3   :  { %v2721_v28 = vpop.f32.mrf.mxu0  ;;  %v2792_v29 = vpop.f32.mrf.mxu1 }
 0x8d4   :  { %v2722_v47 = vadd.f32 %v2721_v28, %v2648_v55 }
 0x8d5   :  { %v2723_v57 = vpop.f32.mrf.mxu0  ;;  %v2794_v39 = vpop.f32.mrf.mxu1 }
 0x8d6   :  { %v2724_v9 = vadd.f32 %v2723_v57, %v2652_v48  ;;  %v2793_v0 = vadd.f32 %v2792_v29, %v2722_v47 }
 0x8d8   :  { %v2795_v50 = vadd.f32 %v2794_v39, %v2724_v9 }
 0x8da   :  { %3025 = vmatprep.mubr.msk.f32.mxu0 %vm2823_vm10, %v2795_v50 }
 0x8db   :  { %2892 = vmatmul.mubr.f32.vlgmr.msra.gmra.mxu0 %v2793_v0 }
 0x99b   :  { %v2893_v61 = vpop.f32.mrf.mxu0 }
 0x99c   :  { %v2894_v8 = vadd.f32 %v2893_v61, %v2822_v49 }
 0x99d   :  { %v2895_v33 = vpop.f32.mrf.mxu0 }
 0x99e   :  { %2898 = vst.msk [vmem:[%s5575_s11] sm:$0x1] %vm2897_vm11, %v2894_v8 }

</bundles_post_ra>
